<compile_context>
chip_gen: v5e
topology: v5e:2x2
jax: 0.10.0
libtpu: 0.0.40
codegen_flags: <defaults>
</compile_context>

<pallas_src>
import functools

import jax
import jax.numpy as jnp
import numpy as np
from jax.experimental import pallas as pl
from jax.experimental.pallas import tpu as pltpu


def _round_up(x, m):
    return ((x + m - 1) // m) * m


# ------------------------------ fused kernel -------------------------------- #

def mtl_gru_kernel(x_ref, wih_sh_ref, whh_sh_ref, bgi_sh_ref, bhn_sh_ref,
                   wih_t_ref, whh_t_ref, bgi_t_ref, bhn_t_ref,
                   wo_ref, bo_ref, out_ref, *, T, Bp, H1p, Gp):
    """Whole MTL_GRU forward in a single kernel invocation.

    All hidden/gate dims are zero-padded so that every gate occupies a whole
    multiple of 128 lanes and the batch Bp is a multiple of 8 sublanes.

    x_ref   : (T*Bp, D)       time-major, flattened (row = t*Bp + b)
    wih_sh  : (D, 3*H1p)      shared GRU input weights, gate order [r|z|n]
    whh_sh  : (H1p, 3*H1p)    shared GRU hidden weights
    bgi_sh  : (1, 3*H1p)      b_ih with b_hh pre-folded for the r,z gates
    bhn_sh  : (1, H1p)        b_hn (must stay inside r*(...))
    wih_t   : (H1p, 3*Gp)     all task heads fused; per-gate columns = tasks concat
    whh_t   : (Gp, 3*Gp)      block-diagonal per gate
    bgi_t   : (1, 3*Gp)
    bhn_t   : (1, Gp)
    wo      : (Gp, NFp)       block-diagonal last-step Linear layers
    bo      : (1, NFp)
    out_ref : (Bp, NFp)       lane-dense padded output slab
    """
    # Hoisted whole-tensor loads.
    whh_sh = whh_sh_ref[...]
    bhn_sh = bhn_sh_ref[...]
    wih_t = wih_t_ref[...]
    whh_t = whh_t_ref[...]
    bgi_t = bgi_t_ref[...]
    bhn_t = bhn_t_ref[...]

    # Phase 1: shared-GRU input projection for ALL timesteps — one matmul, off
    # the serial path. Per-step slices below are tile-aligned because Bp % 8 == 0.
    gi_sh = (jnp.dot(x_ref[...], wih_sh_ref[...],
                     preferred_element_type=jnp.float32) + bgi_sh_ref[...])

    def gru_gates(gi, gh, bhn, hdim, h_prev):
        # Gate blocks are 128-lane aligned (hdim % 128 == 0): whole-vreg slices.
        r = jax.nn.sigmoid(gi[:, :hdim] + gh[:, :hdim])
        z = jax.nn.sigmoid(gi[:, hdim:2 * hdim] + gh[:, hdim:2 * hdim])
        n = jnp.tanh(gi[:, 2 * hdim:] + r * (gh[:, 2 * hdim:] + bhn))
        return (1.0 - z) * n + z * h_prev

    h1 = jnp.zeros((Bp, H1p), jnp.float32)
    h2 = jnp.zeros((Bp, Gp), jnp.float32)

    # Phase 2: interleaved recurrences — per timestep: shared step, fused head
    # input projection, fused block-diagonal head step. Nothing T-sized is live.
    # T is small & static -> fully unrolled; for T >~ 16 switch to
    # lax.fori_loop(..., unroll=4..8) to cap code size / vreg pressure.
    for t in range(T):
        gi1 = gi_sh[t * Bp:(t + 1) * Bp, :]                      # whole-tile slice
        gh1 = jnp.dot(h1, whh_sh, preferred_element_type=jnp.float32)
        h1 = gru_gates(gi1, gh1, bhn_sh, H1p, h1)

        gi2 = jnp.dot(h1, wih_t, preferred_element_type=jnp.float32) + bgi_t
        gh2 = jnp.dot(h2, whh_t, preferred_element_type=jnp.float32)
        h2 = gru_gates(gi2, gh2, bhn_t, Gp, h2)

    # Phase 3: last-step Linear for all heads -> lane-dense padded (Bp, NFp) slab.
    y = jnp.dot(h2, wo_ref[...], preferred_element_type=jnp.float32) + bo_ref[...]
    out_ref[...] = y.astype(out_ref.dtype)


# -------------------------------- wrapper ------------------------------------ #

def run_mtl_gru(x2d, kp, *, T, Bp, H1p, Gp, NFp):
    operands = (x2d, kp["wih_sh"], kp["whh_sh"], kp["bgi_sh"], kp["bhn_sh"],
                kp["wih_t"], kp["whh_t"], kp["bgi_t"], kp["bhn_t"],
                kp["wo_t"], kp["bo_t"])
    vmem = pltpu.MemorySpace.VMEM
    # No grid -> single invocation, whole arrays resident in VMEM with NO
    # double-buffering (the old trivial-grid spec paid 2x VMEM per weight input).
    # TODO(synk): for large batches on v7x, add a leading "parallel" batch grid
    # axis so the two TensorCores each run an independent slice of the batch.
    return pl.pallas_call(
        functools.partial(mtl_gru_kernel, T=T, Bp=Bp, H1p=H1p, Gp=Gp),
        out_shape=jax.ShapeDtypeStruct((Bp, NFp), jnp.float32),
        in_specs=[pl.BlockSpec(memory_space=vmem) for _ in operands],
        out_specs=pl.BlockSpec(memory_space=vmem),
        compiler_params=pltpu.CompilerParams(vmem_limit_bytes=64 * 1024 * 1024),
    )(*operands)


def mtl_gru_forward(x, params):
    """x: (B, T, data_dim) -> (B, forecast_steps, output_size)."""
    ntask = len(params["tasks"])
    F = params["tasks"][0]["wo"].shape[-1]
    H1 = params["shared"]["whh"].shape[-1]
    H2 = params["tasks"][0]["whh"].shape[-1]
    B, T, D = x.shape

    Bp = _round_up(B, 8)                 # whole sublane tiles on the serial path
    H1p = _round_up(H1, 128)             # whole-vreg gate slices
    Gp = _round_up(ntask * H2, 128)
    NFp = _round_up(ntask * F, 128)      # lane-dense output slab

    kp = pack_params(params, H1p=H1p, Gp=Gp, NFp=NFp)            # layout plumbing

    # time-major, batch padded to a sublane multiple, flattened rows (row = t*Bp + b)
    x_t = jnp.transpose(x, (1, 0, 2))
    x_t = jnp.pad(x_t, ((0, 0), (0, Bp - B), (0, 0)))
    x2d = x_t.reshape(T * Bp, D)

    y = run_mtl_gru(x2d, kp, T=T, Bp=Bp, H1p=H1p, Gp=Gp, NFp=NFp)   # (Bp, NFp)
    y = y[:B, :ntask * F]
    return y.reshape(B, ntask, F).transpose(0, 2, 1)                 # (B, F, ntask)


# ------------------------- parameter creation / packing ----------------------- #

def _init_gru(key, in_dim, hidden):
    """Raw PyTorch-style GRU params, gate order (r, z, n)."""
    k = 1.0 / np.sqrt(hidden)
    ks = jax.random.split(key, 4)
    return {
        "wih": jax.random.uniform(ks[0], (3, in_dim, hidden), jnp.float32, -k, k),
        "whh": jax.random.uniform(ks[1], (3, hidden, hidden), jnp.float32, -k, k),
        "bih": jax.random.uniform(ks[2], (3, 1, hidden), jnp.float32, -k, k),
        "bhh": jax.random.uniform(ks[3], (3, 1, hidden), jnp.float32, -k, k),
    }


def init_params(key, data_dim, output_size, forecast_steps, gru_units):
    h1, h2 = gru_units
    keys = jax.random.split(key, 1 + 2 * output_size)
    params = {"shared": _init_gru(keys[0], data_dim, h1), "tasks": []}
    kl = 1.0 / np.sqrt(h2)
    for i in range(output_size):
        p = _init_gru(keys[1 + 2 * i], h1, h2)
        ko = jax.random.split(keys[2 + 2 * i], 2)
        p["wo"] = jax.random.uniform(ko[0], (h2, forecast_steps), jnp.float32, -kl, kl)
        p["bo"] = jax.random.uniform(ko[1], (1, forecast_steps), jnp.float32, -kl, kl)
        params["tasks"].append(p)
    return params


def pack_params(params, *, H1p, Gp, NFp):
    """Raw params -> fused, gate-/lane-padded single-matmul layouts.

    Stored in f32.  (bf16 weight storage + bf16 MXU operands is the main
    throughput/VMEM lever on v6e/v7x at larger sizes; kept f32 here so the
    kernel matches the f32 reference; gate math must stay f32 regardless.)
    """
    sh = params["shared"]
    D = sh["wih"].shape[1]
    H1 = sh["whh"].shape[-1]
    tasks = params["tasks"]
    H2 = tasks[0]["whh"].shape[-1]
    F = tasks[0]["wo"].shape[-1]

    kp = {}

    # Shared GRU: [r | z | n] column blocks, each zero-padded to H1p lanes.
    wih = jnp.zeros((D, 3 * H1p), jnp.float32)
    whh = jnp.zeros((H1p, 3 * H1p), jnp.float32)
    bgi = jnp.zeros((1, 3 * H1p), jnp.float32)
    for g in range(3):
        wih = wih.at[:, g * H1p:g * H1p + H1].set(sh["wih"][g])
        whh = whh.at[:H1, g * H1p:g * H1p + H1].set(sh["whh"][g])
        b = sh["bih"][g] + (sh["bhh"][g] if g < 2 else 0.0)
        bgi = bgi.at[:, g * H1p:g * H1p + H1].set(b)
    kp["wih_sh"], kp["whh_sh"], kp["bgi_sh"] = wih, whh, bgi
    kp["bhn_sh"] = jnp.zeros((1, H1p), jnp.float32).at[:, :H1].set(sh["bhh"][2])

    # Task heads fused: per gate, tasks concatenated along columns; hidden and
    # output weights block-diagonal; each gate block zero-padded to Gp lanes.
    wih_t = jnp.zeros((H1p, 3 * Gp), jnp.float32)
    whh_t = jnp.zeros((Gp, 3 * Gp), jnp.float32)
    bgi_t = jnp.zeros((1, 3 * Gp), jnp.float32)
    bhn_t = jnp.zeros((1, Gp), jnp.float32)
    wo_t = jnp.zeros((Gp, NFp), jnp.float32)
    bo_t = jnp.zeros((1, NFp), jnp.float32)
    for g in range(3):
        for i, tp in enumerate(tasks):
            c0 = g * Gp + i * H2
            wih_t = wih_t.at[:H1, c0:c0 + H2].set(tp["wih"][g])
            whh_t = whh_t.at[i * H2:(i + 1) * H2, c0:c0 + H2].set(tp["whh"][g])
            b = tp["bih"][g] + (tp["bhh"][g] if g < 2 else 0.0)
            bgi_t = bgi_t.at[:, c0:c0 + H2].set(b)
    for i, tp in enumerate(tasks):
        bhn_t = bhn_t.at[:, i * H2:(i + 1) * H2].set(tp["bhh"][2])
        wo_t = wo_t.at[i * H2:(i + 1) * H2, i * F:(i + 1) * F].set(tp["wo"])
        bo_t = bo_t.at[:, i * F:(i + 1) * F].set(tp["bo"])
    kp["wih_t"], kp["whh_t"], kp["bgi_t"], kp["bhn_t"] = wih_t, whh_t, bgi_t, bhn_t
    kp["wo_t"], kp["bo_t"] = wo_t, bo_t
    return kp


# ----------------------------- pure-JAX reference ----------------------------- #

def _gru_ref(x_tbd, p):
    B = x_tbd.shape[1]
    H = p["whh"].shape[-1]

    def step(h, x_t):
        gi = jnp.einsum("bd,gdh->gbh", x_t, p["wih"]) + p["bih"]
        gh = jnp.einsum("bh,ghk->gbk", h, p["whh"]) + p["bhh"]
        r = jax.nn.sigmoid(gi[0] + gh[0])
        z = jax.nn.sigmoid(gi[1] + gh[1])
        n = jnp.tanh(gi[2] + r * gh[2])
        h_new = (1.0 - z) * n + z * h
        return h_new, h_new

    h0 = jnp.zeros((B, H), jnp.float32)
    _, hs = jax.lax.scan(step, h0, x_tbd)
    return hs


def reference_forward(x, params):
    x_tbd = jnp.transpose(x, (1, 0, 2))
    shared = _gru_ref(x_tbd, params["shared"])
    outs = []
    for tp in params["tasks"]:
        hs = _gru_ref(shared, tp)
        outs.append(hs[-1] @ tp["wo"] + tp["bo"])
    return jnp.transpose(jnp.stack(outs, axis=1), (0, 2, 1))


# ------------------------------------ main ------------------------------------ #

if __name__ == "__main__":
    B, T, DATA_DIM = 2, 8, 8
    OUTPUT_SIZE, FORECAST_STEPS = 3, 4
    GRU_UNITS = [32, 16]

    root = jax.random.PRNGKey(0)
    kx, kp_key = jax.random.split(root)
    x = jax.random.normal(kx, (B, T, DATA_DIM), jnp.float32)
    params = init_params(kp_key, DATA_DIM, OUTPUT_SIZE, FORECAST_STEPS, GRU_UNITS)

    out = jax.block_until_ready(mtl_gru_forward(x, params))
    assert out.shape == (B, FORECAST_STEPS, OUTPUT_SIZE), out.shape

    ref = jax.block_until_ready(reference_forward(x, params))
    np.testing.assert_allclose(np.asarray(out), np.asarray(ref), rtol=1e-5, atol=1e-5)

    print("KERNEL_OK")
</pallas_src>

<mosaic_0001>
module attributes {stable_mosaic.version = 11 : i64} {
  func.func @mtl_gru_kernel(%arg0: memref<64x8xf32, #tpu.memory_space<vmem>>, %arg1: memref<8x384xf32, #tpu.memory_space<vmem>>, %arg2: memref<128x384xf32, #tpu.memory_space<vmem>>, %arg3: memref<1x384xf32, #tpu.memory_space<vmem>>, %arg4: memref<1x128xf32, #tpu.memory_space<vmem>>, %arg5: memref<128x384xf32, #tpu.memory_space<vmem>>, %arg6: memref<128x384xf32, #tpu.memory_space<vmem>>, %arg7: memref<1x384xf32, #tpu.memory_space<vmem>>, %arg8: memref<1x128xf32, #tpu.memory_space<vmem>>, %arg9: memref<128x128xf32, #tpu.memory_space<vmem>>, %arg10: memref<1x128xf32, #tpu.memory_space<vmem>>, %arg11: memref<8x128xf32, #tpu.memory_space<vmem>>) attributes {dimension_semantics = [], scalar_prefetch = 0 : i64, scratch_operands = 0 : i64, tpu.core_type = #tpu.core_type<tc>} {
    %c0 = arith.constant 0 : index
    %c0_0 = arith.constant 0 : index
    %0 = vector.load %arg2[%c0, %c0_0] : memref<128x384xf32, #tpu.memory_space<vmem>>, vector<128x384xf32>
    %c0_1 = arith.constant 0 : index
    %c0_2 = arith.constant 0 : index
    %1 = vector.load %arg4[%c0_1, %c0_2] : memref<1x128xf32, #tpu.memory_space<vmem>>, vector<1x128xf32>
    %c0_3 = arith.constant 0 : index
    %c0_4 = arith.constant 0 : index
    %2 = vector.load %arg5[%c0_3, %c0_4] : memref<128x384xf32, #tpu.memory_space<vmem>>, vector<128x384xf32>
    %c0_5 = arith.constant 0 : index
    %c0_6 = arith.constant 0 : index
    %3 = vector.load %arg6[%c0_5, %c0_6] : memref<128x384xf32, #tpu.memory_space<vmem>>, vector<128x384xf32>
    %c0_7 = arith.constant 0 : index
    %c0_8 = arith.constant 0 : index
    %4 = vector.load %arg7[%c0_7, %c0_8] : memref<1x384xf32, #tpu.memory_space<vmem>>, vector<1x384xf32>
    %c0_9 = arith.constant 0 : index
    %c0_10 = arith.constant 0 : index
    %5 = vector.load %arg8[%c0_9, %c0_10] : memref<1x128xf32, #tpu.memory_space<vmem>>, vector<1x128xf32>
    %c0_11 = arith.constant 0 : index
    %c0_12 = arith.constant 0 : index
    %6 = vector.load %arg0[%c0_11, %c0_12] : memref<64x8xf32, #tpu.memory_space<vmem>>, vector<64x8xf32>
    %c0_13 = arith.constant 0 : index
    %c0_14 = arith.constant 0 : index
    %7 = vector.load %arg1[%c0_13, %c0_14] : memref<8x384xf32, #tpu.memory_space<vmem>>, vector<8x384xf32>
    %cst = arith.constant dense<0.000000e+00> : vector<64x384xf32>
    %8 = tpu.matmul %6, %7, %cst {dimension_numbers = #tpu.dot_dimension_numbers<[1], [0], [0], [1], [0, 0, 1, 1], [], []>} : vector<64x8xf32>, vector<8x384xf32>, vector<64x384xf32> -> vector<64x384xf32>
    %c0_15 = arith.constant 0 : index
    %c0_16 = arith.constant 0 : index
    %9 = vector.load %arg3[%c0_15, %c0_16] : memref<1x384xf32, #tpu.memory_space<vmem>>, vector<1x384xf32>
    %10 = vector.broadcast %9 : vector<1x384xf32> to vector<64x384xf32>
    %11 = arith.addf %8, %10 : vector<64x384xf32>
    %cst_17 = arith.constant 0.000000e+00 : f32
    %12 = vector.broadcast %cst_17 : f32 to vector<8x128xf32>
    %cst_18 = arith.constant 0.000000e+00 : f32
    %13 = vector.broadcast %cst_18 : f32 to vector<8x128xf32>
    %14 = vector.extract_strided_slice %11 {offsets = [0, 0], sizes = [8, 384], strides = [1, 1]} : vector<64x384xf32> to vector<8x384xf32>
    %cst_19 = arith.constant dense<0.000000e+00> : vector<8x384xf32>
    %15 = tpu.matmul %12, %0, %cst_19 {dimension_numbers = #tpu.dot_dimension_numbers<[1], [0], [0], [1], [0, 0, 1, 1], [], []>} : vector<8x128xf32>, vector<128x384xf32>, vector<8x384xf32> -> vector<8x384xf32>
    %16 = vector.extract_strided_slice %14 {offsets = [0, 0], sizes = [8, 128], strides = [1, 1]} : vector<8x384xf32> to vector<8x128xf32>
    %17 = vector.extract_strided_slice %15 {offsets = [0, 0], sizes = [8, 128], strides = [1, 1]} : vector<8x384xf32> to vector<8x128xf32>
    %18 = arith.addf %16, %17 : vector<8x128xf32>
    %19 = arith.negf %18 : vector<8x128xf32>
    %20 = math.exp %19 : vector<8x128xf32>
    %cst_20 = arith.constant 1.000000e+00 : f32
    %21 = vector.broadcast %cst_20 : f32 to vector<8x128xf32>
    %22 = arith.addf %21, %20 : vector<8x128xf32>
    %23 = arith.divf %21, %22 : vector<8x128xf32>
    %24 = vector.extract_strided_slice %14 {offsets = [0, 128], sizes = [8, 128], strides = [1, 1]} : vector<8x384xf32> to vector<8x128xf32>
    %25 = vector.extract_strided_slice %15 {offsets = [0, 128], sizes = [8, 128], strides = [1, 1]} : vector<8x384xf32> to vector<8x128xf32>
    %26 = arith.addf %24, %25 : vector<8x128xf32>
    %27 = arith.negf %26 : vector<8x128xf32>
    %28 = math.exp %27 : vector<8x128xf32>
    %cst_21 = arith.constant 1.000000e+00 : f32
    %29 = vector.broadcast %cst_21 : f32 to vector<8x128xf32>
    %30 = arith.addf %29, %28 : vector<8x128xf32>
    %31 = arith.divf %29, %30 : vector<8x128xf32>
    %32 = vector.extract_strided_slice %14 {offsets = [0, 256], sizes = [8, 128], strides = [1, 1]} : vector<8x384xf32> to vector<8x128xf32>
    %33 = vector.extract_strided_slice %15 {offsets = [0, 256], sizes = [8, 128], strides = [1, 1]} : vector<8x384xf32> to vector<8x128xf32>
    %34 = vector.broadcast %1 : vector<1x128xf32> to vector<8x128xf32>
    %35 = arith.addf %33, %34 : vector<8x128xf32>
    %36 = arith.mulf %23, %35 : vector<8x128xf32>
    %37 = arith.addf %32, %36 : vector<8x128xf32>
    %38 = math.tanh %37 : vector<8x128xf32>
    %cst_22 = arith.constant 1.000000e+00 : f32
    %39 = vector.broadcast %cst_22 : f32 to vector<8x128xf32>
    %40 = arith.subf %39, %31 : vector<8x128xf32>
    %41 = arith.mulf %40, %38 : vector<8x128xf32>
    %42 = arith.mulf %31, %12 : vector<8x128xf32>
    %43 = arith.addf %41, %42 : vector<8x128xf32>
    %cst_23 = arith.constant dense<0.000000e+00> : vector<8x384xf32>
    %44 = tpu.matmul %43, %2, %cst_23 {dimension_numbers = #tpu.dot_dimension_numbers<[1], [0], [0], [1], [0, 0, 1, 1], [], []>} : vector<8x128xf32>, vector<128x384xf32>, vector<8x384xf32> -> vector<8x384xf32>
    %45 = vector.broadcast %4 : vector<1x384xf32> to vector<8x384xf32>
    %46 = arith.addf %44, %45 : vector<8x384xf32>
    %cst_24 = arith.constant dense<0.000000e+00> : vector<8x384xf32>
    %47 = tpu.matmul %13, %3, %cst_24 {dimension_numbers = #tpu.dot_dimension_numbers<[1], [0], [0], [1], [0, 0, 1, 1], [], []>} : vector<8x128xf32>, vector<128x384xf32>, vector<8x384xf32> -> vector<8x384xf32>
    %48 = vector.extract_strided_slice %46 {offsets = [0, 0], sizes = [8, 128], strides = [1, 1]} : vector<8x384xf32> to vector<8x128xf32>
    %49 = vector.extract_strided_slice %47 {offsets = [0, 0], sizes = [8, 128], strides = [1, 1]} : vector<8x384xf32> to vector<8x128xf32>
    %50 = arith.addf %48, %49 : vector<8x128xf32>
    %51 = arith.negf %50 : vector<8x128xf32>
    %52 = math.exp %51 : vector<8x128xf32>
    %cst_25 = arith.constant 1.000000e+00 : f32
    %53 = vector.broadcast %cst_25 : f32 to vector<8x128xf32>
    %54 = arith.addf %53, %52 : vector<8x128xf32>
    %55 = arith.divf %53, %54 : vector<8x128xf32>
    %56 = vector.extract_strided_slice %46 {offsets = [0, 128], sizes = [8, 128], strides = [1, 1]} : vector<8x384xf32> to vector<8x128xf32>
    %57 = vector.extract_strided_slice %47 {offsets = [0, 128], sizes = [8, 128], strides = [1, 1]} : vector<8x384xf32> to vector<8x128xf32>
    %58 = arith.addf %56, %57 : vector<8x128xf32>
    %59 = arith.negf %58 : vector<8x128xf32>
    %60 = math.exp %59 : vector<8x128xf32>
    %cst_26 = arith.constant 1.000000e+00 : f32
    %61 = vector.broadcast %cst_26 : f32 to vector<8x128xf32>
    %62 = arith.addf %61, %60 : vector<8x128xf32>
    %63 = arith.divf %61, %62 : vector<8x128xf32>
    %64 = vector.extract_strided_slice %46 {offsets = [0, 256], sizes = [8, 128], strides = [1, 1]} : vector<8x384xf32> to vector<8x128xf32>
    %65 = vector.extract_strided_slice %47 {offsets = [0, 256], sizes = [8, 128], strides = [1, 1]} : vector<8x384xf32> to vector<8x128xf32>
    %66 = vector.broadcast %5 : vector<1x128xf32> to vector<8x128xf32>
    %67 = arith.addf %65, %66 : vector<8x128xf32>
    %68 = arith.mulf %55, %67 : vector<8x128xf32>
    %69 = arith.addf %64, %68 : vector<8x128xf32>
    %70 = math.tanh %69 : vector<8x128xf32>
    %cst_27 = arith.constant 1.000000e+00 : f32
    %71 = vector.broadcast %cst_27 : f32 to vector<8x128xf32>
    %72 = arith.subf %71, %63 : vector<8x128xf32>
    %73 = arith.mulf %72, %70 : vector<8x128xf32>
    %74 = arith.mulf %63, %13 : vector<8x128xf32>
    %75 = arith.addf %73, %74 : vector<8x128xf32>
    %76 = vector.extract_strided_slice %11 {offsets = [8, 0], sizes = [8, 384], strides = [1, 1]} : vector<64x384xf32> to vector<8x384xf32>
    %cst_28 = arith.constant dense<0.000000e+00> : vector<8x384xf32>
    %77 = tpu.matmul %43, %0, %cst_28 {dimension_numbers = #tpu.dot_dimension_numbers<[1], [0], [0], [1], [0, 0, 1, 1], [], []>} : vector<8x128xf32>, vector<128x384xf32>, vector<8x384xf32> -> vector<8x384xf32>
    %78 = vector.extract_strided_slice %76 {offsets = [0, 0], sizes = [8, 128], strides = [1, 1]} : vector<8x384xf32> to vector<8x128xf32>
    %79 = vector.extract_strided_slice %77 {offsets = [0, 0], sizes = [8, 128], strides = [1, 1]} : vector<8x384xf32> to vector<8x128xf32>
    %80 = arith.addf %78, %79 : vector<8x128xf32>
    %81 = arith.negf %80 : vector<8x128xf32>
    %82 = math.exp %81 : vector<8x128xf32>
    %cst_29 = arith.constant 1.000000e+00 : f32
    %83 = vector.broadcast %cst_29 : f32 to vector<8x128xf32>
    %84 = arith.addf %83, %82 : vector<8x128xf32>
    %85 = arith.divf %83, %84 : vector<8x128xf32>
    %86 = vector.extract_strided_slice %76 {offsets = [0, 128], sizes = [8, 128], strides = [1, 1]} : vector<8x384xf32> to vector<8x128xf32>
    %87 = vector.extract_strided_slice %77 {offsets = [0, 128], sizes = [8, 128], strides = [1, 1]} : vector<8x384xf32> to vector<8x128xf32>
    %88 = arith.addf %86, %87 : vector<8x128xf32>
    %89 = arith.negf %88 : vector<8x128xf32>
    %90 = math.exp %89 : vector<8x128xf32>
    %cst_30 = arith.constant 1.000000e+00 : f32
    %91 = vector.broadcast %cst_30 : f32 to vector<8x128xf32>
    %92 = arith.addf %91, %90 : vector<8x128xf32>
    %93 = arith.divf %91, %92 : vector<8x128xf32>
    %94 = vector.extract_strided_slice %76 {offsets = [0, 256], sizes = [8, 128], strides = [1, 1]} : vector<8x384xf32> to vector<8x128xf32>
    %95 = vector.extract_strided_slice %77 {offsets = [0, 256], sizes = [8, 128], strides = [1, 1]} : vector<8x384xf32> to vector<8x128xf32>
    %96 = vector.broadcast %1 : vector<1x128xf32> to vector<8x128xf32>
    %97 = arith.addf %95, %96 : vector<8x128xf32>
    %98 = arith.mulf %85, %97 : vector<8x128xf32>
    %99 = arith.addf %94, %98 : vector<8x128xf32>
    %100 = math.tanh %99 : vector<8x128xf32>
    %cst_31 = arith.constant 1.000000e+00 : f32
    %101 = vector.broadcast %cst_31 : f32 to vector<8x128xf32>
    %102 = arith.subf %101, %93 : vector<8x128xf32>
    %103 = arith.mulf %102, %100 : vector<8x128xf32>
    %104 = arith.mulf %93, %43 : vector<8x128xf32>
    %105 = arith.addf %103, %104 : vector<8x128xf32>
    %cst_32 = arith.constant dense<0.000000e+00> : vector<8x384xf32>
    %106 = tpu.matmul %105, %2, %cst_32 {dimension_numbers = #tpu.dot_dimension_numbers<[1], [0], [0], [1], [0, 0, 1, 1], [], []>} : vector<8x128xf32>, vector<128x384xf32>, vector<8x384xf32> -> vector<8x384xf32>
    %107 = vector.broadcast %4 : vector<1x384xf32> to vector<8x384xf32>
    %108 = arith.addf %106, %107 : vector<8x384xf32>
    %cst_33 = arith.constant dense<0.000000e+00> : vector<8x384xf32>
    %109 = tpu.matmul %75, %3, %cst_33 {dimension_numbers = #tpu.dot_dimension_numbers<[1], [0], [0], [1], [0, 0, 1, 1], [], []>} : vector<8x128xf32>, vector<128x384xf32>, vector<8x384xf32> -> vector<8x384xf32>
    %110 = vector.extract_strided_slice %108 {offsets = [0, 0], sizes = [8, 128], strides = [1, 1]} : vector<8x384xf32> to vector<8x128xf32>
    %111 = vector.extract_strided_slice %109 {offsets = [0, 0], sizes = [8, 128], strides = [1, 1]} : vector<8x384xf32> to vector<8x128xf32>
    %112 = arith.addf %110, %111 : vector<8x128xf32>
    %113 = arith.negf %112 : vector<8x128xf32>
    %114 = math.exp %113 : vector<8x128xf32>
    %cst_34 = arith.constant 1.000000e+00 : f32
    %115 = vector.broadcast %cst_34 : f32 to vector<8x128xf32>
    %116 = arith.addf %115, %114 : vector<8x128xf32>
    %117 = arith.divf %115, %116 : vector<8x128xf32>
    %118 = vector.extract_strided_slice %108 {offsets = [0, 128], sizes = [8, 128], strides = [1, 1]} : vector<8x384xf32> to vector<8x128xf32>
    %119 = vector.extract_strided_slice %109 {offsets = [0, 128], sizes = [8, 128], strides = [1, 1]} : vector<8x384xf32> to vector<8x128xf32>
    %120 = arith.addf %118, %119 : vector<8x128xf32>
    %121 = arith.negf %120 : vector<8x128xf32>
    %122 = math.exp %121 : vector<8x128xf32>
    %cst_35 = arith.constant 1.000000e+00 : f32
    %123 = vector.broadcast %cst_35 : f32 to vector<8x128xf32>
    %124 = arith.addf %123, %122 : vector<8x128xf32>
    %125 = arith.divf %123, %124 : vector<8x128xf32>
    %126 = vector.extract_strided_slice %108 {offsets = [0, 256], sizes = [8, 128], strides = [1, 1]} : vector<8x384xf32> to vector<8x128xf32>
    %127 = vector.extract_strided_slice %109 {offsets = [0, 256], sizes = [8, 128], strides = [1, 1]} : vector<8x384xf32> to vector<8x128xf32>
    %128 = vector.broadcast %5 : vector<1x128xf32> to vector<8x128xf32>
    %129 = arith.addf %127, %128 : vector<8x128xf32>
    %130 = arith.mulf %117, %129 : vector<8x128xf32>
    %131 = arith.addf %126, %130 : vector<8x128xf32>
    %132 = math.tanh %131 : vector<8x128xf32>
    %cst_36 = arith.constant 1.000000e+00 : f32
    %133 = vector.broadcast %cst_36 : f32 to vector<8x128xf32>
    %134 = arith.subf %133, %125 : vector<8x128xf32>
    %135 = arith.mulf %134, %132 : vector<8x128xf32>
    %136 = arith.mulf %125, %75 : vector<8x128xf32>
    %137 = arith.addf %135, %136 : vector<8x128xf32>
    %138 = vector.extract_strided_slice %11 {offsets = [16, 0], sizes = [8, 384], strides = [1, 1]} : vector<64x384xf32> to vector<8x384xf32>
    %cst_37 = arith.constant dense<0.000000e+00> : vector<8x384xf32>
    %139 = tpu.matmul %105, %0, %cst_37 {dimension_numbers = #tpu.dot_dimension_numbers<[1], [0], [0], [1], [0, 0, 1, 1], [], []>} : vector<8x128xf32>, vector<128x384xf32>, vector<8x384xf32> -> vector<8x384xf32>
    %140 = vector.extract_strided_slice %138 {offsets = [0, 0], sizes = [8, 128], strides = [1, 1]} : vector<8x384xf32> to vector<8x128xf32>
    %141 = vector.extract_strided_slice %139 {offsets = [0, 0], sizes = [8, 128], strides = [1, 1]} : vector<8x384xf32> to vector<8x128xf32>
    %142 = arith.addf %140, %141 : vector<8x128xf32>
    %143 = arith.negf %142 : vector<8x128xf32>
    %144 = math.exp %143 : vector<8x128xf32>
    %cst_38 = arith.constant 1.000000e+00 : f32
    %145 = vector.broadcast %cst_38 : f32 to vector<8x128xf32>
    %146 = arith.addf %145, %144 : vector<8x128xf32>
    %147 = arith.divf %145, %146 : vector<8x128xf32>
    %148 = vector.extract_strided_slice %138 {offsets = [0, 128], sizes = [8, 128], strides = [1, 1]} : vector<8x384xf32> to vector<8x128xf32>
    %149 = vector.extract_strided_slice %139 {offsets = [0, 128], sizes = [8, 128], strides = [1, 1]} : vector<8x384xf32> to vector<8x128xf32>
    %150 = arith.addf %148, %149 : vector<8x128xf32>
    %151 = arith.negf %150 : vector<8x128xf32>
    %152 = math.exp %151 : vector<8x128xf32>
    %cst_39 = arith.constant 1.000000e+00 : f32
    %153 = vector.broadcast %cst_39 : f32 to vector<8x128xf32>
    %154 = arith.addf %153, %152 : vector<8x128xf32>
    %155 = arith.divf %153, %154 : vector<8x128xf32>
    %156 = vector.extract_strided_slice %138 {offsets = [0, 256], sizes = [8, 128], strides = [1, 1]} : vector<8x384xf32> to vector<8x128xf32>
    %157 = vector.extract_strided_slice %139 {offsets = [0, 256], sizes = [8, 128], strides = [1, 1]} : vector<8x384xf32> to vector<8x128xf32>
    %158 = vector.broadcast %1 : vector<1x128xf32> to vector<8x128xf32>
    %159 = arith.addf %157, %158 : vector<8x128xf32>
    %160 = arith.mulf %147, %159 : vector<8x128xf32>
    %161 = arith.addf %156, %160 : vector<8x128xf32>
    %162 = math.tanh %161 : vector<8x128xf32>
    %cst_40 = arith.constant 1.000000e+00 : f32
    %163 = vector.broadcast %cst_40 : f32 to vector<8x128xf32>
    %164 = arith.subf %163, %155 : vector<8x128xf32>
    %165 = arith.mulf %164, %162 : vector<8x128xf32>
    %166 = arith.mulf %155, %105 : vector<8x128xf32>
    %167 = arith.addf %165, %166 : vector<8x128xf32>
    %cst_41 = arith.constant dense<0.000000e+00> : vector<8x384xf32>
    %168 = tpu.matmul %167, %2, %cst_41 {dimension_numbers = #tpu.dot_dimension_numbers<[1], [0], [0], [1], [0, 0, 1, 1], [], []>} : vector<8x128xf32>, vector<128x384xf32>, vector<8x384xf32> -> vector<8x384xf32>
    %169 = vector.broadcast %4 : vector<1x384xf32> to vector<8x384xf32>
    %170 = arith.addf %168, %169 : vector<8x384xf32>
    %cst_42 = arith.constant dense<0.000000e+00> : vector<8x384xf32>
    %171 = tpu.matmul %137, %3, %cst_42 {dimension_numbers = #tpu.dot_dimension_numbers<[1], [0], [0], [1], [0, 0, 1, 1], [], []>} : vector<8x128xf32>, vector<128x384xf32>, vector<8x384xf32> -> vector<8x384xf32>
    %172 = vector.extract_strided_slice %170 {offsets = [0, 0], sizes = [8, 128], strides = [1, 1]} : vector<8x384xf32> to vector<8x128xf32>
    %173 = vector.extract_strided_slice %171 {offsets = [0, 0], sizes = [8, 128], strides = [1, 1]} : vector<8x384xf32> to vector<8x128xf32>
    %174 = arith.addf %172, %173 : vector<8x128xf32>
    %175 = arith.negf %174 : vector<8x128xf32>
    %176 = math.exp %175 : vector<8x128xf32>
    %cst_43 = arith.constant 1.000000e+00 : f32
    %177 = vector.broadcast %cst_43 : f32 to vector<8x128xf32>
    %178 = arith.addf %177, %176 : vector<8x128xf32>
    %179 = arith.divf %177, %178 : vector<8x128xf32>
    %180 = vector.extract_strided_slice %170 {offsets = [0, 128], sizes = [8, 128], strides = [1, 1]} : vector<8x384xf32> to vector<8x128xf32>
    %181 = vector.extract_strided_slice %171 {offsets = [0, 128], sizes = [8, 128], strides = [1, 1]} : vector<8x384xf32> to vector<8x128xf32>
    %182 = arith.addf %180, %181 : vector<8x128xf32>
    %183 = arith.negf %182 : vector<8x128xf32>
    %184 = math.exp %183 : vector<8x128xf32>
    %cst_44 = arith.constant 1.000000e+00 : f32
    %185 = vector.broadcast %cst_44 : f32 to vector<8x128xf32>
    %186 = arith.addf %185, %184 : vector<8x128xf32>
    %187 = arith.divf %185, %186 : vector<8x128xf32>
    %188 = vector.extract_strided_slice %170 {offsets = [0, 256], sizes = [8, 128], strides = [1, 1]} : vector<8x384xf32> to vector<8x128xf32>
    %189 = vector.extract_strided_slice %171 {offsets = [0, 256], sizes = [8, 128], strides = [1, 1]} : vector<8x384xf32> to vector<8x128xf32>
    %190 = vector.broadcast %5 : vector<1x128xf32> to vector<8x128xf32>
    %191 = arith.addf %189, %190 : vector<8x128xf32>
    %192 = arith.mulf %179, %191 : vector<8x128xf32>
    %193 = arith.addf %188, %192 : vector<8x128xf32>
    %194 = math.tanh %193 : vector<8x128xf32>
    %cst_45 = arith.constant 1.000000e+00 : f32
    %195 = vector.broadcast %cst_45 : f32 to vector<8x128xf32>
    %196 = arith.subf %195, %187 : vector<8x128xf32>
    %197 = arith.mulf %196, %194 : vector<8x128xf32>
    %198 = arith.mulf %187, %137 : vector<8x128xf32>
    %199 = arith.addf %197, %198 : vector<8x128xf32>
    %200 = vector.extract_strided_slice %11 {offsets = [24, 0], sizes = [8, 384], strides = [1, 1]} : vector<64x384xf32> to vector<8x384xf32>
    %cst_46 = arith.constant dense<0.000000e+00> : vector<8x384xf32>
    %201 = tpu.matmul %167, %0, %cst_46 {dimension_numbers = #tpu.dot_dimension_numbers<[1], [0], [0], [1], [0, 0, 1, 1], [], []>} : vector<8x128xf32>, vector<128x384xf32>, vector<8x384xf32> -> vector<8x384xf32>
    %202 = vector.extract_strided_slice %200 {offsets = [0, 0], sizes = [8, 128], strides = [1, 1]} : vector<8x384xf32> to vector<8x128xf32>
    %203 = vector.extract_strided_slice %201 {offsets = [0, 0], sizes = [8, 128], strides = [1, 1]} : vector<8x384xf32> to vector<8x128xf32>
    %204 = arith.addf %202, %203 : vector<8x128xf32>
    %205 = arith.negf %204 : vector<8x128xf32>
    %206 = math.exp %205 : vector<8x128xf32>
    %cst_47 = arith.constant 1.000000e+00 : f32
    %207 = vector.broadcast %cst_47 : f32 to vector<8x128xf32>
    %208 = arith.addf %207, %206 : vector<8x128xf32>
    %209 = arith.divf %207, %208 : vector<8x128xf32>
    %210 = vector.extract_strided_slice %200 {offsets = [0, 128], sizes = [8, 128], strides = [1, 1]} : vector<8x384xf32> to vector<8x128xf32>
    %211 = vector.extract_strided_slice %201 {offsets = [0, 128], sizes = [8, 128], strides = [1, 1]} : vector<8x384xf32> to vector<8x128xf32>
    %212 = arith.addf %210, %211 : vector<8x128xf32>
    %213 = arith.negf %212 : vector<8x128xf32>
    %214 = math.exp %213 : vector<8x128xf32>
    %cst_48 = arith.constant 1.000000e+00 : f32
    %215 = vector.broadcast %cst_48 : f32 to vector<8x128xf32>
    %216 = arith.addf %215, %214 : vector<8x128xf32>
    %217 = arith.divf %215, %216 : vector<8x128xf32>
    %218 = vector.extract_strided_slice %200 {offsets = [0, 256], sizes = [8, 128], strides = [1, 1]} : vector<8x384xf32> to vector<8x128xf32>
    %219 = vector.extract_strided_slice %201 {offsets = [0, 256], sizes = [8, 128], strides = [1, 1]} : vector<8x384xf32> to vector<8x128xf32>
    %220 = vector.broadcast %1 : vector<1x128xf32> to vector<8x128xf32>
    %221 = arith.addf %219, %220 : vector<8x128xf32>
    %222 = arith.mulf %209, %221 : vector<8x128xf32>
    %223 = arith.addf %218, %222 : vector<8x128xf32>
    %224 = math.tanh %223 : vector<8x128xf32>
    %cst_49 = arith.constant 1.000000e+00 : f32
    %225 = vector.broadcast %cst_49 : f32 to vector<8x128xf32>
    %226 = arith.subf %225, %217 : vector<8x128xf32>
    %227 = arith.mulf %226, %224 : vector<8x128xf32>
    %228 = arith.mulf %217, %167 : vector<8x128xf32>
    %229 = arith.addf %227, %228 : vector<8x128xf32>
    %cst_50 = arith.constant dense<0.000000e+00> : vector<8x384xf32>
    %230 = tpu.matmul %229, %2, %cst_50 {dimension_numbers = #tpu.dot_dimension_numbers<[1], [0], [0], [1], [0, 0, 1, 1], [], []>} : vector<8x128xf32>, vector<128x384xf32>, vector<8x384xf32> -> vector<8x384xf32>
    %231 = vector.broadcast %4 : vector<1x384xf32> to vector<8x384xf32>
    %232 = arith.addf %230, %231 : vector<8x384xf32>
    %cst_51 = arith.constant dense<0.000000e+00> : vector<8x384xf32>
    %233 = tpu.matmul %199, %3, %cst_51 {dimension_numbers = #tpu.dot_dimension_numbers<[1], [0], [0], [1], [0, 0, 1, 1], [], []>} : vector<8x128xf32>, vector<128x384xf32>, vector<8x384xf32> -> vector<8x384xf32>
    %234 = vector.extract_strided_slice %232 {offsets = [0, 0], sizes = [8, 128], strides = [1, 1]} : vector<8x384xf32> to vector<8x128xf32>
    %235 = vector.extract_strided_slice %233 {offsets = [0, 0], sizes = [8, 128], strides = [1, 1]} : vector<8x384xf32> to vector<8x128xf32>
    %236 = arith.addf %234, %235 : vector<8x128xf32>
    %237 = arith.negf %236 : vector<8x128xf32>
    %238 = math.exp %237 : vector<8x128xf32>
    %cst_52 = arith.constant 1.000000e+00 : f32
    %239 = vector.broadcast %cst_52 : f32 to vector<8x128xf32>
    %240 = arith.addf %239, %238 : vector<8x128xf32>
    %241 = arith.divf %239, %240 : vector<8x128xf32>
    %242 = vector.extract_strided_slice %232 {offsets = [0, 128], sizes = [8, 128], strides = [1, 1]} : vector<8x384xf32> to vector<8x128xf32>
    %243 = vector.extract_strided_slice %233 {offsets = [0, 128], sizes = [8, 128], strides = [1, 1]} : vector<8x384xf32> to vector<8x128xf32>
    %244 = arith.addf %242, %243 : vector<8x128xf32>
    %245 = arith.negf %244 : vector<8x128xf32>
    %246 = math.exp %245 : vector<8x128xf32>
    %cst_53 = arith.constant 1.000000e+00 : f32
    %247 = vector.broadcast %cst_53 : f32 to vector<8x128xf32>
    %248 = arith.addf %247, %246 : vector<8x128xf32>
    %249 = arith.divf %247, %248 : vector<8x128xf32>
    %250 = vector.extract_strided_slice %232 {offsets = [0, 256], sizes = [8, 128], strides = [1, 1]} : vector<8x384xf32> to vector<8x128xf32>
    %251 = vector.extract_strided_slice %233 {offsets = [0, 256], sizes = [8, 128], strides = [1, 1]} : vector<8x384xf32> to vector<8x128xf32>
    %252 = vector.broadcast %5 : vector<1x128xf32> to vector<8x128xf32>
    %253 = arith.addf %251, %252 : vector<8x128xf32>
    %254 = arith.mulf %241, %253 : vector<8x128xf32>
    %255 = arith.addf %250, %254 : vector<8x128xf32>
    %256 = math.tanh %255 : vector<8x128xf32>
    %cst_54 = arith.constant 1.000000e+00 : f32
    %257 = vector.broadcast %cst_54 : f32 to vector<8x128xf32>
    %258 = arith.subf %257, %249 : vector<8x128xf32>
    %259 = arith.mulf %258, %256 : vector<8x128xf32>
    %260 = arith.mulf %249, %199 : vector<8x128xf32>
    %261 = arith.addf %259, %260 : vector<8x128xf32>
    %262 = vector.extract_strided_slice %11 {offsets = [32, 0], sizes = [8, 384], strides = [1, 1]} : vector<64x384xf32> to vector<8x384xf32>
    %cst_55 = arith.constant dense<0.000000e+00> : vector<8x384xf32>
    %263 = tpu.matmul %229, %0, %cst_55 {dimension_numbers = #tpu.dot_dimension_numbers<[1], [0], [0], [1], [0, 0, 1, 1], [], []>} : vector<8x128xf32>, vector<128x384xf32>, vector<8x384xf32> -> vector<8x384xf32>
    %264 = vector.extract_strided_slice %262 {offsets = [0, 0], sizes = [8, 128], strides = [1, 1]} : vector<8x384xf32> to vector<8x128xf32>
    %265 = vector.extract_strided_slice %263 {offsets = [0, 0], sizes = [8, 128], strides = [1, 1]} : vector<8x384xf32> to vector<8x128xf32>
    %266 = arith.addf %264, %265 : vector<8x128xf32>
    %267 = arith.negf %266 : vector<8x128xf32>
    %268 = math.exp %267 : vector<8x128xf32>
    %cst_56 = arith.constant 1.000000e+00 : f32
    %269 = vector.broadcast %cst_56 : f32 to vector<8x128xf32>
    %270 = arith.addf %269, %268 : vector<8x128xf32>
    %271 = arith.divf %269, %270 : vector<8x128xf32>
    %272 = vector.extract_strided_slice %262 {offsets = [0, 128], sizes = [8, 128], strides = [1, 1]} : vector<8x384xf32> to vector<8x128xf32>
    %273 = vector.extract_strided_slice %263 {offsets = [0, 128], sizes = [8, 128], strides = [1, 1]} : vector<8x384xf32> to vector<8x128xf32>
    %274 = arith.addf %272, %273 : vector<8x128xf32>
    %275 = arith.negf %274 : vector<8x128xf32>
    %276 = math.exp %275 : vector<8x128xf32>
    %cst_57 = arith.constant 1.000000e+00 : f32
    %277 = vector.broadcast %cst_57 : f32 to vector<8x128xf32>
    %278 = arith.addf %277, %276 : vector<8x128xf32>
    %279 = arith.divf %277, %278 : vector<8x128xf32>
    %280 = vector.extract_strided_slice %262 {offsets = [0, 256], sizes = [8, 128], strides = [1, 1]} : vector<8x384xf32> to vector<8x128xf32>
    %281 = vector.extract_strided_slice %263 {offsets = [0, 256], sizes = [8, 128], strides = [1, 1]} : vector<8x384xf32> to vector<8x128xf32>
    %282 = vector.broadcast %1 : vector<1x128xf32> to vector<8x128xf32>
    %283 = arith.addf %281, %282 : vector<8x128xf32>
    %284 = arith.mulf %271, %283 : vector<8x128xf32>
    %285 = arith.addf %280, %284 : vector<8x128xf32>
    %286 = math.tanh %285 : vector<8x128xf32>
    %cst_58 = arith.constant 1.000000e+00 : f32
    %287 = vector.broadcast %cst_58 : f32 to vector<8x128xf32>
    %288 = arith.subf %287, %279 : vector<8x128xf32>
    %289 = arith.mulf %288, %286 : vector<8x128xf32>
    %290 = arith.mulf %279, %229 : vector<8x128xf32>
    %291 = arith.addf %289, %290 : vector<8x128xf32>
    %cst_59 = arith.constant dense<0.000000e+00> : vector<8x384xf32>
    %292 = tpu.matmul %291, %2, %cst_59 {dimension_numbers = #tpu.dot_dimension_numbers<[1], [0], [0], [1], [0, 0, 1, 1], [], []>} : vector<8x128xf32>, vector<128x384xf32>, vector<8x384xf32> -> vector<8x384xf32>
    %293 = vector.broadcast %4 : vector<1x384xf32> to vector<8x384xf32>
    %294 = arith.addf %292, %293 : vector<8x384xf32>
    %cst_60 = arith.constant dense<0.000000e+00> : vector<8x384xf32>
    %295 = tpu.matmul %261, %3, %cst_60 {dimension_numbers = #tpu.dot_dimension_numbers<[1], [0], [0], [1], [0, 0, 1, 1], [], []>} : vector<8x128xf32>, vector<128x384xf32>, vector<8x384xf32> -> vector<8x384xf32>
    %296 = vector.extract_strided_slice %294 {offsets = [0, 0], sizes = [8, 128], strides = [1, 1]} : vector<8x384xf32> to vector<8x128xf32>
    %297 = vector.extract_strided_slice %295 {offsets = [0, 0], sizes = [8, 128], strides = [1, 1]} : vector<8x384xf32> to vector<8x128xf32>
    %298 = arith.addf %296, %297 : vector<8x128xf32>
    %299 = arith.negf %298 : vector<8x128xf32>
    %300 = math.exp %299 : vector<8x128xf32>
    %cst_61 = arith.constant 1.000000e+00 : f32
    %301 = vector.broadcast %cst_61 : f32 to vector<8x128xf32>
    %302 = arith.addf %301, %300 : vector<8x128xf32>
    %303 = arith.divf %301, %302 : vector<8x128xf32>
    %304 = vector.extract_strided_slice %294 {offsets = [0, 128], sizes = [8, 128], strides = [1, 1]} : vector<8x384xf32> to vector<8x128xf32>
    %305 = vector.extract_strided_slice %295 {offsets = [0, 128], sizes = [8, 128], strides = [1, 1]} : vector<8x384xf32> to vector<8x128xf32>
    %306 = arith.addf %304, %305 : vector<8x128xf32>
    %307 = arith.negf %306 : vector<8x128xf32>
    %308 = math.exp %307 : vector<8x128xf32>
    %cst_62 = arith.constant 1.000000e+00 : f32
    %309 = vector.broadcast %cst_62 : f32 to vector<8x128xf32>
    %310 = arith.addf %309, %308 : vector<8x128xf32>
    %311 = arith.divf %309, %310 : vector<8x128xf32>
    %312 = vector.extract_strided_slice %294 {offsets = [0, 256], sizes = [8, 128], strides = [1, 1]} : vector<8x384xf32> to vector<8x128xf32>
    %313 = vector.extract_strided_slice %295 {offsets = [0, 256], sizes = [8, 128], strides = [1, 1]} : vector<8x384xf32> to vector<8x128xf32>
    %314 = vector.broadcast %5 : vector<1x128xf32> to vector<8x128xf32>
    %315 = arith.addf %313, %314 : vector<8x128xf32>
    %316 = arith.mulf %303, %315 : vector<8x128xf32>
    %317 = arith.addf %312, %316 : vector<8x128xf32>
    %318 = math.tanh %317 : vector<8x128xf32>
    %cst_63 = arith.constant 1.000000e+00 : f32
    %319 = vector.broadcast %cst_63 : f32 to vector<8x128xf32>
    %320 = arith.subf %319, %311 : vector<8x128xf32>
    %321 = arith.mulf %320, %318 : vector<8x128xf32>
    %322 = arith.mulf %311, %261 : vector<8x128xf32>
    %323 = arith.addf %321, %322 : vector<8x128xf32>
    %324 = vector.extract_strided_slice %11 {offsets = [40, 0], sizes = [8, 384], strides = [1, 1]} : vector<64x384xf32> to vector<8x384xf32>
    %cst_64 = arith.constant dense<0.000000e+00> : vector<8x384xf32>
    %325 = tpu.matmul %291, %0, %cst_64 {dimension_numbers = #tpu.dot_dimension_numbers<[1], [0], [0], [1], [0, 0, 1, 1], [], []>} : vector<8x128xf32>, vector<128x384xf32>, vector<8x384xf32> -> vector<8x384xf32>
    %326 = vector.extract_strided_slice %324 {offsets = [0, 0], sizes = [8, 128], strides = [1, 1]} : vector<8x384xf32> to vector<8x128xf32>
    %327 = vector.extract_strided_slice %325 {offsets = [0, 0], sizes = [8, 128], strides = [1, 1]} : vector<8x384xf32> to vector<8x128xf32>
    %328 = arith.addf %326, %327 : vector<8x128xf32>
    %329 = arith.negf %328 : vector<8x128xf32>
    %330 = math.exp %329 : vector<8x128xf32>
    %cst_65 = arith.constant 1.000000e+00 : f32
    %331 = vector.broadcast %cst_65 : f32 to vector<8x128xf32>
    %332 = arith.addf %331, %330 : vector<8x128xf32>
    %333 = arith.divf %331, %332 : vector<8x128xf32>
    %334 = vector.extract_strided_slice %324 {offsets = [0, 128], sizes = [8, 128], strides = [1, 1]} : vector<8x384xf32> to vector<8x128xf32>
    %335 = vector.extract_strided_slice %325 {offsets = [0, 128], sizes = [8, 128], strides = [1, 1]} : vector<8x384xf32> to vector<8x128xf32>
    %336 = arith.addf %334, %335 : vector<8x128xf32>
    %337 = arith.negf %336 : vector<8x128xf32>
    %338 = math.exp %337 : vector<8x128xf32>
    %cst_66 = arith.constant 1.000000e+00 : f32
    %339 = vector.broadcast %cst_66 : f32 to vector<8x128xf32>
    %340 = arith.addf %339, %338 : vector<8x128xf32>
    %341 = arith.divf %339, %340 : vector<8x128xf32>
    %342 = vector.extract_strided_slice %324 {offsets = [0, 256], sizes = [8, 128], strides = [1, 1]} : vector<8x384xf32> to vector<8x128xf32>
    %343 = vector.extract_strided_slice %325 {offsets = [0, 256], sizes = [8, 128], strides = [1, 1]} : vector<8x384xf32> to vector<8x128xf32>
    %344 = vector.broadcast %1 : vector<1x128xf32> to vector<8x128xf32>
    %345 = arith.addf %343, %344 : vector<8x128xf32>
    %346 = arith.mulf %333, %345 : vector<8x128xf32>
    %347 = arith.addf %342, %346 : vector<8x128xf32>
    %348 = math.tanh %347 : vector<8x128xf32>
    %cst_67 = arith.constant 1.000000e+00 : f32
    %349 = vector.broadcast %cst_67 : f32 to vector<8x128xf32>
    %350 = arith.subf %349, %341 : vector<8x128xf32>
    %351 = arith.mulf %350, %348 : vector<8x128xf32>
    %352 = arith.mulf %341, %291 : vector<8x128xf32>
    %353 = arith.addf %351, %352 : vector<8x128xf32>
    %cst_68 = arith.constant dense<0.000000e+00> : vector<8x384xf32>
    %354 = tpu.matmul %353, %2, %cst_68 {dimension_numbers = #tpu.dot_dimension_numbers<[1], [0], [0], [1], [0, 0, 1, 1], [], []>} : vector<8x128xf32>, vector<128x384xf32>, vector<8x384xf32> -> vector<8x384xf32>
    %355 = vector.broadcast %4 : vector<1x384xf32> to vector<8x384xf32>
    %356 = arith.addf %354, %355 : vector<8x384xf32>
    %cst_69 = arith.constant dense<0.000000e+00> : vector<8x384xf32>
    %357 = tpu.matmul %323, %3, %cst_69 {dimension_numbers = #tpu.dot_dimension_numbers<[1], [0], [0], [1], [0, 0, 1, 1], [], []>} : vector<8x128xf32>, vector<128x384xf32>, vector<8x384xf32> -> vector<8x384xf32>
    %358 = vector.extract_strided_slice %356 {offsets = [0, 0], sizes = [8, 128], strides = [1, 1]} : vector<8x384xf32> to vector<8x128xf32>
    %359 = vector.extract_strided_slice %357 {offsets = [0, 0], sizes = [8, 128], strides = [1, 1]} : vector<8x384xf32> to vector<8x128xf32>
    %360 = arith.addf %358, %359 : vector<8x128xf32>
    %361 = arith.negf %360 : vector<8x128xf32>
    %362 = math.exp %361 : vector<8x128xf32>
    %cst_70 = arith.constant 1.000000e+00 : f32
    %363 = vector.broadcast %cst_70 : f32 to vector<8x128xf32>
    %364 = arith.addf %363, %362 : vector<8x128xf32>
    %365 = arith.divf %363, %364 : vector<8x128xf32>
    %366 = vector.extract_strided_slice %356 {offsets = [0, 128], sizes = [8, 128], strides = [1, 1]} : vector<8x384xf32> to vector<8x128xf32>
    %367 = vector.extract_strided_slice %357 {offsets = [0, 128], sizes = [8, 128], strides = [1, 1]} : vector<8x384xf32> to vector<8x128xf32>
    %368 = arith.addf %366, %367 : vector<8x128xf32>
    %369 = arith.negf %368 : vector<8x128xf32>
    %370 = math.exp %369 : vector<8x128xf32>
    %cst_71 = arith.constant 1.000000e+00 : f32
    %371 = vector.broadcast %cst_71 : f32 to vector<8x128xf32>
    %372 = arith.addf %371, %370 : vector<8x128xf32>
    %373 = arith.divf %371, %372 : vector<8x128xf32>
    %374 = vector.extract_strided_slice %356 {offsets = [0, 256], sizes = [8, 128], strides = [1, 1]} : vector<8x384xf32> to vector<8x128xf32>
    %375 = vector.extract_strided_slice %357 {offsets = [0, 256], sizes = [8, 128], strides = [1, 1]} : vector<8x384xf32> to vector<8x128xf32>
    %376 = vector.broadcast %5 : vector<1x128xf32> to vector<8x128xf32>
    %377 = arith.addf %375, %376 : vector<8x128xf32>
    %378 = arith.mulf %365, %377 : vector<8x128xf32>
    %379 = arith.addf %374, %378 : vector<8x128xf32>
    %380 = math.tanh %379 : vector<8x128xf32>
    %cst_72 = arith.constant 1.000000e+00 : f32
    %381 = vector.broadcast %cst_72 : f32 to vector<8x128xf32>
    %382 = arith.subf %381, %373 : vector<8x128xf32>
    %383 = arith.mulf %382, %380 : vector<8x128xf32>
    %384 = arith.mulf %373, %323 : vector<8x128xf32>
    %385 = arith.addf %383, %384 : vector<8x128xf32>
    %386 = vector.extract_strided_slice %11 {offsets = [48, 0], sizes = [8, 384], strides = [1, 1]} : vector<64x384xf32> to vector<8x384xf32>
    %cst_73 = arith.constant dense<0.000000e+00> : vector<8x384xf32>
    %387 = tpu.matmul %353, %0, %cst_73 {dimension_numbers = #tpu.dot_dimension_numbers<[1], [0], [0], [1], [0, 0, 1, 1], [], []>} : vector<8x128xf32>, vector<128x384xf32>, vector<8x384xf32> -> vector<8x384xf32>
    %388 = vector.extract_strided_slice %386 {offsets = [0, 0], sizes = [8, 128], strides = [1, 1]} : vector<8x384xf32> to vector<8x128xf32>
    %389 = vector.extract_strided_slice %387 {offsets = [0, 0], sizes = [8, 128], strides = [1, 1]} : vector<8x384xf32> to vector<8x128xf32>
    %390 = arith.addf %388, %389 : vector<8x128xf32>
    %391 = arith.negf %390 : vector<8x128xf32>
    %392 = math.exp %391 : vector<8x128xf32>
    %cst_74 = arith.constant 1.000000e+00 : f32
    %393 = vector.broadcast %cst_74 : f32 to vector<8x128xf32>
    %394 = arith.addf %393, %392 : vector<8x128xf32>
    %395 = arith.divf %393, %394 : vector<8x128xf32>
    %396 = vector.extract_strided_slice %386 {offsets = [0, 128], sizes = [8, 128], strides = [1, 1]} : vector<8x384xf32> to vector<8x128xf32>
    %397 = vector.extract_strided_slice %387 {offsets = [0, 128], sizes = [8, 128], strides = [1, 1]} : vector<8x384xf32> to vector<8x128xf32>
    %398 = arith.addf %396, %397 : vector<8x128xf32>
    %399 = arith.negf %398 : vector<8x128xf32>
    %400 = math.exp %399 : vector<8x128xf32>
    %cst_75 = arith.constant 1.000000e+00 : f32
    %401 = vector.broadcast %cst_75 : f32 to vector<8x128xf32>
    %402 = arith.addf %401, %400 : vector<8x128xf32>
    %403 = arith.divf %401, %402 : vector<8x128xf32>
    %404 = vector.extract_strided_slice %386 {offsets = [0, 256], sizes = [8, 128], strides = [1, 1]} : vector<8x384xf32> to vector<8x128xf32>
    %405 = vector.extract_strided_slice %387 {offsets = [0, 256], sizes = [8, 128], strides = [1, 1]} : vector<8x384xf32> to vector<8x128xf32>
    %406 = vector.broadcast %1 : vector<1x128xf32> to vector<8x128xf32>
    %407 = arith.addf %405, %406 : vector<8x128xf32>
    %408 = arith.mulf %395, %407 : vector<8x128xf32>
    %409 = arith.addf %404, %408 : vector<8x128xf32>
    %410 = math.tanh %409 : vector<8x128xf32>
    %cst_76 = arith.constant 1.000000e+00 : f32
    %411 = vector.broadcast %cst_76 : f32 to vector<8x128xf32>
    %412 = arith.subf %411, %403 : vector<8x128xf32>
    %413 = arith.mulf %412, %410 : vector<8x128xf32>
    %414 = arith.mulf %403, %353 : vector<8x128xf32>
    %415 = arith.addf %413, %414 : vector<8x128xf32>
    %cst_77 = arith.constant dense<0.000000e+00> : vector<8x384xf32>
    %416 = tpu.matmul %415, %2, %cst_77 {dimension_numbers = #tpu.dot_dimension_numbers<[1], [0], [0], [1], [0, 0, 1, 1], [], []>} : vector<8x128xf32>, vector<128x384xf32>, vector<8x384xf32> -> vector<8x384xf32>
    %417 = vector.broadcast %4 : vector<1x384xf32> to vector<8x384xf32>
    %418 = arith.addf %416, %417 : vector<8x384xf32>
    %cst_78 = arith.constant dense<0.000000e+00> : vector<8x384xf32>
    %419 = tpu.matmul %385, %3, %cst_78 {dimension_numbers = #tpu.dot_dimension_numbers<[1], [0], [0], [1], [0, 0, 1, 1], [], []>} : vector<8x128xf32>, vector<128x384xf32>, vector<8x384xf32> -> vector<8x384xf32>
    %420 = vector.extract_strided_slice %418 {offsets = [0, 0], sizes = [8, 128], strides = [1, 1]} : vector<8x384xf32> to vector<8x128xf32>
    %421 = vector.extract_strided_slice %419 {offsets = [0, 0], sizes = [8, 128], strides = [1, 1]} : vector<8x384xf32> to vector<8x128xf32>
    %422 = arith.addf %420, %421 : vector<8x128xf32>
    %423 = arith.negf %422 : vector<8x128xf32>
    %424 = math.exp %423 : vector<8x128xf32>
    %cst_79 = arith.constant 1.000000e+00 : f32
    %425 = vector.broadcast %cst_79 : f32 to vector<8x128xf32>
    %426 = arith.addf %425, %424 : vector<8x128xf32>
    %427 = arith.divf %425, %426 : vector<8x128xf32>
    %428 = vector.extract_strided_slice %418 {offsets = [0, 128], sizes = [8, 128], strides = [1, 1]} : vector<8x384xf32> to vector<8x128xf32>
    %429 = vector.extract_strided_slice %419 {offsets = [0, 128], sizes = [8, 128], strides = [1, 1]} : vector<8x384xf32> to vector<8x128xf32>
    %430 = arith.addf %428, %429 : vector<8x128xf32>
    %431 = arith.negf %430 : vector<8x128xf32>
    %432 = math.exp %431 : vector<8x128xf32>
    %cst_80 = arith.constant 1.000000e+00 : f32
    %433 = vector.broadcast %cst_80 : f32 to vector<8x128xf32>
    %434 = arith.addf %433, %432 : vector<8x128xf32>
    %435 = arith.divf %433, %434 : vector<8x128xf32>
    %436 = vector.extract_strided_slice %418 {offsets = [0, 256], sizes = [8, 128], strides = [1, 1]} : vector<8x384xf32> to vector<8x128xf32>
    %437 = vector.extract_strided_slice %419 {offsets = [0, 256], sizes = [8, 128], strides = [1, 1]} : vector<8x384xf32> to vector<8x128xf32>
    %438 = vector.broadcast %5 : vector<1x128xf32> to vector<8x128xf32>
    %439 = arith.addf %437, %438 : vector<8x128xf32>
    %440 = arith.mulf %427, %439 : vector<8x128xf32>
    %441 = arith.addf %436, %440 : vector<8x128xf32>
    %442 = math.tanh %441 : vector<8x128xf32>
    %cst_81 = arith.constant 1.000000e+00 : f32
    %443 = vector.broadcast %cst_81 : f32 to vector<8x128xf32>
    %444 = arith.subf %443, %435 : vector<8x128xf32>
    %445 = arith.mulf %444, %442 : vector<8x128xf32>
    %446 = arith.mulf %435, %385 : vector<8x128xf32>
    %447 = arith.addf %445, %446 : vector<8x128xf32>
    %448 = vector.extract_strided_slice %11 {offsets = [56, 0], sizes = [8, 384], strides = [1, 1]} : vector<64x384xf32> to vector<8x384xf32>
    %cst_82 = arith.constant dense<0.000000e+00> : vector<8x384xf32>
    %449 = tpu.matmul %415, %0, %cst_82 {dimension_numbers = #tpu.dot_dimension_numbers<[1], [0], [0], [1], [0, 0, 1, 1], [], []>} : vector<8x128xf32>, vector<128x384xf32>, vector<8x384xf32> -> vector<8x384xf32>
    %450 = vector.extract_strided_slice %448 {offsets = [0, 0], sizes = [8, 128], strides = [1, 1]} : vector<8x384xf32> to vector<8x128xf32>
    %451 = vector.extract_strided_slice %449 {offsets = [0, 0], sizes = [8, 128], strides = [1, 1]} : vector<8x384xf32> to vector<8x128xf32>
    %452 = arith.addf %450, %451 : vector<8x128xf32>
    %453 = arith.negf %452 : vector<8x128xf32>
    %454 = math.exp %453 : vector<8x128xf32>
    %cst_83 = arith.constant 1.000000e+00 : f32
    %455 = vector.broadcast %cst_83 : f32 to vector<8x128xf32>
    %456 = arith.addf %455, %454 : vector<8x128xf32>
    %457 = arith.divf %455, %456 : vector<8x128xf32>
    %458 = vector.extract_strided_slice %448 {offsets = [0, 128], sizes = [8, 128], strides = [1, 1]} : vector<8x384xf32> to vector<8x128xf32>
    %459 = vector.extract_strided_slice %449 {offsets = [0, 128], sizes = [8, 128], strides = [1, 1]} : vector<8x384xf32> to vector<8x128xf32>
    %460 = arith.addf %458, %459 : vector<8x128xf32>
    %461 = arith.negf %460 : vector<8x128xf32>
    %462 = math.exp %461 : vector<8x128xf32>
    %cst_84 = arith.constant 1.000000e+00 : f32
    %463 = vector.broadcast %cst_84 : f32 to vector<8x128xf32>
    %464 = arith.addf %463, %462 : vector<8x128xf32>
    %465 = arith.divf %463, %464 : vector<8x128xf32>
    %466 = vector.extract_strided_slice %448 {offsets = [0, 256], sizes = [8, 128], strides = [1, 1]} : vector<8x384xf32> to vector<8x128xf32>
    %467 = vector.extract_strided_slice %449 {offsets = [0, 256], sizes = [8, 128], strides = [1, 1]} : vector<8x384xf32> to vector<8x128xf32>
    %468 = vector.broadcast %1 : vector<1x128xf32> to vector<8x128xf32>
    %469 = arith.addf %467, %468 : vector<8x128xf32>
    %470 = arith.mulf %457, %469 : vector<8x128xf32>
    %471 = arith.addf %466, %470 : vector<8x128xf32>
    %472 = math.tanh %471 : vector<8x128xf32>
    %cst_85 = arith.constant 1.000000e+00 : f32
    %473 = vector.broadcast %cst_85 : f32 to vector<8x128xf32>
    %474 = arith.subf %473, %465 : vector<8x128xf32>
    %475 = arith.mulf %474, %472 : vector<8x128xf32>
    %476 = arith.mulf %465, %415 : vector<8x128xf32>
    %477 = arith.addf %475, %476 : vector<8x128xf32>
    %cst_86 = arith.constant dense<0.000000e+00> : vector<8x384xf32>
    %478 = tpu.matmul %477, %2, %cst_86 {dimension_numbers = #tpu.dot_dimension_numbers<[1], [0], [0], [1], [0, 0, 1, 1], [], []>} : vector<8x128xf32>, vector<128x384xf32>, vector<8x384xf32> -> vector<8x384xf32>
    %479 = vector.broadcast %4 : vector<1x384xf32> to vector<8x384xf32>
    %480 = arith.addf %478, %479 : vector<8x384xf32>
    %cst_87 = arith.constant dense<0.000000e+00> : vector<8x384xf32>
    %481 = tpu.matmul %447, %3, %cst_87 {dimension_numbers = #tpu.dot_dimension_numbers<[1], [0], [0], [1], [0, 0, 1, 1], [], []>} : vector<8x128xf32>, vector<128x384xf32>, vector<8x384xf32> -> vector<8x384xf32>
    %482 = vector.extract_strided_slice %480 {offsets = [0, 0], sizes = [8, 128], strides = [1, 1]} : vector<8x384xf32> to vector<8x128xf32>
    %483 = vector.extract_strided_slice %481 {offsets = [0, 0], sizes = [8, 128], strides = [1, 1]} : vector<8x384xf32> to vector<8x128xf32>
    %484 = arith.addf %482, %483 : vector<8x128xf32>
    %485 = arith.negf %484 : vector<8x128xf32>
    %486 = math.exp %485 : vector<8x128xf32>
    %cst_88 = arith.constant 1.000000e+00 : f32
    %487 = vector.broadcast %cst_88 : f32 to vector<8x128xf32>
    %488 = arith.addf %487, %486 : vector<8x128xf32>
    %489 = arith.divf %487, %488 : vector<8x128xf32>
    %490 = vector.extract_strided_slice %480 {offsets = [0, 128], sizes = [8, 128], strides = [1, 1]} : vector<8x384xf32> to vector<8x128xf32>
    %491 = vector.extract_strided_slice %481 {offsets = [0, 128], sizes = [8, 128], strides = [1, 1]} : vector<8x384xf32> to vector<8x128xf32>
    %492 = arith.addf %490, %491 : vector<8x128xf32>
    %493 = arith.negf %492 : vector<8x128xf32>
    %494 = math.exp %493 : vector<8x128xf32>
    %cst_89 = arith.constant 1.000000e+00 : f32
    %495 = vector.broadcast %cst_89 : f32 to vector<8x128xf32>
    %496 = arith.addf %495, %494 : vector<8x128xf32>
    %497 = arith.divf %495, %496 : vector<8x128xf32>
    %498 = vector.extract_strided_slice %480 {offsets = [0, 256], sizes = [8, 128], strides = [1, 1]} : vector<8x384xf32> to vector<8x128xf32>
    %499 = vector.extract_strided_slice %481 {offsets = [0, 256], sizes = [8, 128], strides = [1, 1]} : vector<8x384xf32> to vector<8x128xf32>
    %500 = vector.broadcast %5 : vector<1x128xf32> to vector<8x128xf32>
    %501 = arith.addf %499, %500 : vector<8x128xf32>
    %502 = arith.mulf %489, %501 : vector<8x128xf32>
    %503 = arith.addf %498, %502 : vector<8x128xf32>
    %504 = math.tanh %503 : vector<8x128xf32>
    %cst_90 = arith.constant 1.000000e+00 : f32
    %505 = vector.broadcast %cst_90 : f32 to vector<8x128xf32>
    %506 = arith.subf %505, %497 : vector<8x128xf32>
    %507 = arith.mulf %506, %504 : vector<8x128xf32>
    %508 = arith.mulf %497, %447 : vector<8x128xf32>
    %509 = arith.addf %507, %508 : vector<8x128xf32>
    %c0_91 = arith.constant 0 : index
    %c0_92 = arith.constant 0 : index
    %510 = vector.load %arg9[%c0_91, %c0_92] : memref<128x128xf32, #tpu.memory_space<vmem>>, vector<128x128xf32>
    %cst_93 = arith.constant dense<0.000000e+00> : vector<8x128xf32>
    %511 = tpu.matmul %509, %510, %cst_93 {dimension_numbers = #tpu.dot_dimension_numbers<[1], [0], [0], [1], [0, 0, 1, 1], [], []>} : vector<8x128xf32>, vector<128x128xf32>, vector<8x128xf32> -> vector<8x128xf32>
    %c0_94 = arith.constant 0 : index
    %c0_95 = arith.constant 0 : index
    %512 = vector.load %arg10[%c0_94, %c0_95] : memref<1x128xf32, #tpu.memory_space<vmem>>, vector<1x128xf32>
    %513 = vector.broadcast %512 : vector<1x128xf32> to vector<8x128xf32>
    %514 = arith.addf %511, %513 : vector<8x128xf32>
    %c0_96 = arith.constant 0 : index
    %c0_97 = arith.constant 0 : index
    %515 = vector.load %arg11[%c0_96, %c0_97] : memref<8x128xf32, #tpu.memory_space<vmem>>, vector<8x128xf32>
    tpu.vector_store %arg11[%c0_96, %c0_97], %514 {strides = array<i32>} : memref<8x128xf32, #tpu.memory_space<vmem>>, vector<8x128xf32>,
    return
  }
}

</mosaic_0001>

<bundles_post_ra>
// kernel: tpu_custom_call.1
= control target key start
LH: loop header
LB: loop body
LE: loop exit
PB: predicated region body
PF: predicated region fallthrough
CT: control target
= control target key end

     0   :  { %16 = vsyncpa [#allocation3], 0  ;;  %s6181_s0 = inlined_call_operand.vmem [shape: f32[64,8], index: 0, kind: input, shape index: {}]   ;;  %s6182_s1 = inlined_call_operand.vmem [shape: f32[8,384], index: 1, kind: input, shape index: {}]   ;;  %s6183_s2 = inlined_call_operand.hbm [shape: f32[128,384], index: 2, kind: input, shape index: {}]   ;;  %s6184_s3 = inlined_call_operand.vmem [shape: f32[1,384], index: 3, kind: input, shape index: {}]   ;;  %s6185_s4 = inlined_call_operand.vmem [shape: f32[1,128], index: 4, kind: input, shape index: {}]   ;;  %s6186_s5 = inlined_call_operand.hbm [shape: f32[128,384], index: 5, kind: input, shape index: {}]   ;;  %s6187_s6 = inlined_call_operand.hbm [shape: f32[128,384], index: 6, kind: input, shape index: {}]   ;;  %s6188_s7 = inlined_call_operand.vmem [shape: f32[1,384], index: 7, kind: input, shape index: {}]   ;;  %s6189_s8 = inlined_call_operand.vmem [shape: f32[1,128], index: 8, kind: input, shape index: {}]   ;;  %s6190_s9 = inlined_call_operand.hbm [shape: f32[128,128], index: 9, kind: input, shape index: {}]   ;;  %s6191_s10 = inlined_call_operand.vmem [shape: f32[1,128], index: 10, kind: input, shape index: {}]   ;;  %s6192_s11 = inlined_call_operand.hbm [shape: f32[8,128], index: 11, kind: output, shape index: {}]  }
   0x1   :  { %17 = vsyncpa [#allocation6], 0 }
   0x2   :  { %18 = vsyncpa [#allocation9], 0 }
   0x3   :  { %19 = vsyncpa [#allocation4], 0  ;;  %s45_s19 = sshll.u32 %s6186_s5, 4  ;;  %s3484_s20 = smov [#allocation5]   ;;  %s46_s19 = int_to_ptr.hbm [resolvable:$true] %s45_s19 }
   0x4   :  { %s47_s21 = sshll.u32 %s3484_s20, 4  ;;  %s28_s24 = sshll.u32 %s6183_s2, 4  ;;  %s48_s21 = int_to_ptr.vmem [resolvable:$true] %s47_s21  ;;  %s29_s24 = int_to_ptr.hbm [resolvable:$true] %s28_s24 }
   0x5   :  { %s3485_s25 = smov 384   ;;  %s3486_s26 = smov 24  }
   0x6   :  { %53 = dma.hbm_to_vmem [thread:$0]  %s46_s19, 6144, %s48_s21, [#allocation6], %s3485_s25, %s3485_s25, %s3486_s26  }
   0x7   :  { %s3487_s27 = smov [#allocation2]   ;;  %s58_s12 = sshll.u32 %s6187_s6, 4  ;;  %s59_s12 = int_to_ptr.hbm [resolvable:$true] %s58_s12 }
   0x8   :  { %s30_s28 = sshll.u32 %s3487_s27, 4  ;;  %s75_s14 = sshll.u32 %s6190_s9, 4  ;;  %s31_s28 = int_to_ptr.vmem [resolvable:$true] %s30_s28  ;;  %s76_s14 = int_to_ptr.hbm [resolvable:$true] %s75_s14 }
   0x9   :  { %36 = dma.hbm_to_vmem [thread:$0]  %s29_s24, 6144, %s31_s28, [#allocation3], %s3485_s25, %s3485_s25, %s3486_s26  }
   0xa   :  { %s3488_s15 = smov [#allocation7]   ;;  %s3489_s2 = smov [#allocation8]  }
   0xb   :  { %s60_s16 = sshll.u32 %s3488_s15, 4  ;;  %s77_s17 = sshll.u32 %s3489_s2, 4  ;;  %s61_s16 = int_to_ptr.vmem [resolvable:$true] %s60_s16  ;;  %s78_s17 = int_to_ptr.vmem [resolvable:$true] %s77_s17 }
   0xc   :  { %66 = dma.hbm_to_vmem [thread:$0]  %s59_s12, 6144, %s61_s16, [#allocation6], %s3485_s25, %s3485_s25, %s3486_s26  }
   0xd   :  { %s3490_s18 = smov 128   ;;  %s3491_s19 = smov 8  }
   0xe   :  { %83 = dma.hbm_to_vmem [thread:$0]  %s76_s14, 2048, %s78_s17, [#allocation9], %s3490_s18, %s3490_s18, %s3491_s19  }
   0xf   :  { %3476 = dma.done.wait [#allocation3], 6144  }
  0x10   :  { %3477 = vsyncadd [#allocation3], 4294961152 }
  0x11   :  { %3478 = dma.done.wait [#allocation6], 12288  }
  0x12   :  { %3479 = vsyncadd [#allocation6], 4294955008 }
  0x13   :  { %3480 = dma.done.wait [#allocation9], 2048  }
  0x14   :  { %3481 = vsyncadd [#allocation9], 4294965248  ;;  %vm268_vm0 = vcmask 64512   ;;  %v257_v0 = vld [vmem:[%s6182_s1] sm:$0xff]  ;;  %v3569_v1 = vld [vmem:[#allocation2 + $0x168] sm:$0xff]  ;;  %v6193_v38 = vmov 0.0  }
  0x15   :  { %v3574_v2 = vld [vmem:[%s6181_s0] sm:$0xff]  ;;  %308 = vmatpush.msra.mxu0 %v257_v0  ;;  %416 = vmatpush.msra.mxu3 %v3569_v1  ;;  %v3577_v3 = vld [vmem:[#allocation2 + $0x150] sm:$0xff]  ;;  %v3581_v4 = vld [vmem:[#allocation2 + $0x138] sm:$0xff]  ;;  %s3493_s13 = smov [#allocation10]   ;;  %s2685_s16 = sshll.u32 %s6192_s11, 4  ;;  %s2686_s16 = int_to_ptr.hbm [resolvable:$true] %s2685_s16 }
  0x16   :  { %2697 = vmatmul.msk.f32.vlgmr.msra.gmra.mxu0 %vm268_vm0, %v3574_v2  ;;  %v3584_v5 = vld [vmem:[#allocation2 + $0x120] sm:$0xff]  ;;  %v3587_v6 = vld [vmem:[#allocation2 + $0x178] sm:$0xff]  ;;  %v3589_v7 = vld [vmem:[#allocation2 + $0x108] sm:$0xff] }
  0x17   :  { %417 = vmatpush.msra.mxu3 %v3577_v3  ;;  %456 = vmatpush.msrb.mxu0 %v3587_v6  ;;  %v3592_v8 = vld [vmem:[#allocation2 + $0x160] sm:$0xff]  ;;  %v3598_v9 = vld [vmem:[%s6181_s0 + $0x8] sm:$0xff]  ;;  %v3600_v10 = vld [vmem:[#allocation2 + $0xf0] sm:$0xff] }
  0x18   :  { %v3603_v11 = vld [vmem:[#allocation2 + $0x148] sm:$0xff]  ;;  %v3608_v12 = vld [vmem:[#allocation2 + $0xd8] sm:$0xff]  ;;  %v3610_v13 = vld [vmem:[#allocation2 + $0x130] sm:$0xff] }
  0x19   :  { %418 = vmatpush.msra.mxu3 %v3581_v4  ;;  %457 = vmatpush.msrb.mxu0 %v3592_v8  ;;  %6529 = vst [vmem:[#allocation15_spill] sm:$0xff] %v3610_v13  ;;  %v3613_v14 = vld [vmem:[#allocation2 + $0xc0] sm:$0xff]  ;;  %v3616_v15 = vld [vmem:[#allocation2 + $0x118] sm:$0xff]  ;;  %v3620_v16 = vld [vmem:[#allocation2 + $0xa8] sm:$0xff] }
  0x1a   :  { %6530 = vst [vmem:[#allocation16_spill] sm:$0xff] %v3616_v15  ;;  %v3622_v17 = vld [vmem:[#allocation2 + $0x100] sm:$0xff]  ;;  %v3628_v18 = vld [vmem:[%s6181_s0 + $0x10] sm:$0xff]  ;;  %v3633_v20 = vld [vmem:[#allocation2 + $0xe8] sm:$0xff] }
  0x1b   :  { %419 = vmatpush.msra.mxu3 %v3584_v5  ;;  %458 = vmatpush.msrb.mxu0 %v3603_v11  ;;  %6531 = vst [vmem:[#allocation17_spill] sm:$0xff] %v3622_v17  ;;  %v3631_v19 = vld [vmem:[#allocation2 + $0x90] sm:$0xff]  ;;  %v3639_v21 = vld [vmem:[#allocation2 + $0x78] sm:$0xff]  ;;  %v3645_v23 = vld [vmem:[#allocation2 + $0x60] sm:$0xff] }
  0x1c   :  { %6532 = vst [vmem:[#allocation18_spill] sm:$0xff] %v3633_v20  ;;  %v3641_v22 = vld [vmem:[#allocation2 + $0xd0] sm:$0xff]  ;;  %v3647_v24 = vld [vmem:[#allocation2 + $0xb8] sm:$0xff]  ;;  %v3651_v25 = vld [vmem:[#allocation2 + $0x48] sm:$0xff] }
  0x1d   :  { %420 = vmatpush.msra.mxu3 %v3589_v7  ;;  %459 = vmatpush.msrb.mxu0 %v3610_v13  ;;  %6533 = vst [vmem:[#allocation19_spill] sm:$0xff] %v3641_v22  ;;  %v3653_v26 = vld [vmem:[#allocation2 + $0xa0] sm:$0xff]  ;;  %v3659_v27 = vld [vmem:[%s6181_s0 + $0x18] sm:$0xff]  ;;  %v3662_v28 = vld [vmem:[#allocation2 + $0x30] sm:$0xff] }
  0x1e   :  { %2698 = vmatmul.msk.f32.gmra.mxu0 %vm268_vm0, %v3598_v9  ;;  %6534 = vst [vmem:[#allocation20_spill] sm:$0xff] %v3647_v24  ;;  %v3664_v29 = vld [vmem:[#allocation2 + $0x88] sm:$0xff]  ;;  %v3670_v30 = vld [vmem:[#allocation2 + $0x18] sm:$0xff]  ;;  %v3672_v31 = vld [vmem:[#allocation2 + $0x70] sm:$0xff] }
  0x1f   :  { %421 = vmatpush.msra.mxu3 %v3600_v10  ;;  %460 = vmatpush.msrb.mxu0 %v3616_v15  ;;  %6535 = vst [vmem:[#allocation21_spill] sm:$0xff] %v3653_v26  ;;  %v3676_v32 = vld [vmem:[#allocation2] sm:$0xff]  ;;  %v3678_v33 = vld [vmem:[#allocation2 + $0x58] sm:$0xff]  ;;  %v259_v34 = vld [vmem:[%s6182_s1 + $0x10] sm:$0xff] }
  0x20   :  { %6536 = vst [vmem:[#allocation22_spill] sm:$0xff] %v3664_v29  ;;  %v3685_v35 = vld [vmem:[#allocation2 + $0x170] sm:$0xff]  ;;  %390 = vmatpush.msra.mxu2 %v259_v34  ;;  %v3687_v36 = vld [vmem:[#allocation2 + $0x40] sm:$0xff]  ;;  %v3695_v39 = vld [vmem:[#allocation2 + $0x158] sm:$0xff] }
  0x21   :  { %422 = vmatpush.msra.mxu3 %v3608_v12  ;;  %461 = vmatpush.msrb.mxu0 %v3622_v17  ;;  %6537 = vst [vmem:[#allocation23_spill] sm:$0xff] %v3672_v31  ;;  %v253_v37 = vld [vmem:[%s6181_s0 + $0x20] sm:$0xff]  ;;  %v3699_v40 = vld [vmem:[#allocation2 + $0x28] sm:$0xff]  ;;  %v3709_v43 = vld [vmem:[#allocation2 + $0x10] sm:$0xff] }
  0x22   :  { %6538 = vst [vmem:[#allocation24_spill] sm:$0xff] %v3678_v33  ;;  %2713 = vmatmul.msk.f32.vlgmr.msra.gmra.mxu2 %vm268_vm0, %v3574_v2  ;;  %v258_v41 = vld [vmem:[%s6182_s1 + $0x8] sm:$0xff]  ;;  %v3707_v42 = vld [vmem:[#allocation2 + $0x140] sm:$0xff]  ;;  %v3719_v45 = vld [vmem:[#allocation2 + $0x110] sm:$0xff]  ;;  %s2683_s1 = sshll.u32 %s3493_s13, 4  ;;  %s2684_s1 = int_to_ptr.vmem [resolvable:$true] %s2683_s1 }
  0x23   :  { %423 = vmatpush.msra.mxu3 %v3613_v14  ;;  %462 = vmatpush.msrb.mxu0 %v3633_v20  ;;  %6539 = vst [vmem:[#allocation25_spill] sm:$0xff] %v3685_v35  ;;  %v3713_v44 = vld [vmem:[#allocation2 + $0x128] sm:$0xff]  ;;  %v3725_v47 = vld [vmem:[#allocation2 + $0xf8] sm:$0xff]  ;;  %v3731_v48 = vld [vmem:[#allocation2 + $0xe0] sm:$0xff] }
  0x24   :  { %6540 = vst [vmem:[#allocation26_spill] sm:$0xff] %v3687_v36  ;;  %349 = vmatpush.msra.mxu1 %v258_v41  ;;  %v254_v46 = vld [vmem:[%s6181_s0 + $0x28] sm:$0xff]  ;;  %v3739_v50 = vld [vmem:[#allocation2 + $0xb0] sm:$0xff]  ;;  %v3745_v52 = vld [vmem:[#allocation2 + $0x98] sm:$0xff] }
  0x25   :  { %424 = vmatpush.msra.mxu3 %v3620_v16  ;;  %463 = vmatpush.msrb.mxu0 %v3641_v22  ;;  %6541 = vst [vmem:[#allocation27_spill] sm:$0xff] %v3695_v39  ;;  %v3734_v49 = vld [vmem:[#allocation2 + $0xc8] sm:$0xff]  ;;  %v255_v51 = vld [vmem:[%s6181_s0 + $0x30] sm:$0xff]  ;;  %v3751_v53 = vld [vmem:[#allocation2 + $0x80] sm:$0xff] }
  0x26   :  { %2699 = vmatmul.msk.f32.gmra.mxu0 %vm268_vm0, %v3628_v18  ;;  %6542 = vst [vmem:[#allocation28_spill] sm:$0xff] %v3699_v40  ;;  %2705 = vmatmul.msk.f32.vlgmr.msra.gmra.mxu1 %vm268_vm0, %v3574_v2  ;;  %v3754_v54 = vld [vmem:[#allocation2 + $0x68] sm:$0xff]  ;;  %v3759_v55 = vld [vmem:[#allocation2 + $0x50] sm:$0xff]  ;;  %v256_v56 = vld [vmem:[%s6181_s0 + $0x38] sm:$0xff] }
  0x27   :  { %425 = vmatpush.msra.mxu3 %v3631_v19  ;;  %464 = vmatpush.msrb.mxu0 %v3647_v24  ;;  %6543 = vst [vmem:[#allocation29_spill] sm:$0xff] %v3707_v42  ;;  %v3765_v57 = vld [vmem:[#allocation2 + $0x38] sm:$0xff]  ;;  %v3771_v58 = vld [vmem:[#allocation2 + $0x20] sm:$0xff]  ;;  %v3774_v59 = vld [vmem:[#allocation2 + $0x8] sm:$0xff] }
  0x28   :  { %6544 = vst [vmem:[#allocation30_spill] sm:$0xff] %v3709_v43  ;;  %v3794_v62 = vld [vmem:[#allocation5 + $0x168] sm:$0xff]  ;;  %v3803_v0 = vld [vmem:[%s6184_s3] sm:$0x7]  ;;  %v3805_v2 = vld [vmem:[#allocation5 + $0x150] sm:$0xff] }
  0x29   :  { %426 = vmatpush.msra.mxu3 %v3639_v21  ;;  %465 = vmatpush.msrb.mxu0 %v3653_v26  ;;  %6545 = vst [vmem:[#allocation31_spill] sm:$0xff] %v3713_v44  ;;  %v3796_v63 = vld [vmem:[#allocation7 + $0x168] sm:$0xff]  ;;  %v3816_v34 = vperm.slane %v3803_v0, 0  ;;  %v3820_v41 = vld [vmem:[#allocation5 + $0x120] sm:$0xff]  ;;  %v3897_v24 = vld [vmem:[#allocation5 + $0xd0] sm:$0xff] }
  0x2a   :  { %6546 = vst [vmem:[#allocation32_spill] sm:$0xff] %v3719_v45  ;;  %2714 = vmatmul.msk.f32.gmra.mxu2 %vm268_vm0, %v3598_v9  ;;  %534 = vmatpush.msrb.mxu1 %v3794_v62  ;;  %v3876_v26 = vld [vmem:[#allocation5 + $0x100] sm:$0xff]  ;;  %v3964_v13 = vld [vmem:[#allocation5 + $0x58] sm:$0xff] }
  0x2b   :  { %427 = vmatpush.msra.mxu3 %v3645_v23  ;;  %466 = vmatpush.msrb.mxu0 %v3664_v29  ;;  %6547 = vst [vmem:[#allocation33_spill] sm:$0xff] %v3725_v47  ;;  %v3871_v29 = vld [vmem:[#allocation7 + $0xa8] sm:$0xff] }
  0x2c   :  { %6548 = vst [vmem:[#allocation34_spill] sm:$0xff] %v3731_v48  ;;  %535 = vmatpush.msrb.mxu1 %v3805_v2 }
  0x2d   :  { %428 = vmatpush.msra.mxu3 %v3651_v25  ;;  %467 = vmatpush.msrb.mxu0 %v3672_v31  ;;  %6549 = vst [vmem:[#allocation35_spill] sm:$0xff] %v3734_v49  ;;  %v3869_v31 = vld [vmem:[#allocation5 + $0x118] sm:$0xff] }
  0x2e   :  { %2700 = vmatmul.msk.f32.gmra.mxu0 %vm268_vm0, %v3659_v27  ;;  %2706 = vmatmul.msk.f32.gmra.mxu1 %vm268_vm0, %v3598_v9  ;;  %6550 = vst [vmem:[#allocation36_spill] sm:$0xff] %v3739_v50  ;;  %v3807_v9 = vld [vmem:[#allocation7 + $0x150] sm:$0xff] }
  0x2f   :  { %429 = vmatpush.msra.mxu3 %v3662_v28  ;;  %468 = vmatpush.msrb.mxu0 %v3678_v33  ;;  %6551 = vst [vmem:[#allocation37_spill] sm:$0xff] %v3745_v52 }
  0x30   :  { %6552 = vst [vmem:[#allocation38_spill] sm:$0xff] %v3751_v53 }
  0x31   :  { %430 = vmatpush.msra.mxu3 %v3670_v30  ;;  %469 = vmatpush.msrb.mxu0 %v3687_v36  ;;  %6553 = vst [vmem:[#allocation39_spill] sm:$0xff] %v3754_v54  ;;  %v3860_v36 = vld [vmem:[#allocation7 + $0xc0] sm:$0xff] }
  0x32   :  { %2715 = vmatmul.msk.f32.gmra.mxu2 %vm268_vm0, %v3628_v18  ;;  %6554 = vst [vmem:[#allocation40_spill] sm:$0xff] %v3759_v55 }
  0x33   :  { %431 = vmatpush.msra.mxu3 %v3676_v32  ;;  %470 = vmatpush.msrb.mxu0 %v3699_v40  ;;  %6555 = vst [vmem:[#allocation41_spill] sm:$0xff] %v3765_v57  ;;  %v3858_v40 = vld [vmem:[#allocation5 + $0x130] sm:$0xff] }
  0x34   :  { %432 = vmatmul.f32.vlgmr.msra.gmra.mxu3 %v6193_v38  ;;  %6556 = vst [vmem:[#allocation42_spill] sm:$0xff] %v3771_v58 }
  0x35   :  { %436 = vmatpush.msrb.mxu3 %v3685_v35  ;;  %471 = vmatpush.msrb.mxu0 %v3709_v43  ;;  %6557 = vst [vmem:[#allocation43_spill] sm:$0xff] %v3774_v59 }
  0x36   :  { %2701 = vmatmul.msk.f32.gmra.mxu0 %vm268_vm0, %v253_v37  ;;  %2707 = vmatmul.msk.f32.gmra.mxu1 %vm268_vm0, %v3628_v18  ;;  %6559 = vst [vmem:[#allocation45_spill] sm:$0xff] %v3796_v63  ;;  %v3811_v18 = vld [vmem:[#allocation5 + $0x138] sm:$0xff] }
  0x37   :  { %437 = vmatpush.msrb.mxu3 %v3695_v39  ;;  %594 = vmatpush.msra.mxu0 %v3796_v63  ;;  %6560 = vst [vmem:[#allocation46_spill] sm:$0xff] %v3807_v9  ;;  %v3850_v63 = vld [vmem:[#allocation7 + $0xd8] sm:$0xff] }
  0x38   :  { %6562 = vst [vmem:[#allocation48_spill] sm:$0xff] %v3816_v34  ;;  %536 = vmatpush.msrb.mxu1 %v3811_v18 }
  0x39   :  { %438 = vmatpush.msrb.mxu3 %v3707_v42  ;;  %595 = vmatpush.msra.mxu0 %v3807_v9  ;;  %6563 = vst [vmem:[#allocation49_spill] sm:$0xff] %v3820_v41  ;;  %v3839_v9 = vld [vmem:[#allocation5 + $0x160] sm:$0xff] }
  0x3a   :  { %2716 = vmatmul.msk.f32.gmra.mxu2 %vm268_vm0, %v3659_v27  ;;  %537 = vmatpush.msrb.mxu1 %v3820_v41  ;;  %6571 = vst [vmem:[#allocation57_spill] sm:$0xff] %v3850_v63  ;;  %v3949_v41 = vld [vmem:[#allocation5 + $0x70] sm:$0xff] }
  0x3b   :  { %439 = vmatpush.msrb.mxu3 %v3713_v44  ;;  %6573 = vst [vmem:[#allocation59_spill] sm:$0xff] %v3860_v36 }
  0x3c   :  { %6576 = vst [vmem:[#allocation62_spill] sm:$0xff] %v3871_v29 }
  0x3d   :  { %440 = vmatpush.msrb.mxu3 %v3719_v45 }
  0x3e   :  { %2702 = vmatmul.msk.f32.gmra.mxu0 %vm268_vm0, %v254_v46  ;;  %2708 = vmatmul.msk.f32.gmra.mxu1 %vm268_vm0, %v3659_v27  ;;  %v3813_v27 = vld [vmem:[#allocation7 + $0x138] sm:$0xff] }
  0x3f   :  { %441 = vmatpush.msrb.mxu3 %v3725_v47  ;;  %6561 = vst [vmem:[#allocation47_spill] sm:$0xff] %v3813_v27  ;;  %596 = vmatpush.msra.mxu0 %v3813_v27  ;;  %v3837_v27 = vld [vmem:[#allocation5 + $0xf0] sm:$0xff] }
  0x40   :  { %6568 = vst [vmem:[#allocation54_spill] sm:$0xff] %v3837_v27 }
  0x41   :  { %442 = vmatpush.msrb.mxu3 %v3731_v48 }
  0x42   :  { %2717 = vmatmul.msk.f32.gmra.mxu2 %vm268_vm0, %v253_v37 }
  0x43   :  { %443 = vmatpush.msrb.mxu3 %v3734_v49 }
  0x45   :  { %444 = vmatpush.msrb.mxu3 %v3739_v50 }
  0x46   :  { %2703 = vmatmul.msk.f32.gmra.mxu0 %vm268_vm0, %v255_v51  ;;  %2709 = vmatmul.msk.f32.gmra.mxu1 %vm268_vm0, %v253_v37 }
  0x47   :  { %445 = vmatpush.msrb.mxu3 %v3745_v52 }
  0x49   :  { %446 = vmatpush.msrb.mxu3 %v3751_v53 }
  0x4a   :  { %2718 = vmatmul.msk.f32.gmra.mxu2 %vm268_vm0, %v254_v46 }
  0x4b   :  { %447 = vmatpush.msrb.mxu3 %v3754_v54 }
  0x4d   :  { %448 = vmatpush.msrb.mxu3 %v3759_v55 }
  0x4e   :  { %2704 = vmatmul.msk.f32.gmra.mxu0 %vm268_vm0, %v256_v56  ;;  %2710 = vmatmul.msk.f32.gmra.mxu1 %vm268_vm0, %v254_v46  ;;  %v3822_v46 = vld [vmem:[#allocation7 + $0x120] sm:$0xff] }
  0x4f   :  { %449 = vmatpush.msrb.mxu3 %v3765_v57  ;;  %6564 = vst [vmem:[#allocation50_spill] sm:$0xff] %v3822_v46  ;;  %597 = vmatpush.msra.mxu0 %v3822_v46  ;;  %v3846_v46 = vld [vmem:[#allocation5 + $0x148] sm:$0xff] }
  0x51   :  { %450 = vmatpush.msrb.mxu3 %v3771_v58 }
  0x52   :  { %2719 = vmatmul.msk.f32.gmra.mxu2 %vm268_vm0, %v255_v51 }
  0x53   :  { %451 = vmatpush.msrb.mxu3 %v3774_v59 }
  0x54   :  { %452 = vmatmul.f32.vlgmr.msrb.gmra.mxu3 %v6193_v38 }
  0x56   :  { %472 = vmatmul.f32.vlgmr.msrb.gmra.mxu0 %v6193_v38  ;;  %2711 = vmatmul.msk.f32.gmra.mxu1 %vm268_vm0, %v255_v51  ;;  %v3831_v38 = vld [vmem:[#allocation5 + $0x178] sm:$0xff] }
  0x57   :  { %574 = vmatpush.msra.mxu3 %v3831_v38 }
  0x59   :  { %575 = vmatpush.msra.mxu3 %v3839_v9 }
  0x5a   :  { %2720 = vmatmul.msk.f32.gmra.mxu2 %vm268_vm0, %v256_v56 }
  0x5b   :  { %576 = vmatpush.msra.mxu3 %v3846_v46 }
  0x5d   :  { %577 = vmatpush.msra.mxu3 %v3858_v40 }
  0x5e   :  { %2712 = vmatmul.msk.f32.gmra.mxu1 %vm268_vm0, %v256_v56  ;;  %v3829_v56 = vld [vmem:[#allocation5 + $0x108] sm:$0xff] }
  0x5f   :  { %6566 = vst [vmem:[#allocation52_spill] sm:$0xff] %v3829_v56  ;;  %538 = vmatpush.msrb.mxu1 %v3829_v56  ;;  %578 = vmatpush.msra.mxu3 %v3869_v31  ;;  %v3937_v56 = vld [vmem:[#allocation5 + $0x88] sm:$0xff] }
  0x61   :  { %539 = vmatpush.msrb.mxu1 %v3837_v27  ;;  %579 = vmatpush.msra.mxu3 %v3876_v26  ;;  %v3925_v27 = vld [vmem:[#allocation5 + $0xa0] sm:$0xff] }
  0x93   :  { %v3790_v60 = vpop.f32.mrf.mxu0 }
  0x94   :  { %v311_v22 = vadd.f32 %v3790_v60, %v3816_v34  ;;  %v3929_v60 = vld [vmem:[#allocation7 + $0x30] sm:$0xff] }
  0x95   :  { %6587 = vst [vmem:[#allocation73_spill] sm:$0xff] %v3929_v60 }
  0x9b   :  { %v3792_v61 = vpop.f32.mrf.mxu0 }
  0x9c   :  { %6558 = vst [vmem:[#allocation44_spill] sm:$0xff] %v3792_v61  ;;  %v3833_v61 = vld [vmem:[#allocation7 + $0x108] sm:$0xff] }
  0x9d   :  { %6567 = vst [vmem:[#allocation53_spill] sm:$0xff] %v3833_v61  ;;  %598 = vmatpush.msra.mxu0 %v3833_v61  ;;  %v3856_v61 = vld [vmem:[#allocation5 + $0xc0] sm:$0xff] }
  0x9e   :  { %6572 = vst [vmem:[#allocation58_spill] sm:$0xff] %v3856_v61 }
  0xa3   :  { %v316_v37 = vpop.f32.mrf.mxu0 }
  0xa4   :  { %v3825_v51 = vadd.f32 %v316_v37, %v3816_v34  ;;  %v3841_v37 = vld [vmem:[#allocation7 + $0xf0] sm:$0xff] }
  0xa5   :  { %6569 = vst [vmem:[#allocation55_spill] sm:$0xff] %v3841_v37  ;;  %599 = vmatpush.msra.mxu0 %v3841_v37  ;;  %v3867_v37 = vld [vmem:[#allocation5 + $0xa8] sm:$0xff] }
  0xa6   :  { %6565 = vst [vmem:[#allocation51_spill] sm:$0xff] %v3825_v51  ;;  %v3844_v51 = vld [vmem:[#allocation5 + $0xd8] sm:$0xff] }
  0xa7   :  { %6570 = vst [vmem:[#allocation56_spill] sm:$0xff] %v3844_v51  ;;  %540 = vmatpush.msrb.mxu1 %v3844_v51  ;;  %600 = vmatpush.msra.mxu0 %v3850_v63  ;;  %v3874_v63 = vld [vmem:[#allocation5 + $0x90] sm:$0xff] }
  0xa8   :  { %6575 = vst [vmem:[#allocation61_spill] sm:$0xff] %v3867_v37 }
  0xa9   :  { %541 = vmatpush.msrb.mxu1 %v3856_v61  ;;  %601 = vmatpush.msra.mxu0 %v3860_v36  ;;  %6577 = vst [vmem:[#allocation63_spill] sm:$0xff] %v3874_v63  ;;  %v3885_v61 = vld [vmem:[#allocation5 + $0xe8] sm:$0xff]  ;;  %v3889_v36 = vld [vmem:[#allocation7 + $0x78] sm:$0xff] }
  0xaa   :  { %6580 = vst [vmem:[#allocation66_spill] sm:$0xff] %v3889_v36  ;;  %580 = vmatpush.msra.mxu3 %v3885_v61 }
  0xab   :  { %v319_v43 = vpop.f32.mrf.mxu0  ;;  %542 = vmatpush.msrb.mxu1 %v3867_v37  ;;  %602 = vmatpush.msra.mxu0 %v3871_v29  ;;  %v3895_v29 = vld [vmem:[#allocation5 + $0x60] sm:$0xff] }
  0xac   :  { %v3863_v33 = vadd.f32 %v319_v43, %v3816_v34  ;;  %v3880_v43 = vld [vmem:[#allocation7 + $0x90] sm:$0xff]  ;;  %6581 = vst [vmem:[#allocation67_spill] sm:$0xff] %v3895_v29  ;;  %581 = vmatpush.msra.mxu3 %v3897_v24 }
  0xad   :  { %6578 = vst [vmem:[#allocation64_spill] sm:$0xff] %v3880_v43  ;;  %543 = vmatpush.msrb.mxu1 %v3874_v63  ;;  %603 = vmatpush.msra.mxu0 %v3880_v43  ;;  %v3904_v63 = vld [vmem:[#allocation7 + $0x60] sm:$0xff]  ;;  %v3907_v43 = vld [vmem:[#allocation5 + $0x170] sm:$0xff] }
  0xae   :  { %6574 = vst [vmem:[#allocation60_spill] sm:$0xff] %v3863_v33  ;;  %v3883_v33 = vld [vmem:[#allocation5 + $0x78] sm:$0xff]  ;;  %554 = vmatpush.msrb.mxu2 %v3907_v43 }
  0xaf   :  { %6579 = vst [vmem:[#allocation65_spill] sm:$0xff] %v3883_v33  ;;  %544 = vmatpush.msrb.mxu1 %v3883_v33  ;;  %604 = vmatpush.msra.mxu0 %v3889_v36  ;;  %v3909_v33 = vld [vmem:[#allocation5 + $0x48] sm:$0xff]  ;;  %v3911_v36 = vld [vmem:[#allocation5 + $0xb8] sm:$0xff] }
  0xb0   :  { %6583 = vst [vmem:[#allocation69_spill] sm:$0xff] %v3904_v63  ;;  %582 = vmatpush.msra.mxu3 %v3911_v36 }
  0xb1   :  { %545 = vmatpush.msrb.mxu1 %v3895_v29  ;;  %605 = vmatpush.msra.mxu0 %v3904_v63  ;;  %6584 = vst [vmem:[#allocation70_spill] sm:$0xff] %v3909_v33  ;;  %v3921_v63 = vld [vmem:[#allocation5 + $0x30] sm:$0xff]  ;;  %v3923_v29 = vld [vmem:[#allocation5 + $0x158] sm:$0xff] }
  0xb2   :  { %6586 = vst [vmem:[#allocation72_spill] sm:$0xff] %v3921_v63  ;;  %555 = vmatpush.msrb.mxu2 %v3923_v29  ;;  %583 = vmatpush.msra.mxu3 %v3925_v27 }
  0xb3   :  { %v322_v37 = vpop.f32.mrf.mxu0  ;;  %546 = vmatpush.msrb.mxu1 %v3909_v33  ;;  %v3933_v33 = vld [vmem:[#allocation5 + $0x18] sm:$0xff] }
  0xb4   :  { %v3900_v51 = vadd.f32 %v322_v37, %v3816_v34  ;;  %v3917_v37 = vld [vmem:[#allocation7 + $0x48] sm:$0xff]  ;;  %6588 = vst [vmem:[#allocation74_spill] sm:$0xff] %v3933_v33  ;;  %584 = vmatpush.msra.mxu3 %v3937_v56 }
  0xb5   :  { %6585 = vst [vmem:[#allocation71_spill] sm:$0xff] %v3917_v37  ;;  %606 = vmatpush.msra.mxu0 %v3917_v37  ;;  %547 = vmatpush.msrb.mxu1 %v3921_v63  ;;  %v3935_v37 = vld [vmem:[#allocation5 + $0x140] sm:$0xff] }
  0xb6   :  { %6582 = vst [vmem:[#allocation68_spill] sm:$0xff] %v3900_v51  ;;  %556 = vmatpush.msrb.mxu2 %v3935_v37  ;;  %v3945_v63 = vld [vmem:[#allocation5] sm:$0xff]  ;;  %585 = vmatpush.msra.mxu3 %v3949_v41 }
  0xb7   :  { %v433_v51 = vpop.f32.mrf.mxu3  ;;  %607 = vmatpush.msra.mxu0 %v3929_v60  ;;  %548 = vmatpush.msrb.mxu1 %v3933_v33  ;;  %6590 = vst [vmem:[#allocation76_spill] sm:$0xff] %v3945_v63  ;;  %v3947_v60 = vld [vmem:[#allocation5 + $0x128] sm:$0xff]  ;;  %v3958_v33 = vld [vmem:[#allocation7 + $0x170] sm:$0xff] }
  0xb8   :  { %v476_v20 = vadd.f32 %v433_v51, %v311_v22  ;;  %v3941_v22 = vld [vmem:[#allocation7 + $0x18] sm:$0xff]  ;;  %6591 = vst [vmem:[#allocation77_spill] sm:$0xff] %v3947_v60  ;;  %557 = vmatpush.msrb.mxu2 %v3947_v60  ;;  %586 = vmatpush.msra.mxu3 %v3964_v13 }
  0xb9   :  { %6589 = vst [vmem:[#allocation75_spill] sm:$0xff] %v3941_v22  ;;  %608 = vmatpush.msra.mxu0 %v3941_v22  ;;  %549 = vmatpush.msrb.mxu1 %v3945_v63  ;;  %v3962_v22 = vld [vmem:[#allocation5 + $0x110] sm:$0xff]  ;;  %v3988_v63 = vld [vmem:[#allocation7 + $0x128] sm:$0xff] }
  0xba   :  { %v2721_v17 = vmul.f32 -1.442695, %v476_v20  ;;  %v3956_v20 = vld [vmem:[#allocation7] sm:$0xff]  ;;  %6594 = vst [vmem:[#allocation80_spill] sm:$0xff] %v3958_v33  ;;  %558 = vmatpush.msrb.mxu2 %v3962_v22 }
  0xbb   :  { %v325_v51 = vpop.f32.mrf.mxu0  ;;  %6593 = vst [vmem:[#allocation79_spill] sm:$0xff] %v3956_v20  ;;  %609 = vmatpush.msra.mxu0 %v3956_v20  ;;  %614 = vmatpush.msra.mxu1 %v3958_v33  ;;  %v3978_v20 = vld [vmem:[#allocation7 + $0x140] sm:$0xff]  ;;  %v3984_v33 = vld [vmem:[#allocation5 + $0x28] sm:$0xff] }
  0xbc   :  { %v3952_v15 = vadd.f32 %v325_v51, %v3816_v34  ;;  %2766 = vpow2.f32 %v2721_v17  ;;  %6595 = vst [vmem:[#allocation81_spill] sm:$0xff] %v3962_v22  ;;  %v3968_v51 = vld [vmem:[#allocation7 + $0x158] sm:$0xff]  ;;  %v3974_v17 = vld [vmem:[#allocation5 + $0x40] sm:$0xff] }
  0xbd   :  { %725 = vmatpush.msrb.mxu0 %v3685_v35  ;;  %6596 = vst [vmem:[#allocation82_spill] sm:$0xff] %v3968_v51  ;;  %615 = vmatpush.msra.mxu1 %v3968_v51  ;;  %v3982_v35 = vld [vmem:[#allocation5 + $0xe0] sm:$0xff] }
  0xbe   :  { %6592 = vst [vmem:[#allocation78_spill] sm:$0xff] %v3952_v15  ;;  %v3972_v15 = vld [vmem:[#allocation5 + $0xf8] sm:$0xff]  ;;  %587 = vmatpush.msra.mxu3 %v3974_v17 }
  0xbf   :  { %6597 = vst [vmem:[#allocation83_spill] sm:$0xff] %v3972_v15  ;;  %726 = vmatpush.msrb.mxu0 %v3695_v39  ;;  %559 = vmatpush.msrb.mxu2 %v3972_v15  ;;  %v3992_v39 = vld [vmem:[#allocation5 + $0xc8] sm:$0xff]  ;;  %v3994_v15 = vld [vmem:[#allocation5 + $0x10] sm:$0xff] }
  0xc0   :  { %6598 = vst [vmem:[#allocation84_spill] sm:$0xff] %v3978_v20  ;;  %616 = vmatpush.msra.mxu1 %v3978_v20  ;;  %588 = vmatpush.msra.mxu3 %v3984_v33  ;;  %v4005_v20 = vld [vmem:[#allocation5 + $0xb0] sm:$0xff] }
  0xc1   :  { %6599 = vst [vmem:[#allocation85_spill] sm:$0xff] %v3982_v35  ;;  %727 = vmatpush.msrb.mxu0 %v3707_v42  ;;  %560 = vmatpush.msrb.mxu2 %v3982_v35  ;;  %v4001_v42 = vld [vmem:[#allocation7 + $0x110] sm:$0xff] }
  0xc2   :  { %6600 = vst [vmem:[#allocation86_spill] sm:$0xff] %v3988_v63  ;;  %v2767_v22 = vpop.eup %2766  ;;  %617 = vmatpush.msra.mxu1 %v3988_v63  ;;  %589 = vmatpush.msra.mxu3 %v3994_v15  ;;  %v4039_v63 = vld [vmem:[#allocation7 + $0xb0] sm:$0xff] }
  0xc3   :  { %v328_v51 = vpop.f32.mrf.mxu0  ;;  %728 = vmatpush.msrb.mxu0 %v3713_v44  ;;  %6602 = vst [vmem:[#allocation88_spill] sm:$0xff] %v4001_v42  ;;  %561 = vmatpush.msrb.mxu2 %v3992_v39  ;;  %v4007_v35 = vadd.f32 1.0, %v2767_v22  ;;  %v4019_v44 = vld [vmem:[#allocation7 + $0xe0] sm:$0xff] }
  0xc4   :  { %v3997_v60 = vadd.f32 %v328_v51, %v3816_v34  ;;  %618 = vmatpush.msra.mxu1 %v4001_v42  ;;  %705 = vmatpush.msrb.mxu3 %v3569_v1  ;;  %v4011_v51 = vld [vmem:[#allocation7 + $0xf8] sm:$0xff]  ;;  %6604 = vst [vmem:[#allocation90_spill] sm:$0xff] %v4019_v44  ;;  %v4023_v22 = vld [vmem:[#allocation5 + $0x80] sm:$0xff] }
  0xc5   :  { %6603 = vst [vmem:[#allocation89_spill] sm:$0xff] %v4011_v51  ;;  %729 = vmatpush.msrb.mxu0 %v3719_v45  ;;  %562 = vmatpush.msrb.mxu2 %v4005_v20  ;;  %2768 = vrcp.f32 %v4007_v35  ;;  %v4028_v45 = vld [vmem:[#allocation7 + $0xc8] sm:$0xff]  ;;  %vm486_vm2 = vweird.f32 %v4007_v35 }
  0xc6   :  { %6601 = vst [vmem:[#allocation87_spill] sm:$0xff] %v3997_v60  ;;  %v4015_v60 = vld [vmem:[#allocation5 + $0x98] sm:$0xff]  ;;  %619 = vmatpush.msra.mxu1 %v4011_v51  ;;  %706 = vmatpush.msrb.mxu3 %v3577_v3  ;;  %v4032_v51 = vld [vmem:[#allocation5 + $0x68] sm:$0xff] }
  0xc7   :  { %730 = vmatpush.msrb.mxu0 %v3725_v47  ;;  %563 = vmatpush.msrb.mxu2 %v4015_v60  ;;  %6605 = vst [vmem:[#allocation91_spill] sm:$0xff] %v4028_v45 }
  0xc8   :  { %620 = vmatpush.msra.mxu1 %v4019_v44  ;;  %707 = vmatpush.msrb.mxu3 %v3581_v4  ;;  %6606 = vst [vmem:[#allocation92_spill] sm:$0xff] %v4032_v51  ;;  %v4043_v44 = vld [vmem:[#allocation5 + $0x50] sm:$0xff] }
  0xc9   :  { %731 = vmatpush.msrb.mxu0 %v3731_v48  ;;  %564 = vmatpush.msrb.mxu2 %v4023_v22  ;;  %6608 = vst [vmem:[#allocation94_spill] sm:$0xff] %v4039_v63  ;;  %v4047_v48 = vld [vmem:[#allocation7 + $0x98] sm:$0xff] }
  0xca   :  { %621 = vmatpush.msra.mxu1 %v4028_v45  ;;  %708 = vmatpush.msrb.mxu3 %v3584_v5  ;;  %6609 = vst [vmem:[#allocation95_spill] sm:$0xff] %v4043_v44  ;;  %v4068_v45 = vld [vmem:[#allocation7 + $0x68] sm:$0xff] }
  0xcb   :  { %v331_v42 = vpop.f32.mrf.mxu0  ;;  %732 = vmatpush.msrb.mxu0 %v3734_v49  ;;  %565 = vmatpush.msrb.mxu2 %v4032_v51  ;;  %6610 = vst [vmem:[#allocation96_spill] sm:$0xff] %v4047_v48  ;;  %v4060_v49 = vld [vmem:[#allocation7 + $0x80] sm:$0xff]  ;;  %v6618_v51 = vmov 0.0  }
  0xcc   :  { %v4035_v47 = vadd.f32 %v331_v42, %v3816_v34  ;;  %622 = vmatpush.msra.mxu1 %v4039_v63  ;;  %709 = vmatpush.msrb.mxu3 %v3589_v7  ;;  %v4051_v42 = vld [vmem:[#allocation5 + $0x38] sm:$0xff]  ;;  %v4056_v34 = vperm.slane %v3803_v0, 1  ;;  %6613 = vst [vmem:[#allocation99_spill] sm:$0xff] %v4060_v49  ;;  %v351_v63 = vpop.f32.mrf.mxu1 }
  0xcd   :  { %733 = vmatpush.msrb.mxu0 %v3739_v50  ;;  %566 = vmatpush.msrb.mxu2 %v4043_v44  ;;  %6611 = vst [vmem:[#allocation97_spill] sm:$0xff] %v4051_v42  ;;  %v4064_v50 = vld [vmem:[#allocation5 + $0x20] sm:$0xff]  ;;  %v4074_v44 = vld [vmem:[#allocation5 + $0x8] sm:$0xff] }
  0xce   :  { %6607 = vst [vmem:[#allocation93_spill] sm:$0xff] %v4035_v47  ;;  %v4053_v47 = vpop.eup %2768  ;;  %623 = vmatpush.msra.mxu1 %v4047_v48  ;;  %710 = vmatpush.msrb.mxu3 %v3600_v10 }
  0xcf   :  { %6612 = vst [vmem:[#allocation98_spill] sm:$0xff] %v4056_v34  ;;  %734 = vmatpush.msrb.mxu0 %v3745_v52  ;;  %567 = vmatpush.msrb.mxu2 %v4051_v42  ;;  %v482_v48 = vmul.f32 %v4053_v47, %v4007_v35  ;;  %v352_v52 = vadd.f32 %v351_v63, %v4056_v34  ;;  %v4081_v42 = vld [vmem:[#allocation7 + $0x178] sm:$0xff]  ;;  %vm487_vm1 = vweird.f32 %v4053_v47 }
  0xd0   :  { %6614 = vst [vmem:[#allocation100_spill] sm:$0xff] %v4064_v50  ;;  %624 = vmatpush.msra.mxu1 %v4060_v49  ;;  %711 = vmatpush.msrb.mxu3 %v3608_v12  ;;  %v4079_v49 = vld [vmem:[#allocation7 + $0x50] sm:$0xff]  ;;  %vm4134_vm3 = vmor %vm486_vm2, %vm487_vm1 }
  0xd1   :  { %6615 = vst [vmem:[#allocation101_spill] sm:$0xff] %v4068_v45  ;;  %735 = vmatpush.msrb.mxu0 %v3751_v53  ;;  %568 = vmatpush.msrb.mxu2 %v4064_v50  ;;  %v4087_v53 = vld [vmem:[#allocation7 + $0x38] sm:$0xff]  ;;  %v4089_v50 = vld [vmem:[#allocation7 + $0x160] sm:$0xff]  ;;  %v483_v63 = vsub.f32 1.0, %v482_v48  ;;  %v4103_v48 = vld [vmem:[#allocation7 + $0x8] sm:$0xff] }
  0xd2   :  { %6616 = vst [vmem:[#allocation102_spill] sm:$0xff] %v4074_v44  ;;  %625 = vmatpush.msra.mxu1 %v4068_v45  ;;  %712 = vmatpush.msrb.mxu3 %v3613_v14 }
  0xd3   :  { %6617 = vst [vmem:[#allocation103_spill] sm:$0xff] %v4079_v49  ;;  %736 = vmatpush.msrb.mxu0 %v3754_v54  ;;  %569 = vmatpush.msrb.mxu2 %v4074_v44  ;;  %v4095_v54 = vld [vmem:[#allocation7 + $0x20] sm:$0xff]  ;;  %v4097_v44 = vld [vmem:[#allocation7 + $0x148] sm:$0xff] }
  0xd4   :  { %610 = vmatmul.f32.vlgmr.msra.gmra.mxu0 %v6618_v51  ;;  %626 = vmatpush.msra.mxu1 %v4079_v49  ;;  %6619 = vst [vmem:[#allocation104_spill] sm:$0xff] %v4087_v53 }
  0xd5   :  { %634 = vmatpush.msra.mxu2 %v4081_v42  ;;  %713 = vmatpush.msrb.mxu3 %v3620_v16  ;;  %6620 = vst [vmem:[#allocation105_spill] sm:$0xff] %v4095_v54 }
  0xd6   :  { %737 = vmatpush.msrb.mxu0 %v3759_v55  ;;  %627 = vmatpush.msra.mxu1 %v4087_v53  ;;  %6621 = vst [vmem:[#allocation106_spill] sm:$0xff] %v4103_v48  ;;  %v473_v55 = vpop.f32.mrf.mxu0 }
  0xd7   :  { %v453_v34 = vpop.f32.mrf.mxu3  ;;  %635 = vmatpush.msra.mxu2 %v4089_v50  ;;  %714 = vmatpush.msrb.mxu3 %v3631_v19 }
  0xd8   :  { %v496_v45 = vadd.f32 %v453_v34, %v352_v52  ;;  %738 = vmatpush.msrb.mxu0 %v3765_v57  ;;  %628 = vmatpush.msra.mxu1 %v4095_v54  ;;  %v4105_v52 = vld [vmem:[#allocation7 + $0x130] sm:$0xff]  ;;  %v484_v34 = vmul.f32 %v4053_v47, %v483_v63  ;;  %v4122_v63 = vld [vmem:[#allocation7 + $0x100] sm:$0xff] }
  0xd9   :  { %6622 = vst [vmem:[#allocation107_spill] sm:$0xff] %v4105_v52  ;;  %636 = vmatpush.msra.mxu2 %v4097_v44  ;;  %715 = vmatpush.msrb.mxu3 %v3639_v21 }
  0xda   :  { %v2722_v49 = vmul.f32 -1.442695, %v496_v45  ;;  %739 = vmatpush.msrb.mxu0 %v3771_v58  ;;  %629 = vmatpush.msra.mxu1 %v4103_v48  ;;  %v4115_v45 = vld [vmem:[#allocation7 + $0x118] sm:$0xff]  ;;  %v485_v57 = vadd.f32 %v4053_v47, %v484_v34  ;;  %6624 = vst [vmem:[#allocation109_spill] sm:$0xff] %v4122_v63  ;;  %v4130_v34 = vld [vmem:[%s6185_s4] ss:$0 sm:$0xff] }
  0xdb   :  { %637 = vmatpush.msra.mxu2 %v4105_v52  ;;  %716 = vmatpush.msrb.mxu3 %v3645_v23  ;;  %6623 = vst [vmem:[#allocation108_spill] sm:$0xff] %v4115_v45  ;;  %v4151_v52 = vperm.slane %v3803_v0, 2  ;;  %v4164_v0 = vld [vmem:[#allocation7 + $0x88] sm:$0xff] }
  0xdc   :  { %2770 = vpow2.f32 %v2722_v49  ;;  %740 = vmatpush.msrb.mxu0 %v3774_v59  ;;  %v492_v49 = vand.u32 2147483648, %v4007_v35  ;;  %v490_v59 = vand.u32 2147483647, %v4007_v35  ;;  %v489_v35 = vsel %vm4134_vm3, %v4053_v47, %v485_v57  ;;  %v392_v57 = vpop.f32.mrf.mxu2 }
  0xdd   :  { %638 = vmatpush.msra.mxu2 %v4115_v45  ;;  %717 = vmatpush.msrb.mxu3 %v3651_v25  ;;  %v519_v45 = vadd.f32 %v4130_v34, %v473_v55  ;;  %6627 = vst [vmem:[#allocation110_spill] sm:$0xff] %v4151_v52 }
  0xde   :  { %853 = vmatpush.msra.mxu0 %v3831_v38  ;;  %v4138_v38 = vld [vmem:[#allocation7 + $0xe8] sm:$0xff]  ;;  %v493_v53 = vor.u32 1.1754944e-38, %v492_v49  ;;  %vm491_vm4 = vcmp.eq.f32.partialorder %v490_v59, 8.507059e+37  ;;  %v393_v59 = vadd.f32 %v392_v57, %v4151_v52 }
  0xdf   :  { %639 = vmatpush.msra.mxu2 %v4122_v63  ;;  %718 = vmatpush.msrb.mxu3 %v3662_v28  ;;  %v4146_v63 = vld [vmem:[#allocation7 + $0xd0] sm:$0xff]  ;;  %v4180_v57 = vld [vmem:[#allocation7 + $0x28] sm:$0xff] }
  0xe0   :  { %854 = vmatpush.msra.mxu0 %v3839_v9  ;;  %v494_v47 = vsel %vm491_vm4, %v493_v53, %v489_v35  ;;  %v4159_v9 = vld [vmem:[#allocation7 + $0xa0] sm:$0xff]  ;;  %6628 = vst [vmem:[#allocation111_spill] sm:$0xff] %v4180_v57 }
  0xe1   :  { %640 = vmatpush.msra.mxu2 %v4138_v38  ;;  %719 = vmatpush.msrb.mxu3 %v3670_v30  ;;  %v520_v55 = vmul.f32 %v519_v45, %v494_v47  ;;  %v4172_v45 = vld [vmem:[#allocation7 + $0x58] sm:$0xff]  ;;  %v4176_v47 = vld [vmem:[#allocation7 + $0x40] sm:$0xff] }
  0xe2   :  { %v2771_v58 = vpop.eup %2770  ;;  %855 = vmatpush.msra.mxu0 %v3846_v46 }
  0xe3   :  { %v500_v54 = vadd.f32 1.0, %v2771_v58  ;;  %641 = vmatpush.msra.mxu2 %v4146_v63  ;;  %720 = vmatpush.msrb.mxu3 %v3676_v32  ;;  %v4155_v58 = vld [vmem:[#allocation7 + $0xb8] sm:$0xff]  ;;  %v521_v48 = vadd.f32 %v520_v55, %v393_v59  ;;  %v4184_v59 = vld [vmem:[#allocation7 + $0x10] sm:$0xff] }
  0xe4   :  { %856 = vmatpush.msra.mxu0 %v3858_v40  ;;  %v4168_v40 = vld [vmem:[#allocation7 + $0x70] sm:$0xff]  ;;  %6629 = vst [vmem:[#allocation112_spill] sm:$0xff] %v4184_v59 }
  0xe5   :  { %2772 = vrcp.f32 %v500_v54  ;;  %642 = vmatpush.msra.mxu2 %v4155_v58  ;;  %v512_v49 = vand.u32 2147483648, %v500_v54  ;;  %v510_v35 = vand.u32 2147483647, %v500_v54  ;;  %vm506_vm6 = vweird.f32 %v500_v54 }
  0xe6   :  { %857 = vmatpush.msra.mxu0 %v3869_v31  ;;  %2774 = vtanh.f32 %v521_v48 }
  0xe7   :  { %643 = vmatpush.msra.mxu2 %v4159_v9  ;;  %vm511_vm8 = vcmp.eq.f32.partialorder %v510_v35, 8.507059e+37  ;;  %v6652_v35 = vld [vmem:[#allocation67_spill] sm:$0xff] }
  0xe8   :  { %858 = vmatpush.msra.mxu0 %v3876_v26 }
  0xe9   :  { %644 = vmatpush.msra.mxu2 %v4164_v0 }
  0xea   :  { %859 = vmatpush.msra.mxu0 %v3885_v61 }
  0xeb   :  { %v2773_v53 = vpop.eup %2772  ;;  %645 = vmatpush.msra.mxu2 %v4168_v40 }
  0xec   :  { %v502_v46 = vmul.f32 %v2773_v53, %v500_v54  ;;  %860 = vmatpush.msra.mxu0 %v3897_v24  ;;  %vm507_vm5 = vweird.f32 %v2773_v53  ;;  %v513_v24 = vor.u32 1.1754944e-38, %v512_v49  ;;  %v2775_v54 = vpop.eup %2774  ;;  %v6648_v49 = vld [vmem:[#allocation63_spill] sm:$0xff] }
  0xed   :  { %646 = vmatpush.msra.mxu2 %v4172_v45  ;;  %vm508_vm7 = vmor %vm506_vm6, %vm507_vm5 }
  0xee   :  { %v503_v31 = vsub.f32 1.0, %v502_v46  ;;  %861 = vmatpush.msra.mxu0 %v3911_v36 }
  0xef   :  { %647 = vmatpush.msra.mxu2 %v4176_v47 }
  0xf0   :  { %v504_v26 = vmul.f32 %v2773_v53, %v503_v31  ;;  %862 = vmatpush.msra.mxu0 %v3925_v27 }
  0xf1   :  { %648 = vmatpush.msra.mxu2 %v4180_v57 }
  0xf2   :  { %v505_v61 = vadd.f32 %v2773_v53, %v504_v26  ;;  %863 = vmatpush.msra.mxu0 %v3937_v56  ;;  %v6640_v56 = vld [vmem:[#allocation19_spill] sm:$0xff]  ;;  %v6650_v26 = vld [vmem:[#allocation65_spill] sm:$0xff] }
  0xf3   :  { %649 = vmatpush.msra.mxu2 %v4184_v59 }
  0xf4   :  { %v509_v55 = vsel %vm508_vm7, %v2773_v53, %v505_v61  ;;  %864 = vmatpush.msra.mxu0 %v3949_v41  ;;  %v6639_v41 = vld [vmem:[#allocation83_spill] sm:$0xff]  ;;  %v6646_v53 = vld [vmem:[#allocation61_spill] sm:$0xff]  ;;  %v6654_v61 = vld [vmem:[#allocation26_spill] sm:$0xff] }
  0xf5   :  { %v514_v36 = vsel %vm511_vm8, %v513_v24, %v509_v55  ;;  %v6655_v24 = vld [vmem:[#allocation70_spill] sm:$0xff]  ;;  %v6657_v55 = vld [vmem:[#allocation28_spill] sm:$0xff] }
  0xf6   :  { %v523_v46 = vsub.f32 1.0, %v514_v36  ;;  %v525_v31 = vmul.f32 0.0, %v514_v36  ;;  %865 = vmatpush.msra.mxu0 %v3964_v13  ;;  %v6632_v13 = vld [vmem:[#allocation49_spill] sm:$0xff]  ;;  %v6658_v36 = vld [vmem:[#allocation72_spill] sm:$0xff] }
  0xf8   :  { %v524_v48 = vmul.f32 %v2775_v54, %v523_v46  ;;  %866 = vmatpush.msra.mxu0 %v3974_v17  ;;  %v6660_v46 = vld [vmem:[#allocation30_spill] sm:$0xff] }
  0xf9   :  { %v6661_v54 = vld [vmem:[#allocation74_spill] sm:$0xff] }
  0xfa   :  { %v4190_v27 = vadd.f32 %v525_v31, %v524_v48  ;;  %867 = vmatpush.msra.mxu0 %v3984_v33  ;;  %v6663_v48 = vld [vmem:[#allocation45_spill] sm:$0xff]  ;;  %v6664_v31 = vld [vmem:[#allocation76_spill] sm:$0xff] }
  0xfc   :  { %550 = vmatmul.f32.vlgmr.msrb.gmra.mxu1 %v4190_v27  ;;  %570 = vmatmul.f32.vlgmr.msrb.gmra.mxu2 %v4190_v27 }
  0xfd   :  { %590 = vmatmul.f32.vlgmr.msra.gmra.mxu3 %v4190_v27  ;;  %741 = vmatmul.f32.vlgmr.msrb.gmra.mxu0 %v4190_v27 }
  0xfe   :  { %745 = vmatpush.msrb.mxu1 %v3587_v6  ;;  %813 = vmatpush.msrb.mxu2 %v3794_v62  ;;  %v6630_v6 = vld [vmem:[#allocation15_spill] sm:$0xff]  ;;  %v6635_v62 = vld [vmem:[#allocation52_spill] sm:$0xff] }
  0xff   :  { %833 = vmatpush.msra.mxu3 %v3907_v43  ;;  %868 = vmatpush.msra.mxu0 %v3994_v15  ;;  %v6641_v43 = vld [vmem:[#allocation56_spill] sm:$0xff] }
 0x100   :  { %746 = vmatpush.msrb.mxu1 %v3592_v8  ;;  %814 = vmatpush.msrb.mxu2 %v3805_v2  ;;  %v6631_v8 = vld [vmem:[#allocation16_spill] sm:$0xff]  ;;  %v6637_v2 = vld [vmem:[#allocation18_spill] sm:$0xff] }
 0x101   :  { %834 = vmatpush.msra.mxu3 %v3923_v29  ;;  %981 = vmatpush.msrb.mxu0 %v3569_v1  ;;  %v6633_v29 = vld [vmem:[#allocation77_spill] sm:$0xff] }
 0x102   :  { %747 = vmatpush.msrb.mxu1 %v3603_v11  ;;  %815 = vmatpush.msrb.mxu2 %v3811_v18  ;;  %v6634_v11 = vld [vmem:[#allocation17_spill] sm:$0xff]  ;;  %v6638_v18 = vld [vmem:[#allocation54_spill] sm:$0xff] }
 0x103   :  { %835 = vmatpush.msra.mxu3 %v3935_v37  ;;  %982 = vmatpush.msrb.mxu0 %v3577_v3  ;;  %v6636_v1 = vld [vmem:[#allocation81_spill] sm:$0xff]  ;;  %v6643_v37 = vld [vmem:[#allocation20_spill] sm:$0xff] }
 0x104   :  { %748 = vmatpush.msrb.mxu1 %v6630_v6  ;;  %650 = vmatmul.f32.vlgmr.msra.gmra.mxu2 %v6618_v51  ;;  %v6642_v3 = vld [vmem:[#allocation85_spill] sm:$0xff]  ;;  %v6666_v6 = vld [vmem:[#allocation102_spill] sm:$0xff] }
 0x105   :  { %630 = vmatmul.f32.vlgmr.msra.gmra.mxu1 %v6618_v51  ;;  %721 = vmatmul.f32.vlgmr.msrb.gmra.mxu3 %v4190_v27  ;;  %v6644_v51 = vld [vmem:[#allocation58_spill] sm:$0xff] }
 0x106   :  { %749 = vmatpush.msrb.mxu1 %v6631_v8  ;;  %816 = vmatpush.msrb.mxu2 %v6632_v13  ;;  %v6667_v8 = vld [vmem:[#allocation46_spill] sm:$0xff]  ;;  %v6669_v13 = vld [vmem:[#allocation47_spill] sm:$0xff] }
 0x107   :  { %836 = vmatpush.msra.mxu3 %v6633_v29  ;;  %983 = vmatpush.msrb.mxu0 %v3581_v4  ;;  %v6645_v4 = vld [vmem:[#allocation21_spill] sm:$0xff] }
 0x108   :  { %750 = vmatpush.msrb.mxu1 %v6634_v11  ;;  %817 = vmatpush.msrb.mxu2 %v6635_v62  ;;  %v6670_v11 = vld [vmem:[#allocation84_spill] sm:$0xff]  ;;  %v6671_v62 = vld [vmem:[#allocation50_spill] sm:$0xff] }
 0x109   :  { %837 = vmatpush.msra.mxu3 %v6636_v1  ;;  %984 = vmatpush.msrb.mxu0 %v3584_v5  ;;  %v6647_v5 = vld [vmem:[#allocation22_spill] sm:$0xff] }
 0x10a   :  { %751 = vmatpush.msrb.mxu1 %v6637_v2  ;;  %818 = vmatpush.msrb.mxu2 %v6638_v18  ;;  %v6672_v2 = vld [vmem:[#allocation86_spill] sm:$0xff]  ;;  %v6673_v18 = vld [vmem:[#allocation53_spill] sm:$0xff] }
 0x10b   :  { %838 = vmatpush.msra.mxu3 %v6639_v41  ;;  %985 = vmatpush.msrb.mxu0 %v3589_v7  ;;  %v6649_v7 = vld [vmem:[#allocation23_spill] sm:$0xff] }
 0x10c   :  { %752 = vmatpush.msrb.mxu1 %v6640_v56  ;;  %819 = vmatpush.msrb.mxu2 %v6641_v43  ;;  %v6674_v56 = vld [vmem:[#allocation107_spill] sm:$0xff] }
 0x10d   :  { %839 = vmatpush.msra.mxu3 %v6642_v3  ;;  %986 = vmatpush.msrb.mxu0 %v3600_v10  ;;  %v6651_v10 = vld [vmem:[#allocation24_spill] sm:$0xff]  ;;  %v6676_v43 = vld [vmem:[#allocation55_spill] sm:$0xff] }
 0x10e   :  { %753 = vmatpush.msrb.mxu1 %v6643_v37  ;;  %820 = vmatpush.msrb.mxu2 %v6644_v51  ;;  %v6677_v37 = vld [vmem:[#allocation108_spill] sm:$0xff]  ;;  %v6679_v51 = vld [vmem:[#allocation57_spill] sm:$0xff] }
 0x10f   :  { %840 = vmatpush.msra.mxu3 %v3992_v39  ;;  %987 = vmatpush.msrb.mxu0 %v3608_v12  ;;  %v6653_v12 = vld [vmem:[#allocation92_spill] sm:$0xff] }
 0x110   :  { %754 = vmatpush.msrb.mxu1 %v6645_v4  ;;  %821 = vmatpush.msrb.mxu2 %v6646_v53  ;;  %v6680_v4 = vld [vmem:[#allocation109_spill] sm:$0xff]  ;;  %v6681_v53 = vld [vmem:[#allocation90_spill] sm:$0xff] }
 0x111   :  { %841 = vmatpush.msra.mxu3 %v4005_v20  ;;  %988 = vmatpush.msrb.mxu0 %v3613_v14  ;;  %v6656_v14 = vld [vmem:[#allocation95_spill] sm:$0xff] }
 0x112   :  { %755 = vmatpush.msrb.mxu1 %v6647_v5  ;;  %822 = vmatpush.msrb.mxu2 %v6648_v49  ;;  %v6683_v5 = vld [vmem:[#allocation91_spill] sm:$0xff]  ;;  %v6684_v49 = vld [vmem:[#allocation62_spill] sm:$0xff] }
 0x113   :  { %842 = vmatpush.msra.mxu3 %v4015_v60  ;;  %989 = vmatpush.msrb.mxu0 %v3620_v16  ;;  %v6659_v16 = vld [vmem:[#allocation97_spill] sm:$0xff] }
 0x114   :  { %756 = vmatpush.msrb.mxu1 %v6649_v7  ;;  %823 = vmatpush.msrb.mxu2 %v6650_v26  ;;  %v6686_v7 = vld [vmem:[#allocation64_spill] sm:$0xff] }
 0x115   :  { %843 = vmatpush.msra.mxu3 %v4023_v22  ;;  %990 = vmatpush.msrb.mxu0 %v3631_v19  ;;  %v6662_v19 = vld [vmem:[#allocation100_spill] sm:$0xff] }
 0x116   :  { %757 = vmatpush.msrb.mxu1 %v6651_v10  ;;  %824 = vmatpush.msrb.mxu2 %v6652_v35  ;;  %v6687_v26 = vld [vmem:[#allocation96_spill] sm:$0xff]  ;;  %v6688_v10 = vld [vmem:[#allocation66_spill] sm:$0xff]  ;;  %v354_v35 = vpop.f32.mrf.mxu1 }
 0x117   :  { %844 = vmatpush.msra.mxu3 %v6653_v12  ;;  %991 = vmatpush.msrb.mxu0 %v3639_v21  ;;  %v6665_v21 = vld [vmem:[#allocation80_spill] sm:$0xff] }
 0x118   :  { %758 = vmatpush.msrb.mxu1 %v6654_v61  ;;  %825 = vmatpush.msrb.mxu2 %v6655_v24  ;;  %v6689_v61 = vld [vmem:[#allocation99_spill] sm:$0xff]  ;;  %v6690_v24 = vld [vmem:[#allocation69_spill] sm:$0xff] }
 0x119   :  { %845 = vmatpush.msra.mxu3 %v6656_v14  ;;  %992 = vmatpush.msrb.mxu0 %v3645_v23  ;;  %v6668_v23 = vld [vmem:[#allocation82_spill] sm:$0xff] }
 0x11a   :  { %759 = vmatpush.msrb.mxu1 %v6657_v55  ;;  %826 = vmatpush.msrb.mxu2 %v6658_v36  ;;  %v6691_v55 = vld [vmem:[#allocation101_spill] sm:$0xff]  ;;  %v6692_v36 = vld [vmem:[#allocation71_spill] sm:$0xff] }
 0x11b   :  { %846 = vmatpush.msra.mxu3 %v6659_v16  ;;  %993 = vmatpush.msrb.mxu0 %v3651_v25  ;;  %v6675_v25 = vld [vmem:[#allocation88_spill] sm:$0xff] }
 0x11c   :  { %760 = vmatpush.msrb.mxu1 %v6660_v46  ;;  %827 = vmatpush.msrb.mxu2 %v6661_v54  ;;  %v6693_v46 = vld [vmem:[#allocation103_spill] sm:$0xff]  ;;  %v6694_v54 = vld [vmem:[#allocation73_spill] sm:$0xff] }
 0x11d   :  { %761 = vmatmul.f32.vlgmr.msrb.gmra.mxu1 %v4190_v27  ;;  %847 = vmatpush.msra.mxu3 %v6662_v19 }
 0x11e   :  { %873 = vmatpush.msra.mxu1 %v6663_v48  ;;  %828 = vmatpush.msrb.mxu2 %v6664_v31  ;;  %v4307_v48 = vpop.f32.mrf.mxu2  ;;  %v6695_v31 = vld [vmem:[#allocation104_spill] sm:$0xff] }
 0x11f   :  { %848 = vmatpush.msra.mxu3 %v6666_v6  ;;  %994 = vmatpush.msrb.mxu0 %v3662_v28  ;;  %v6678_v28 = vld [vmem:[#allocation89_spill] sm:$0xff] }
 0x120   :  { %893 = vmatpush.msra.mxu2 %v6665_v21  ;;  %874 = vmatpush.msra.mxu1 %v6667_v8  ;;  %v6696_v21 = vld [vmem:[#allocation75_spill] sm:$0xff]  ;;  %v6697_v8 = vld [vmem:[#allocation105_spill] sm:$0xff] }
 0x121   :  { %913 = vmatpush.msrb.mxu3 %v4081_v42  ;;  %995 = vmatpush.msrb.mxu0 %v3670_v30  ;;  %v6682_v30 = vld [vmem:[#allocation59_spill] sm:$0xff] }
 0x122   :  { %894 = vmatpush.msra.mxu2 %v6668_v23  ;;  %875 = vmatpush.msra.mxu1 %v6669_v13  ;;  %v6698_v23 = vld [vmem:[#allocation79_spill] sm:$0xff]  ;;  %v4315_v13 = vpop.f32.mrf.mxu1 }
 0x123   :  { %914 = vmatpush.msrb.mxu3 %v4089_v50  ;;  %996 = vmatpush.msrb.mxu0 %v3676_v32  ;;  %v6685_v32 = vld [vmem:[#allocation94_spill] sm:$0xff]  ;;  %6699 = vst [vmem:[#allocation15_spill] sm:$0xff] %v4315_v13 }
 0x124   :  { %895 = vmatpush.msra.mxu2 %v6670_v11  ;;  %876 = vmatpush.msra.mxu1 %v6671_v62  ;;  %v6700_v11 = vld [vmem:[#allocation25_spill] sm:$0xff]  ;;  %v6701_v62 = vld [vmem:[#allocation106_spill] sm:$0xff] }
 0x125   :  { %915 = vmatpush.msrb.mxu3 %v4097_v44 }
 0x126   :  { %896 = vmatpush.msra.mxu2 %v6672_v2  ;;  %877 = vmatpush.msra.mxu1 %v6673_v18  ;;  %v6702_v2 = vld [vmem:[#allocation27_spill] sm:$0xff]  ;;  %v6703_v18 = vld [vmem:[#allocation29_spill] sm:$0xff] }
 0x127   :  { %916 = vmatpush.msrb.mxu3 %v6674_v56 }
 0x128   :  { %897 = vmatpush.msra.mxu2 %v6675_v25  ;;  %878 = vmatpush.msra.mxu1 %v6676_v43  ;;  %v4322_v25 = vpop.f32.mrf.mxu2  ;;  %v6705_v43 = vld [vmem:[#allocation31_spill] sm:$0xff] }
 0x129   :  { %917 = vmatpush.msrb.mxu3 %v6677_v37  ;;  %6704 = vst [vmem:[#allocation16_spill] sm:$0xff] %v4322_v25 }
 0x12a   :  { %898 = vmatpush.msra.mxu2 %v6678_v28  ;;  %879 = vmatpush.msra.mxu1 %v6679_v51  ;;  %v6706_v28 = vld [vmem:[#allocation32_spill] sm:$0xff]  ;;  %v4326_v51 = vpop.f32.mrf.mxu1 }
 0x12b   :  { %918 = vmatpush.msrb.mxu3 %v6680_v4  ;;  %6707 = vst [vmem:[#allocation49_spill] sm:$0xff] %v4326_v51  ;;  %v6732_v51 = vld [vmem:[#allocation44_spill] sm:$0xff] }
 0x12c   :  { %899 = vmatpush.msra.mxu2 %v6681_v53  ;;  %880 = vmatpush.msra.mxu1 %v6682_v30  ;;  %v6708_v53 = vld [vmem:[#allocation33_spill] sm:$0xff]  ;;  %v6709_v30 = vld [vmem:[#allocation34_spill] sm:$0xff] }
 0x12d   :  { %919 = vmatpush.msrb.mxu3 %v4138_v38 }
 0x12e   :  { %900 = vmatpush.msra.mxu2 %v6683_v5  ;;  %881 = vmatpush.msra.mxu1 %v6684_v49  ;;  %v6710_v5 = vld [vmem:[#allocation35_spill] sm:$0xff] }
 0x12f   :  { %920 = vmatpush.msrb.mxu3 %v4146_v63 }
 0x130   :  { %901 = vmatpush.msra.mxu2 %v6685_v32  ;;  %882 = vmatpush.msra.mxu1 %v6686_v7  ;;  %v4331_v49 = vpop.f32.mrf.mxu2  ;;  %v6712_v32 = vld [vmem:[#allocation36_spill] sm:$0xff]  ;;  %v6713_v7 = vld [vmem:[#allocation37_spill] sm:$0xff] }
 0x131   :  { %921 = vmatpush.msrb.mxu3 %v4155_v58  ;;  %6711 = vst [vmem:[#allocation77_spill] sm:$0xff] %v4331_v49 }
 0x132   :  { %902 = vmatpush.msra.mxu2 %v6687_v26  ;;  %883 = vmatpush.msra.mxu1 %v6688_v10  ;;  %v4335_v26 = vpop.f32.mrf.mxu1  ;;  %v6715_v10 = vld [vmem:[#allocation38_spill] sm:$0xff] }
 0x133   :  { %922 = vmatpush.msrb.mxu3 %v4159_v9  ;;  %6714 = vst [vmem:[#allocation17_spill] sm:$0xff] %v4335_v26 }
 0x134   :  { %903 = vmatpush.msra.mxu2 %v6689_v61  ;;  %884 = vmatpush.msra.mxu1 %v6690_v24  ;;  %v6716_v61 = vld [vmem:[#allocation39_spill] sm:$0xff]  ;;  %v6717_v24 = vld [vmem:[#allocation40_spill] sm:$0xff] }
 0x135   :  { %923 = vmatpush.msrb.mxu3 %v4164_v0 }
 0x136   :  { %904 = vmatpush.msra.mxu2 %v6691_v55  ;;  %885 = vmatpush.msra.mxu1 %v6692_v36  ;;  %v6719_v36 = vld [vmem:[#allocation41_spill] sm:$0xff] }
 0x137   :  { %924 = vmatpush.msrb.mxu3 %v4168_v40 }
 0x138   :  { %905 = vmatpush.msra.mxu2 %v6693_v46  ;;  %886 = vmatpush.msra.mxu1 %v6694_v54  ;;  %v4340_v55 = vpop.f32.mrf.mxu2  ;;  %v6720_v54 = vld [vmem:[#allocation42_spill] sm:$0xff] }
 0x139   :  { %925 = vmatpush.msrb.mxu3 %v4172_v45  ;;  %6718 = vst [vmem:[#allocation52_spill] sm:$0xff] %v4340_v55 }
 0x13a   :  { %906 = vmatpush.msra.mxu2 %v6695_v31  ;;  %887 = vmatpush.msra.mxu1 %v6696_v21  ;;  %v4344_v21 = vpop.f32.mrf.mxu1 }
 0x13b   :  { %926 = vmatpush.msrb.mxu3 %v4176_v47  ;;  %6721 = vst [vmem:[#allocation81_spill] sm:$0xff] %v4344_v21 }
 0x13c   :  { %907 = vmatpush.msra.mxu2 %v6697_v8  ;;  %888 = vmatpush.msra.mxu1 %v6698_v23  ;;  %v6722_v23 = vld [vmem:[#allocation43_spill] sm:$0xff] }
 0x13d   :  { %927 = vmatpush.msrb.mxu3 %v4180_v57 }
 0x13e   :  { %1001 = vmatpush.msrb.mxu1 %v6700_v11  ;;  %908 = vmatpush.msra.mxu2 %v6701_v62 }
 0x13f   :  { %928 = vmatpush.msrb.mxu3 %v4184_v59 }
 0x140   :  { %1002 = vmatpush.msrb.mxu1 %v6702_v2  ;;  %v4347_v11 = vpop.f32.mrf.mxu2 }
 0x141   :  { %6723 = vst [vmem:[#allocation18_spill] sm:$0xff] %v4347_v11 }
 0x142   :  { %1003 = vmatpush.msrb.mxu1 %v6703_v18  ;;  %v4349_v2 = vpop.f32.mrf.mxu1 }
 0x143   :  { %6724 = vst [vmem:[#allocation54_spill] sm:$0xff] %v4349_v2 }
 0x144   :  { %1004 = vmatpush.msrb.mxu1 %v6705_v43 }
 0x146   :  { %1005 = vmatpush.msrb.mxu1 %v6706_v28 }
 0x148   :  { %1006 = vmatpush.msrb.mxu1 %v6708_v53  ;;  %v4351_v18 = vpop.f32.mrf.mxu2  ;;  %v247_v53 = vld [vmem:[%s6188_s7] sm:$0x7] }
 0x149   :  { %6725 = vst [vmem:[#allocation83_spill] sm:$0xff] %v4351_v18 }
 0x14a   :  { %1007 = vmatpush.msrb.mxu1 %v6709_v30  ;;  %v4353_v43 = vpop.f32.mrf.mxu1 }
 0x14b   :  { %6726 = vst [vmem:[#allocation19_spill] sm:$0xff] %v4353_v43 }
 0x14c   :  { %1008 = vmatpush.msrb.mxu1 %v6710_v5  ;;  %v4360_v5 = vperm.slane %v247_v53, 0 }
 0x14e   :  { %1009 = vmatpush.msrb.mxu1 %v6712_v32  ;;  %6728 = vst [vmem:[#allocation85_spill] sm:$0xff] %v4360_v5 }
 0x150   :  { %1010 = vmatpush.msrb.mxu1 %v6713_v7  ;;  %v4358_v30 = vpop.f32.mrf.mxu2  ;;  %v6729_v7 = vld [vmem:[#allocation98_spill] sm:$0xff] }
 0x151   :  { %v611_v28 = vpop.f32.mrf.mxu0  ;;  %6727 = vst [vmem:[#allocation56_spill] sm:$0xff] %v4358_v30 }
 0x152   :  { %1011 = vmatpush.msrb.mxu1 %v6715_v10  ;;  %v355_v10 = vadd.f32 %v354_v35, %v6729_v7  ;;  %v6731_v35 = vld [vmem:[#allocation48_spill] sm:$0xff] }
 0x154   :  { %1012 = vmatpush.msrb.mxu1 %v6716_v61 }
 0x156   :  { %1013 = vmatpush.msrb.mxu1 %v6717_v24 }
 0x158   :  { %1014 = vmatpush.msrb.mxu1 %v6719_v36 }
 0x15a   :  { %1015 = vmatpush.msrb.mxu1 %v6720_v54 }
 0x15c   :  { %1016 = vmatpush.msrb.mxu1 %v6722_v23  ;;  %v4364_v23 = vperm.slane %v247_v53, 1 }
 0x15e   :  { %6730 = vst [vmem:[#allocation20_spill] sm:$0xff] %v4364_v23 }
 0x179   :  { %v551_v32 = vpop.f32.mrf.mxu1 }
 0x17a   :  { %v552_v61 = vadd.f32 %v551_v32, %v4360_v5  ;;  %v742_v24 = vpop.f32.mrf.mxu0  ;;  %v314_v32 = vadd.f32 %v6732_v51, %v6731_v35  ;;  %v4375_v51 = vld [vmem:[%s6189_s8] ss:$0 sm:$0xff] }
 0x17b   :  { %v785_v54 = vadd.f32 %v742_v24, %v355_v10  ;;  %6733 = vst [vmem:[#allocation58_spill] sm:$0xff] %v4375_v51 }
 0x17c   :  { %v654_v36 = vadd.f32 %v611_v28, %v552_v61 }
 0x17d   :  { %v2726_v2 = vmul.f32 -1.442695, %v785_v54 }
 0x17e   :  { %v2723_v43 = vmul.f32 -1.442695, %v654_v36 }
 0x17f   :  { %v571_v18 = vpop.f32.mrf.mxu2 }
 0x180   :  { %2776 = vpow2.f32 %v2723_v43  ;;  %v572_v11 = vadd.f32 %v571_v18, %v4364_v23  ;;  %v591_v21 = vpop.f32.mrf.mxu3 }
 0x181   :  { %2778 = vpow2.f32 %v2726_v2 }
 0x182   :  { %v631_v30 = vpop.f32.mrf.mxu1 }
 0x183   :  { %v674_v55 = vadd.f32 %v631_v30, %v572_v11 }
 0x185   :  { %v2724_v26 = vmul.f32 -1.442695, %v674_v55 }
 0x186   :  { %v2777_v49 = vpop.eup %2776 }
 0x187   :  { %v658_v25 = vadd.f32 1.0, %v2777_v49  ;;  %2780 = vpow2.f32 %v2724_v26  ;;  %v2779_v61 = vpop.eup %2778  ;;  %v651_v26 = vpop.f32.mrf.mxu2 }
 0x188   :  { %v722_v28 = vpop.f32.mrf.mxu3  ;;  %v4369_v36 = vadd.f32 1.0, %v2779_v61 }
 0x189   :  { %2782 = vrcp.f32 %v658_v25  ;;  %v765_v10 = vadd.f32 %v722_v28, %v314_v32  ;;  %v670_v2 = vand.u32 2147483648, %v658_v25  ;;  %v668_v32 = vand.u32 2147483647, %v658_v25 }
 0x18a   :  { %v4377_v28 = vperm.slane %v247_v53, 2  ;;  %vm664_vm10 = vweird.f32 %v658_v25  ;;  %vm795_vm6 = vweird.f32 %v4369_v36 }
 0x18b   :  { %v2725_v24 = vmul.f32 -1.442695, %v765_v10  ;;  %v671_v23 = vor.u32 1.1754944e-38, %v670_v2  ;;  %vm669_vm12 = vcmp.eq.f32.partialorder %v668_v32, 8.507059e+37 }
 0x18c   :  { %6734 = vst [vmem:[#allocation21_spill] sm:$0xff] %v4377_v28  ;;  %v592_v53 = vadd.f32 %v591_v21, %v4377_v28 }
 0x18d   :  { %v2781_v43 = vpop.eup %2780  ;;  %2784 = vpow2.f32 %v2725_v24  ;;  %v697_v24 = vadd.f32 %v4375_v51, %v651_v26 }
 0x18e   :  { %v678_v18 = vadd.f32 1.0, %v2781_v43 }
 0x18f   :  { %v2783_v54 = vpop.eup %2782 }
 0x190   :  { %2786 = vrcp.f32 %v678_v18  ;;  %v660_v11 = vmul.f32 %v2783_v54, %v658_v25  ;;  %vm665_vm9 = vweird.f32 %v2783_v54  ;;  %v690_v59 = vand.u32 2147483648, %v678_v18 }
 0x191   :  { %2788 = vrcp.f32 %v4369_v36  ;;  %vm666_vm11 = vmor %vm664_vm10, %vm665_vm9  ;;  %v688_v25 = vand.u32 2147483647, %v678_v18  ;;  %vm684_vm14 = vweird.f32 %v678_v18 }
 0x192   :  { %v661_v55 = vsub.f32 1.0, %v660_v11 }
 0x193   :  { %v2785_v49 = vpop.eup %2784  ;;  %vm689_vm0 = vcmp.eq.f32.partialorder %v688_v25, 8.507059e+37 }
 0x194   :  { %v769_v30 = vadd.f32 1.0, %v2785_v49  ;;  %v662_v35 = vmul.f32 %v2783_v54, %v661_v55 }
 0x196   :  { %v2787_v10 = vpop.eup %2786  ;;  %2790 = vrcp.f32 %v769_v30  ;;  %v663_v61 = vadd.f32 %v2783_v54, %v662_v35  ;;  %v779_v32 = vand.u32 2147483647, %v769_v30  ;;  %vm775_vm2 = vweird.f32 %v769_v30 }
 0x197   :  { %v4380_v43 = vpop.eup %2788  ;;  %v680_v11 = vmul.f32 %v2787_v10, %v678_v18  ;;  %vm685_vm13 = vweird.f32 %v2787_v10 }
 0x198   :  { %v667_v5 = vsel %vm666_vm11, %v2783_v54, %v663_v61  ;;  %v791_v55 = vmul.f32 %v4380_v43, %v4369_v36  ;;  %vm686_vm15 = vmor %vm684_vm14, %vm685_vm13  ;;  %v691_v54 = vor.u32 1.1754944e-38, %v690_v59  ;;  %v781_v61 = vand.u32 2147483648, %v769_v30 }
 0x199   :  { %v681_v13 = vsub.f32 1.0, %v680_v11  ;;  %v672_v49 = vsel %vm669_vm12, %v671_v23, %v667_v5  ;;  %vm780_vm4 = vcmp.eq.f32.partialorder %v779_v32, 8.507059e+37  ;;  %vm796_vm5 = vweird.f32 %v4380_v43 }
 0x19a   :  { %v698_v7 = vmul.f32 %v697_v24, %v672_v49  ;;  %v792_v2 = vsub.f32 1.0, %v791_v55  ;;  %v762_v11 = vpop.f32.mrf.mxu1  ;;  %vm797_vm7 = vmor %vm795_vm6, %vm796_vm5 }
 0x19b   :  { %v682_v35 = vmul.f32 %v2787_v10, %v681_v13  ;;  %v805_v59 = vadd.f32 %v4130_v34, %v762_v11  ;;  %v4411_v11 = vld [vmem:[#allocation5 + $0x118] sm:$0xff] }
 0x19c   :  { %v2791_v26 = vpop.eup %2790  ;;  %v699_v51 = vadd.f32 %v698_v7, %v592_v53  ;;  %v793_v13 = vmul.f32 %v4380_v43, %v792_v2 }
 0x19d   :  { %v771_v62 = vmul.f32 %v2791_v26, %v769_v30  ;;  %v683_v57 = vadd.f32 %v2787_v10, %v682_v35  ;;  %vm776_vm1 = vweird.f32 %v2791_v26  ;;  %v396_v35 = vadd.f32 %v4307_v48, %v4151_v52 }
 0x19e   :  { %2792 = vtanh.f32 %v699_v51  ;;  %vm777_vm3 = vmor %vm775_vm2, %vm776_vm1  ;;  %v782_v51 = vor.u32 1.1754944e-38, %v781_v61  ;;  %v801_v30 = vand.u32 2147483648, %v4369_v36  ;;  %v4404_v61 = vld [vmem:[#allocation5 + $0x148] sm:$0xff] }
 0x19f   :  { %v772_v5 = vsub.f32 1.0, %v771_v62  ;;  %v687_v23 = vsel %vm686_vm15, %v2787_v10, %v683_v57  ;;  %v794_v10 = vadd.f32 %v4380_v43, %v793_v13 }
 0x1a0   :  { %v692_v21 = vsel %vm689_vm0, %v691_v54, %v687_v23  ;;  %v802_v48 = vor.u32 1.1754944e-38, %v801_v30  ;;  %v4401_v23 = vld [vmem:[#allocation5 + $0x160] sm:$0xff] }
 0x1a1   :  { %v773_v24 = vmul.f32 %v2791_v26, %v772_v5  ;;  %v701_v7 = vsub.f32 1.0, %v692_v21  ;;  %v703_v62 = vmul.f32 0.0, %v692_v21  ;;  %v798_v54 = vsel %vm797_vm7, %v4380_v43, %v794_v10  ;;  %v4398_v5 = vld [vmem:[#allocation5 + $0x178] sm:$0xff]  ;;  %v4407_v21 = vld [vmem:[#allocation5 + $0x130] sm:$0xff]  ;;  %v4453_v30 = vld [vmem:[#allocation5 + $0x140] sm:$0xff] }
 0x1a2   :  { %v4444_v10 = vld [vmem:[#allocation5 + $0xd0] sm:$0xff] }
 0x1a3   :  { %v774_v49 = vadd.f32 %v2791_v26, %v773_v24  ;;  %6735 = vst [vmem:[#allocation61_spill] sm:$0xff] %v4444_v10 }
 0x1a4   :  { %v2793_v18 = vpop.eup %2792 }
 0x1a5   :  { %v778_v55 = vsel %vm777_vm3, %v2791_v26, %v774_v49  ;;  %v702_v57 = vmul.f32 %v2793_v18, %v701_v7  ;;  %v799_v26 = vand.u32 2147483647, %v4369_v36  ;;  %v4416_v7 = vld [vmem:[#allocation5 + $0x100] sm:$0xff]  ;;  %v4423_v18 = vld [vmem:[#allocation2 + $0x178] sm:$0xff] }
 0x1a6   :  { %v783_v53 = vsel %vm780_vm4, %v782_v51, %v778_v55  ;;  %v4429_v51 = vld [vmem:[#allocation5 + $0x170] sm:$0xff]  ;;  %v4432_v55 = vld [vmem:[#allocation5 + $0xe8] sm:$0xff] }
 0x1a7   :  { %v806_v25 = vmul.f32 %v805_v59, %v783_v53  ;;  %v4392_v2 = vadd.f32 %v703_v62, %v702_v57  ;;  %vm800_vm8 = vcmp.eq.f32.partialorder %v799_v26, 8.507059e+37  ;;  %v4435_v59 = vld [vmem:[#allocation2 + $0x160] sm:$0xff]  ;;  %v4438_v57 = vld [vmem:[#allocation5 + $0x150] sm:$0xff]  ;;  %v4441_v62 = vld [vmem:[#allocation5 + $0x158] sm:$0xff] }
 0x1a8   :  { %v803_v32 = vsel %vm800_vm8, %v802_v48, %v798_v54  ;;  %v4447_v53 = vld [vmem:[#allocation2 + $0x148] sm:$0xff]  ;;  %v4459_v26 = vld [vmem:[#allocation2 + $0x130] sm:$0xff]  ;;  %v4468_v54 = vld [vmem:[#allocation5 + $0x120] sm:$0xff] }
 0x1a9   :  { %v807_v34 = vadd.f32 %v806_v25, %v396_v35  ;;  %889 = vmatmul.f32.vlgmr.msra.gmra.mxu1 %v4392_v2  ;;  %v809_v36 = vsub.f32 1.0, %v803_v32  ;;  %v811_v13 = vmul.f32 %v803_v32, %v4190_v27  ;;  %v4426_v27 = vld [vmem:[#allocation5 + $0x168] sm:$0xff]  ;;  %v4450_v35 = vld [vmem:[#allocation5 + $0x138] sm:$0xff]  ;;  %v4472_v48 = vld [vmem:[#allocation5 + $0xa0] sm:$0xff] }
 0x1aa   :  { %1129 = vmatpush.msra.mxu1 %v4398_v5  ;;  %v4456_v25 = vld [vmem:[#allocation5 + $0xb8] sm:$0xff]  ;;  %6737 = vst [vmem:[#allocation63_spill] sm:$0xff] %v4472_v48  ;;  %v4475_v32 = vld [vmem:[#allocation2 + $0x100] sm:$0xff] }
 0x1ab   :  { %2794 = vtanh.f32 %v807_v34  ;;  %6736 = vst [vmem:[#allocation22_spill] sm:$0xff] %v4456_v25  ;;  %v4465_v34 = vld [vmem:[#allocation2 + $0x118] sm:$0xff] }
 0x1ac   :  { %1130 = vmatpush.msra.mxu1 %v4401_v23 }
 0x1ae   :  { %1131 = vmatpush.msra.mxu1 %v4404_v61 }
 0x1b0   :  { %1132 = vmatpush.msra.mxu1 %v4407_v21 }
 0x1b1   :  { %v2795_v43 = vpop.eup %2794 }
 0x1b2   :  { %v810_v24 = vmul.f32 %v2795_v43, %v809_v36  ;;  %1133 = vmatpush.msra.mxu1 %v4411_v11  ;;  %v4478_v36 = vld [vmem:[#allocation5 + $0x108] sm:$0xff] }
 0x1b3   :  { %v4482_v43 = vld [vmem:[#allocation5 + $0x88] sm:$0xff] }
 0x1b4   :  { %v4414_v49 = vadd.f32 %v811_v13, %v810_v24  ;;  %1134 = vmatpush.msra.mxu1 %v4416_v7  ;;  %6738 = vst [vmem:[#allocation23_spill] sm:$0xff] %v4482_v43  ;;  %v4485_v24 = vld [vmem:[#allocation2 + $0xe8] sm:$0xff]  ;;  %v4492_v13 = vld [vmem:[#allocation5 + $0x70] sm:$0xff] }
 0x1b5   :  { %6739 = vst [vmem:[#allocation65_spill] sm:$0xff] %v4492_v13 }
 0x1b6   :  { %829 = vmatmul.f32.vlgmr.msrb.gmra.mxu2 %v4414_v49  ;;  %849 = vmatmul.f32.vlgmr.msra.gmra.mxu3 %v4414_v49 }
 0x1b7   :  { %869 = vmatmul.f32.vlgmr.msra.gmra.mxu0 %v4414_v49  ;;  %1017 = vmatmul.f32.vlgmr.msrb.gmra.mxu1 %v4414_v49 }
 0x1b8   :  { %1021 = vmatpush.msrb.mxu2 %v4423_v18  ;;  %1089 = vmatpush.msra.mxu3 %v4426_v27 }
 0x1b9   :  { %1109 = vmatpush.msra.mxu0 %v4429_v51  ;;  %1135 = vmatpush.msra.mxu1 %v4432_v55 }
 0x1ba   :  { %1022 = vmatpush.msrb.mxu2 %v4435_v59  ;;  %1090 = vmatpush.msra.mxu3 %v4438_v57 }
 0x1bb   :  { %1110 = vmatpush.msra.mxu0 %v4441_v62  ;;  %1136 = vmatpush.msra.mxu1 %v4444_v10  ;;  %v4524_v10 = vld [vmem:[#allocation5 + $0x90] sm:$0xff] }
 0x1bc   :  { %1023 = vmatpush.msrb.mxu2 %v4447_v53  ;;  %1091 = vmatpush.msra.mxu3 %v4450_v35 }
 0x1bd   :  { %1111 = vmatpush.msra.mxu0 %v4453_v30  ;;  %1137 = vmatpush.msra.mxu1 %v4456_v25  ;;  %v4505_v25 = vld [vmem:[#allocation2 + $0xb8] sm:$0xff] }
 0x1be   :  { %1024 = vmatpush.msrb.mxu2 %v4459_v26  ;;  %929 = vmatmul.f32.vlgmr.msrb.gmra.mxu3 %v4392_v2 }
 0x1bf   :  { %909 = vmatmul.f32.vlgmr.msra.gmra.mxu2 %v4392_v2  ;;  %997 = vmatmul.f32.vlgmr.msrb.gmra.mxu0 %v4414_v49 }
 0x1c0   :  { %1025 = vmatpush.msrb.mxu2 %v4465_v34  ;;  %1092 = vmatpush.msra.mxu3 %v4468_v54 }
 0x1c1   :  { %1112 = vmatpush.msra.mxu0 %v6633_v29  ;;  %1138 = vmatpush.msra.mxu1 %v4472_v48  ;;  %v4488_v29 = vld [vmem:[#allocation5 + $0xf0] sm:$0xff] }
 0x1c2   :  { %1026 = vmatpush.msrb.mxu2 %v4475_v32  ;;  %1093 = vmatpush.msra.mxu3 %v4478_v36  ;;  %v4495_v48 = vld [vmem:[#allocation2 + $0xd0] sm:$0xff] }
 0x1c3   :  { %1113 = vmatpush.msra.mxu0 %v6636_v1  ;;  %1139 = vmatpush.msra.mxu1 %v4482_v43  ;;  %v4498_v1 = vld [vmem:[#allocation5 + $0xd8] sm:$0xff] }
 0x1c4   :  { %1027 = vmatpush.msrb.mxu2 %v4485_v24  ;;  %1094 = vmatpush.msra.mxu3 %v4488_v29  ;;  %v4502_v43 = vld [vmem:[#allocation5 + $0x58] sm:$0xff] }
 0x1c5   :  { %1114 = vmatpush.msra.mxu0 %v6639_v41  ;;  %1140 = vmatpush.msra.mxu1 %v4492_v13  ;;  %6740 = vst [vmem:[#allocation24_spill] sm:$0xff] %v4502_v43  ;;  %v4508_v41 = vld [vmem:[#allocation5 + $0xc0] sm:$0xff] }
 0x1c6   :  { %1028 = vmatpush.msrb.mxu2 %v4495_v48  ;;  %1095 = vmatpush.msra.mxu3 %v4498_v1  ;;  %v4513_v13 = vld [vmem:[#allocation2 + $0xa0] sm:$0xff] }
 0x1c7   :  { %1115 = vmatpush.msra.mxu0 %v6642_v3  ;;  %1141 = vmatpush.msra.mxu1 %v4502_v43  ;;  %v4516_v3 = vld [vmem:[#allocation5 + $0xa8] sm:$0xff] }
 0x1c8   :  { %1029 = vmatpush.msrb.mxu2 %v4505_v25  ;;  %1096 = vmatpush.msra.mxu3 %v4508_v41  ;;  %v4521_v43 = vld [vmem:[#allocation2 + $0x88] sm:$0xff] }
 0x1c9   :  { %1116 = vmatpush.msra.mxu0 %v3992_v39  ;;  %1142 = vmatpush.msra.mxu1 %v3974_v17  ;;  %v4529_v39 = vld [vmem:[#allocation2 + $0x70] sm:$0xff]  ;;  %v4532_v17 = vld [vmem:[#allocation5 + $0x78] sm:$0xff] }
 0x1ca   :  { %1030 = vmatpush.msrb.mxu2 %v4513_v13  ;;  %1097 = vmatpush.msra.mxu3 %v4516_v3  ;;  %6741 = vst [vmem:[#allocation67_spill] sm:$0xff] %v4529_v39 }
 0x1cb   :  { %1117 = vmatpush.msra.mxu0 %v4005_v20  ;;  %1143 = vmatpush.msra.mxu1 %v3984_v33  ;;  %6742 = vst [vmem:[#allocation92_spill] sm:$0xff] %v4532_v17  ;;  %v4536_v33 = vld [vmem:[#allocation2 + $0x168] sm:$0xff]  ;;  %v4539_v20 = vld [vmem:[#allocation2 + $0x58] sm:$0xff] }
 0x1cc   :  { %1031 = vmatpush.msrb.mxu2 %v4521_v43  ;;  %1098 = vmatpush.msra.mxu3 %v4524_v10  ;;  %6743 = vst [vmem:[#allocation26_spill] sm:$0xff] %v4536_v33 }
 0x1cd   :  { %1118 = vmatpush.msra.mxu0 %v4015_v60  ;;  %1144 = vmatpush.msra.mxu1 %v3994_v15  ;;  %6744 = vst [vmem:[#allocation70_spill] sm:$0xff] %v4539_v20  ;;  %v4542_v60 = vld [vmem:[#allocation5 + $0x60] sm:$0xff]  ;;  %v4546_v15 = vld [vmem:[#allocation2 + $0x150] sm:$0xff] }
 0x1ce   :  { %1032 = vmatpush.msrb.mxu2 %v4529_v39  ;;  %1099 = vmatpush.msra.mxu3 %v4532_v17  ;;  %6745 = vst [vmem:[#allocation95_spill] sm:$0xff] %v4542_v60  ;;  %v4549_v17 = vld [vmem:[#allocation2 + $0x40] sm:$0xff] }
 0x1cf   :  { %1119 = vmatpush.msra.mxu0 %v4023_v22  ;;  %1257 = vmatpush.msrb.mxu1 %v4536_v33  ;;  %6746 = vst [vmem:[#allocation28_spill] sm:$0xff] %v4546_v15  ;;  %v4552_v22 = vld [vmem:[#allocation5 + $0x48] sm:$0xff]  ;;  %v4556_v33 = vld [vmem:[#allocation2 + $0x138] sm:$0xff] }
 0x1d0   :  { %1033 = vmatpush.msrb.mxu2 %v4539_v20  ;;  %1100 = vmatpush.msra.mxu3 %v4542_v60  ;;  %6747 = vst [vmem:[#allocation72_spill] sm:$0xff] %v4549_v17  ;;  %v4559_v60 = vld [vmem:[#allocation2 + $0x28] sm:$0xff] }
 0x1d1   :  { %1120 = vmatpush.msra.mxu0 %v6653_v12  ;;  %1258 = vmatpush.msrb.mxu1 %v4546_v15  ;;  %6748 = vst [vmem:[#allocation97_spill] sm:$0xff] %v4552_v22  ;;  %v4562_v12 = vld [vmem:[#allocation5 + $0x30] sm:$0xff]  ;;  %v4566_v15 = vld [vmem:[#allocation2 + $0x120] sm:$0xff] }
 0x1d2   :  { %1034 = vmatpush.msrb.mxu2 %v4549_v17  ;;  %1101 = vmatpush.msra.mxu3 %v4552_v22  ;;  %6749 = vst [vmem:[#allocation30_spill] sm:$0xff] %v4556_v33  ;;  %v4569_v22 = vld [vmem:[#allocation2 + $0x10] sm:$0xff] }
 0x1d3   :  { %1121 = vmatpush.msra.mxu0 %v6656_v14  ;;  %1259 = vmatpush.msrb.mxu1 %v4556_v33  ;;  %6750 = vst [vmem:[#allocation74_spill] sm:$0xff] %v4559_v60  ;;  %v4572_v14 = vld [vmem:[#allocation5 + $0x18] sm:$0xff]  ;;  %v4577_v33 = vld [vmem:[#allocation7 + $0x168] sm:$0xff] }
 0x1d4   :  { %1035 = vmatpush.msrb.mxu2 %v4559_v60  ;;  %6751 = vst [vmem:[#allocation100_spill] sm:$0xff] %v4562_v12  ;;  %1102 = vmatpush.msra.mxu3 %v4562_v12 }
 0x1d5   :  { %1122 = vmatpush.msra.mxu0 %v6659_v16  ;;  %6752 = vst [vmem:[#allocation45_spill] sm:$0xff] %v4566_v15  ;;  %1260 = vmatpush.msrb.mxu1 %v4566_v15  ;;  %v4580_v16 = vld [vmem:[#allocation5] sm:$0xff]  ;;  %v4583_v15 = vld [vmem:[#allocation7 + $0x170] sm:$0xff] }
 0x1d6   :  { %6753 = vst [vmem:[#allocation76_spill] sm:$0xff] %v4569_v22  ;;  %1036 = vmatpush.msrb.mxu2 %v4569_v22  ;;  %1103 = vmatpush.msra.mxu3 %v4572_v14  ;;  %v4587_v22 = vld [vmem:[#allocation7 + $0x150] sm:$0xff] }
 0x1d7   :  { %6754 = vst [vmem:[#allocation80_spill] sm:$0xff] %v4572_v14  ;;  %1037 = vmatmul.f32.vlgmr.msrb.gmra.mxu2 %v4414_v49  ;;  %1123 = vmatpush.msra.mxu0 %v6662_v19  ;;  %v4591_v19 = vld [vmem:[#allocation7 + $0x158] sm:$0xff]  ;;  %v6820_v14 = vld [vmem:[#allocation58_spill] sm:$0xff] }
 0x1d8   :  { %6755 = vst [vmem:[#allocation102_spill] sm:$0xff] %v4577_v33  ;;  %1149 = vmatpush.msra.mxu2 %v4577_v33  ;;  %1104 = vmatpush.msra.mxu3 %v4580_v16  ;;  %v4594_v33 = vld [vmem:[#allocation2 + $0x108] sm:$0xff] }
 0x1d9   :  { %6756 = vst [vmem:[#allocation46_spill] sm:$0xff] %v4580_v16  ;;  %1124 = vmatpush.msra.mxu0 %v6666_v6  ;;  %1261 = vmatpush.msrb.mxu1 %v4594_v33  ;;  %v4597_v16 = vld [vmem:[#allocation7 + $0x138] sm:$0xff]  ;;  %v4601_v6 = vld [vmem:[#allocation7 + $0x140] sm:$0xff] }
 0x1da   :  { %6757 = vst [vmem:[#allocation82_spill] sm:$0xff] %v4583_v15  ;;  %1169 = vmatpush.msrb.mxu3 %v4583_v15  ;;  %1150 = vmatpush.msra.mxu2 %v4587_v22  ;;  %v4604_v15 = vld [vmem:[#allocation2 + $0xf0] sm:$0xff] }
 0x1db   :  { %6758 = vst [vmem:[#allocation47_spill] sm:$0xff] %v4587_v22  ;;  %1189 = vmatpush.msrb.mxu0 %v4081_v42  ;;  %1262 = vmatpush.msrb.mxu1 %v4604_v15  ;;  %v4607_v42 = vld [vmem:[#allocation7 + $0x120] sm:$0xff] }
 0x1dc   :  { %6759 = vst [vmem:[#allocation84_spill] sm:$0xff] %v4591_v19  ;;  %1170 = vmatpush.msrb.mxu3 %v4591_v19  ;;  %1151 = vmatpush.msra.mxu2 %v4597_v16  ;;  %v4614_v19 = vld [vmem:[#allocation2 + $0xd8] sm:$0xff] }
 0x1dd   :  { %6760 = vst [vmem:[#allocation50_spill] sm:$0xff] %v4594_v33  ;;  %1190 = vmatpush.msrb.mxu0 %v4089_v50  ;;  %v4611_v33 = vld [vmem:[#allocation7 + $0x128] sm:$0xff]  ;;  %1263 = vmatpush.msrb.mxu1 %v4614_v19 }
 0x1de   :  { %6761 = vst [vmem:[#allocation86_spill] sm:$0xff] %v4597_v16  ;;  %1171 = vmatpush.msrb.mxu3 %v4601_v6  ;;  %1152 = vmatpush.msra.mxu2 %v4607_v42  ;;  %v4617_v50 = vld [vmem:[#allocation7 + $0x108] sm:$0xff] }
 0x1df   :  { %6762 = vst [vmem:[#allocation53_spill] sm:$0xff] %v4601_v6  ;;  %1191 = vmatpush.msrb.mxu0 %v4097_v44  ;;  %v4624_v6 = vld [vmem:[#allocation2 + $0xc0] sm:$0xff]  ;;  %v4627_v44 = vld [vmem:[#allocation7 + $0xf0] sm:$0xff] }
 0x1e0   :  { %6763 = vst [vmem:[#allocation107_spill] sm:$0xff] %v4604_v15  ;;  %1172 = vmatpush.msrb.mxu3 %v4611_v33  ;;  %1153 = vmatpush.msra.mxu2 %v4617_v50  ;;  %v4621_v15 = vld [vmem:[#allocation7 + $0x110] sm:$0xff] }
 0x1e1   :  { %6764 = vst [vmem:[#allocation88_spill] sm:$0xff] %v4607_v42  ;;  %1192 = vmatpush.msrb.mxu0 %v6674_v56  ;;  %1264 = vmatpush.msrb.mxu1 %v4624_v6  ;;  %v4637_v56 = vld [vmem:[#allocation7 + $0xd8] sm:$0xff] }
 0x1e2   :  { %6765 = vst [vmem:[#allocation55_spill] sm:$0xff] %v4611_v33  ;;  %1173 = vmatpush.msrb.mxu3 %v4621_v15  ;;  %1154 = vmatpush.msra.mxu2 %v4627_v44  ;;  %v4634_v33 = vld [vmem:[#allocation2 + $0xa8] sm:$0xff] }
 0x1e3   :  { %6766 = vst [vmem:[#allocation108_spill] sm:$0xff] %v4614_v19  ;;  %1193 = vmatpush.msrb.mxu0 %v6677_v37  ;;  %v4631_v19 = vld [vmem:[#allocation7 + $0xf8] sm:$0xff]  ;;  %1265 = vmatpush.msrb.mxu1 %v4634_v33  ;;  %v4647_v37 = vld [vmem:[#allocation7 + $0xc0] sm:$0xff] }
 0x1e4   :  { %6767 = vst [vmem:[#allocation89_spill] sm:$0xff] %v4617_v50  ;;  %1174 = vmatpush.msrb.mxu3 %v4631_v19  ;;  %1155 = vmatpush.msra.mxu2 %v4637_v56  ;;  %v6819_v50 = vld [vmem:[#allocation20_spill] sm:$0xff] }
 0x1e5   :  { %6768 = vst [vmem:[#allocation57_spill] sm:$0xff] %v4621_v15  ;;  %1194 = vmatpush.msrb.mxu0 %v6680_v4  ;;  %v4644_v15 = vld [vmem:[#allocation2 + $0x90] sm:$0xff]  ;;  %v4657_v4 = vld [vmem:[#allocation7 + $0xa8] sm:$0xff] }
 0x1e6   :  { %6769 = vst [vmem:[#allocation109_spill] sm:$0xff] %v4624_v6  ;;  %v4641_v6 = vld [vmem:[#allocation7 + $0xe0] sm:$0xff]  ;;  %1266 = vmatpush.msrb.mxu1 %v4644_v15  ;;  %1156 = vmatpush.msra.mxu2 %v4647_v37 }
 0x1e7   :  { %6770 = vst [vmem:[#allocation90_spill] sm:$0xff] %v4627_v44  ;;  %1175 = vmatpush.msrb.mxu3 %v4641_v6  ;;  %1195 = vmatpush.msrb.mxu0 %v4138_v38  ;;  %v4667_v38 = vld [vmem:[#allocation7 + $0x90] sm:$0xff] }
 0x1e8   :  { %6771 = vst [vmem:[#allocation59_spill] sm:$0xff] %v4631_v19  ;;  %v4654_v19 = vld [vmem:[#allocation2 + $0x78] sm:$0xff]  ;;  %1157 = vmatpush.msra.mxu2 %v4657_v4 }
 0x1e9   :  { %6772 = vst [vmem:[#allocation91_spill] sm:$0xff] %v4634_v33  ;;  %v4651_v33 = vld [vmem:[#allocation7 + $0xc8] sm:$0xff]  ;;  %1267 = vmatpush.msrb.mxu1 %v4654_v19  ;;  %1196 = vmatpush.msrb.mxu0 %v4146_v63  ;;  %v4677_v63 = vld [vmem:[#allocation7 + $0x78] sm:$0xff] }
 0x1ea   :  { %6773 = vst [vmem:[#allocation62_spill] sm:$0xff] %v4637_v56  ;;  %1176 = vmatpush.msrb.mxu3 %v4651_v33  ;;  %1158 = vmatpush.msra.mxu2 %v4667_v38 }
 0x1eb   :  { %6774 = vst [vmem:[#allocation94_spill] sm:$0xff] %v4641_v6  ;;  %v4664_v6 = vld [vmem:[#allocation2 + $0x60] sm:$0xff]  ;;  %1197 = vmatpush.msrb.mxu0 %v4155_v58 }
 0x1ec   :  { %6775 = vst [vmem:[#allocation64_spill] sm:$0xff] %v4644_v15  ;;  %v4661_v15 = vld [vmem:[#allocation7 + $0xb0] sm:$0xff]  ;;  %1268 = vmatpush.msrb.mxu1 %v4664_v6  ;;  %1159 = vmatpush.msra.mxu2 %v4677_v63  ;;  %v4687_v58 = vld [vmem:[#allocation7 + $0x60] sm:$0xff] }
 0x1ed   :  { %6776 = vst [vmem:[#allocation96_spill] sm:$0xff] %v4647_v37  ;;  %1177 = vmatpush.msrb.mxu3 %v4661_v15  ;;  %1198 = vmatpush.msrb.mxu0 %v4159_v9  ;;  %v4697_v9 = vld [vmem:[#allocation7 + $0x48] sm:$0xff] }
 0x1ee   :  { %6777 = vst [vmem:[#allocation66_spill] sm:$0xff] %v4651_v33  ;;  %v4674_v33 = vld [vmem:[#allocation2 + $0x48] sm:$0xff]  ;;  %1160 = vmatpush.msra.mxu2 %v4687_v58 }
 0x1ef   :  { %6778 = vst [vmem:[#allocation99_spill] sm:$0xff] %v4654_v19  ;;  %v4671_v19 = vld [vmem:[#allocation7 + $0x98] sm:$0xff]  ;;  %1269 = vmatpush.msrb.mxu1 %v4674_v33  ;;  %1199 = vmatpush.msrb.mxu0 %v4164_v0  ;;  %v4705_v0 = vld [vmem:[#allocation7 + $0x30] sm:$0xff] }
 0x1f0   :  { %6779 = vst [vmem:[#allocation69_spill] sm:$0xff] %v4657_v4  ;;  %1178 = vmatpush.msrb.mxu3 %v4671_v19  ;;  %1161 = vmatpush.msra.mxu2 %v4697_v9 }
 0x1f1   :  { %6780 = vst [vmem:[#allocation101_spill] sm:$0xff] %v4661_v15  ;;  %v4684_v15 = vld [vmem:[#allocation2 + $0x30] sm:$0xff]  ;;  %1200 = vmatpush.msrb.mxu0 %v4168_v40  ;;  %v4715_v40 = vld [vmem:[#allocation7] sm:$0xff] }
 0x1f2   :  { %6781 = vst [vmem:[#allocation71_spill] sm:$0xff] %v4664_v6  ;;  %v4681_v6 = vld [vmem:[#allocation7 + $0x80] sm:$0xff]  ;;  %1270 = vmatpush.msrb.mxu1 %v4684_v15  ;;  %1162 = vmatpush.msra.mxu2 %v4705_v0 }
 0x1f3   :  { %6782 = vst [vmem:[#allocation103_spill] sm:$0xff] %v4667_v38  ;;  %1179 = vmatpush.msrb.mxu3 %v4681_v6  ;;  %1201 = vmatpush.msrb.mxu0 %v4172_v45  ;;  %v6798_v45 = vld [vmem:[#allocation106_spill] sm:$0xff] }
 0x1f4   :  { %6783 = vst [vmem:[#allocation73_spill] sm:$0xff] %v4671_v19  ;;  %v4694_v19 = vld [vmem:[#allocation2 + $0x18] sm:$0xff] }
 0x1f5   :  { %6784 = vst [vmem:[#allocation104_spill] sm:$0xff] %v4674_v33  ;;  %v4691_v33 = vld [vmem:[#allocation7 + $0x68] sm:$0xff]  ;;  %1271 = vmatpush.msrb.mxu1 %v4694_v19  ;;  %1202 = vmatpush.msrb.mxu0 %v4176_v47  ;;  %v4727_v47 = vld [vmem:[#allocation2 + $0x140] sm:$0xff] }
 0x1f6   :  { %6785 = vst [vmem:[#allocation75_spill] sm:$0xff] %v4677_v63  ;;  %1180 = vmatpush.msrb.mxu3 %v4691_v33 }
 0x1f7   :  { %6786 = vst [vmem:[#allocation105_spill] sm:$0xff] %v4681_v6 }
 0x1f8   :  { %6787 = vst [vmem:[#allocation79_spill] sm:$0xff] %v4684_v15  ;;  %1181 = vmatpush.msrb.mxu3 %v6693_v46  ;;  %v4702_v15 = vld [vmem:[#allocation2] sm:$0xff]  ;;  %v6796_v46 = vld [vmem:[#allocation111_spill] sm:$0xff] }
 0x1f9   :  { %6788 = vst [vmem:[#allocation25_spill] sm:$0xff] %v4687_v58  ;;  %1272 = vmatpush.msrb.mxu1 %v4702_v15  ;;  %1203 = vmatpush.msrb.mxu0 %v6796_v46  ;;  %v4733_v46 = vld [vmem:[#allocation2 + $0x110] sm:$0xff] }
 0x1fa   :  { %6789 = vst [vmem:[#allocation27_spill] sm:$0xff] %v4691_v33  ;;  %1182 = vmatpush.msrb.mxu3 %v6695_v31  ;;  %v6799_v31 = vld [vmem:[#allocation112_spill] sm:$0xff] }
 0x1fb   :  { %6790 = vst [vmem:[#allocation29_spill] sm:$0xff] %v4694_v19  ;;  %v4710_v19 = vld [vmem:[#allocation7 + $0x18] sm:$0xff]  ;;  %1204 = vmatpush.msrb.mxu0 %v6799_v31  ;;  %v4742_v31 = vld [vmem:[#allocation2 + $0xc8] sm:$0xff] }
 0x1fc   :  { %6791 = vst [vmem:[#allocation31_spill] sm:$0xff] %v4697_v9  ;;  %1163 = vmatpush.msra.mxu2 %v4710_v19  ;;  %1183 = vmatpush.msrb.mxu3 %v6697_v8  ;;  %v4730_v8 = vld [vmem:[#allocation2 + $0x128] sm:$0xff] }
 0x1fd   :  { %6792 = vst [vmem:[#allocation32_spill] sm:$0xff] %v4702_v15  ;;  %v4719_v15 = vld [vmem:[#allocation2 + $0x170] sm:$0xff] }
 0x1fe   :  { %6793 = vst [vmem:[#allocation33_spill] sm:$0xff] %v4705_v0  ;;  %1164 = vmatpush.msra.mxu2 %v4715_v40  ;;  %1184 = vmatpush.msrb.mxu3 %v6798_v45  ;;  %v4724_v0 = vld [vmem:[#allocation2 + $0x158] sm:$0xff]  ;;  %v4739_v45 = vld [vmem:[#allocation2 + $0xe0] sm:$0xff] }
 0x1ff   :  { %6794 = vst [vmem:[#allocation34_spill] sm:$0xff] %v4710_v19 }
 0x200   :  { %6795 = vst [vmem:[#allocation35_spill] sm:$0xff] %v4715_v40  ;;  %1277 = vmatpush.msrb.mxu2 %v4719_v15  ;;  %v6816_v40 = vld [vmem:[#allocation15_spill] sm:$0xff] }
 0x201   :  { %6797 = vst [vmem:[#allocation36_spill] sm:$0xff] %v4719_v15  ;;  %v4736_v15 = vld [vmem:[#allocation2 + $0xf8] sm:$0xff] }
 0x202   :  { %6800 = vst [vmem:[#allocation37_spill] sm:$0xff] %v4724_v0  ;;  %1278 = vmatpush.msrb.mxu2 %v4724_v0  ;;  %v6815_v0 = vld [vmem:[#allocation98_spill] sm:$0xff] }
 0x203   :  { %6801 = vst [vmem:[#allocation38_spill] sm:$0xff] %v4727_v47 }
 0x204   :  { %1279 = vmatpush.msrb.mxu2 %v4727_v47  ;;  %6802 = vst [vmem:[#allocation39_spill] sm:$0xff] %v4730_v8  ;;  %v4745_v47 = vld [vmem:[#allocation2 + $0xb0] sm:$0xff] }
 0x205   :  { %6803 = vst [vmem:[#allocation40_spill] sm:$0xff] %v4733_v46 }
 0x206   :  { %1280 = vmatpush.msrb.mxu2 %v4730_v8  ;;  %6804 = vst [vmem:[#allocation41_spill] sm:$0xff] %v4736_v15  ;;  %v4748_v8 = vld [vmem:[#allocation2 + $0x98] sm:$0xff] }
 0x207   :  { %6805 = vst [vmem:[#allocation42_spill] sm:$0xff] %v4739_v45 }
 0x208   :  { %1281 = vmatpush.msrb.mxu2 %v4733_v46  ;;  %6806 = vst [vmem:[#allocation43_spill] sm:$0xff] %v4742_v31  ;;  %v4751_v46 = vld [vmem:[#allocation2 + $0x80] sm:$0xff] }
 0x209   :  { %6807 = vst [vmem:[#allocation48_spill] sm:$0xff] %v4745_v47 }
 0x20a   :  { %1282 = vmatpush.msrb.mxu2 %v4736_v15  ;;  %6808 = vst [vmem:[#allocation44_spill] sm:$0xff] %v4748_v8  ;;  %v4754_v15 = vld [vmem:[#allocation2 + $0x68] sm:$0xff] }
 0x20b   :  { %6809 = vst [vmem:[#allocation111_spill] sm:$0xff] %v4751_v46 }
 0x20c   :  { %1283 = vmatpush.msrb.mxu2 %v4739_v45  ;;  %6810 = vst [vmem:[#allocation106_spill] sm:$0xff] %v4754_v15  ;;  %v4757_v45 = vld [vmem:[#allocation2 + $0x50] sm:$0xff] }
 0x20d   :  { %6811 = vst [vmem:[#allocation112_spill] sm:$0xff] %v4757_v45 }
 0x20e   :  { %1284 = vmatpush.msrb.mxu2 %v4742_v31  ;;  %v4760_v31 = vld [vmem:[#allocation2 + $0x38] sm:$0xff] }
 0x20f   :  { %6812 = vst [vmem:[#allocation113_spill] sm:$0xff] %v4760_v31 }
 0x210   :  { %1285 = vmatpush.msrb.mxu2 %v4745_v47  ;;  %v4763_v47 = vld [vmem:[#allocation2 + $0x20] sm:$0xff] }
 0x211   :  { %6813 = vst [vmem:[#allocation114_spill] sm:$0xff] %v4763_v47 }
 0x212   :  { %1286 = vmatpush.msrb.mxu2 %v4748_v8  ;;  %v4766_v8 = vld [vmem:[#allocation2 + $0x8] sm:$0xff] }
 0x213   :  { %6814 = vst [vmem:[#allocation115_spill] sm:$0xff] %v4766_v8 }
 0x214   :  { %1287 = vmatpush.msrb.mxu2 %v4751_v46 }
 0x216   :  { %1288 = vmatpush.msrb.mxu2 %v4754_v15  ;;  %v358_v15 = vadd.f32 %v6816_v40, %v6815_v0 }
 0x218   :  { %1289 = vmatpush.msrb.mxu2 %v4757_v45 }
 0x21a   :  { %1290 = vmatpush.msrb.mxu2 %v4760_v31  ;;  %v6817_v31 = vld [vmem:[#allocation85_spill] sm:$0xff] }
 0x21c   :  { %1291 = vmatpush.msrb.mxu2 %v4763_v47  ;;  %v6818_v47 = vld [vmem:[#allocation51_spill] sm:$0xff] }
 0x21e   :  { %1292 = vmatpush.msrb.mxu2 %v4766_v8 }
 0x226   :  { %v890_v46 = vpop.f32.mrf.mxu1 }
 0x234   :  { %v4771_v19 = vpop.f32.mrf.mxu0  ;;  %v1018_v33 = vpop.f32.mrf.mxu1 }
 0x235   :  { %v1061_v45 = vadd.f32 %v1018_v33, %v358_v15 }
 0x237   :  { %v2730_v9 = vmul.f32 -1.442695, %v1061_v45 }
 0x239   :  { %2796 = vpow2.f32 %v2730_v9  ;;  %v830_v6 = vpop.f32.mrf.mxu2  ;;  %v850_v56 = vpop.f32.mrf.mxu3 }
 0x23a   :  { %v831_v58 = vadd.f32 %v830_v6, %v6817_v31  ;;  %v851_v40 = vadd.f32 %v850_v56, %v6819_v50 }
 0x23c   :  { %v933_v63 = vadd.f32 %v890_v46, %v831_v58  ;;  %v998_v38 = vpop.f32.mrf.mxu0 }
 0x23d   :  { %v1041_v4 = vadd.f32 %v998_v38, %v6818_v47 }
 0x23e   :  { %v2727_v37 = vmul.f32 -1.442695, %v933_v63 }
 0x23f   :  { %v2797_v8 = vpop.eup %2796  ;;  %v2729_v44 = vmul.f32 -1.442695, %v1041_v4 }
 0x240   :  { %2798 = vpow2.f32 %v2727_v37  ;;  %v4776_v0 = vadd.f32 1.0, %v2797_v8 }
 0x241   :  { %2800 = vpow2.f32 %v2729_v44 }
 0x242   :  { %v910_v33 = vpop.f32.mrf.mxu2  ;;  %2802 = vrcp.f32 %v4776_v0  ;;  %vm1071_vm4 = vweird.f32 %v4776_v0 }
 0x243   :  { %v953_v15 = vadd.f32 %v910_v33, %v851_v40  ;;  %v930_v33 = vpop.f32.mrf.mxu3 }
 0x244   :  { %v973_v12 = vadd.f32 %v6820_v14, %v930_v33 }
 0x245   :  { %v2728_v9 = vmul.f32 -1.442695, %v953_v15 }
 0x246   :  { %v2799_v45 = vpop.eup %2798 }
 0x247   :  { %v2801_v6 = vpop.eup %2800  ;;  %v937_v58 = vadd.f32 1.0, %v2799_v45  ;;  %2804 = vpow2.f32 %v2728_v9 }
 0x248   :  { %v1045_v38 = vadd.f32 1.0, %v2801_v6  ;;  %v4779_v63 = vpop.eup %2802 }
 0x249   :  { %2806 = vrcp.f32 %v937_v58  ;;  %v1067_v47 = vmul.f32 %v4779_v63, %v4776_v0  ;;  %v947_v15 = vand.u32 2147483647, %v937_v58  ;;  %v949_v9 = vand.u32 2147483648, %v937_v58 }
 0x24a   :  { %2808 = vrcp.f32 %v1045_v38  ;;  %v1057_v31 = vand.u32 2147483648, %v1045_v38  ;;  %v1055_v42 = vand.u32 2147483647, %v1045_v38  ;;  %vm943_vm11 = vweird.f32 %v937_v58 }
 0x24b   :  { %v1068_v6 = vsub.f32 1.0, %v1067_v47  ;;  %vm1051_vm13 = vweird.f32 %v1045_v38  ;;  %vm948_vm14 = vcmp.eq.f32.partialorder %v947_v15, 8.507059e+37  ;;  %vm1072_vm2 = vweird.f32 %v4779_v63 }
 0x24c   :  { %vm1056_vm0 = vcmp.eq.f32.partialorder %v1055_v42, 8.507059e+37  ;;  %vm1073_vm6 = vmor %vm1071_vm4, %vm1072_vm2 }
 0x24d   :  { %v2805_v37 = vpop.eup %2804 }
 0x24e   :  { %v4781_v4 = vadd.f32 1.0, %v2805_v37 }
 0x24f   :  { %v2807_v44 = vpop.eup %2806 }
 0x250   :  { %v2809_v56 = vpop.eup %2808  ;;  %2810 = vrcp.f32 %v4781_v4  ;;  %v939_v8 = vmul.f32 %v2807_v44, %v937_v58  ;;  %vm944_vm9 = vweird.f32 %v2807_v44  ;;  %vm963_vm3 = vweird.f32 %v4781_v4 }
 0x251   :  { %v1047_v46 = vmul.f32 %v2809_v56, %v1045_v38  ;;  %vm1052_vm10 = vweird.f32 %v2809_v56  ;;  %vm945_vm12 = vmor %vm943_vm11, %vm944_vm9 }
 0x252   :  { %v940_v40 = vsub.f32 1.0, %v939_v8  ;;  %v950_v8 = vor.u32 1.1754944e-38, %v949_v9  ;;  %vm1053_vm15 = vmor %vm1051_vm13, %vm1052_vm10  ;;  %v969_v9 = vand.u32 2147483648, %v4781_v4 }
 0x253   :  { %v1048_v45 = vsub.f32 1.0, %v1047_v46  ;;  %v1069_v46 = vmul.f32 %v4779_v63, %v1068_v6 }
 0x254   :  { %v941_v50 = vmul.f32 %v2807_v44, %v940_v40  ;;  %v1058_v40 = vor.u32 1.1754944e-38, %v1057_v31 }
 0x255   :  { %v1049_v37 = vmul.f32 %v2809_v56, %v1048_v45 }
 0x256   :  { %v2811_v16 = vpop.eup %2810  ;;  %v942_v22 = vadd.f32 %v2807_v44, %v941_v50  ;;  %v871_v50 = vadd.f32 %v4771_v19, %v4377_v28 }
 0x257   :  { %v959_v60 = vmul.f32 %v2811_v16, %v4781_v4  ;;  %v1050_v17 = vadd.f32 %v2809_v56, %v1049_v37  ;;  %vm964_vm1 = vweird.f32 %v2811_v16 }
 0x258   :  { %v946_v47 = vsel %vm945_vm12, %v2807_v44, %v942_v22  ;;  %v4795_v22 = vld [vmem:[%s6185_s4] ss:$0 sm:$0xff]  ;;  %v1075_v44 = vand.u32 2147483647, %v4776_v0  ;;  %vm965_vm5 = vmor %vm963_vm3, %vm964_vm1 }
 0x259   :  { %v960_v45 = vsub.f32 1.0, %v959_v60  ;;  %v951_v20 = vsel %vm948_vm14, %v950_v8, %v946_v47  ;;  %v1054_v39 = vsel %vm1053_vm15, %v2809_v56, %v1050_v17  ;;  %v967_v17 = vand.u32 2147483647, %v4781_v4  ;;  %v6821_v60 = vld [vmem:[#allocation16_spill] sm:$0xff] }
 0x25a   :  { %v974_v14 = vmul.f32 %v973_v12, %v951_v20  ;;  %v1038_v58 = vpop.f32.mrf.mxu2  ;;  %v1059_v33 = vsel %vm1056_vm0, %v1058_v40, %v1054_v39  ;;  %v399_v42 = vadd.f32 %v6821_v60, %v4151_v52  ;;  %v1070_v20 = vadd.f32 %v4779_v63, %v1069_v46  ;;  %v6844_v60 = vld [vmem:[#allocation86_spill] sm:$0xff] }
 0x25b   :  { %v961_v37 = vmul.f32 %v2811_v16, %v960_v45  ;;  %v1081_v31 = vadd.f32 %v4795_v22, %v1038_v58  ;;  %v1077_v12 = vand.u32 2147483648, %v4776_v0  ;;  %v970_v56 = vor.u32 1.1754944e-38, %v969_v9 }
 0x25c   :  { %v975_v39 = vadd.f32 %v974_v14, %v871_v50  ;;  %vm968_vm7 = vcmp.eq.f32.partialorder %v967_v17, 8.507059e+37  ;;  %v1074_v8 = vsel %vm1073_vm6, %v4779_v63, %v1070_v20  ;;  %vm1076_vm8 = vcmp.eq.f32.partialorder %v1075_v44, 8.507059e+37  ;;  %v4919_v17 = vld [vmem:[#allocation5 + $0x10] sm:$0xff]  ;;  %v4924_v20 = vld [vmem:[#allocation7 + $0x178] sm:$0xff] }
 0x25d   :  { %v1082_v19 = vmul.f32 %v1081_v31, %v1059_v33  ;;  %v962_v38 = vadd.f32 %v2811_v16, %v961_v37  ;;  %v1078_v47 = vor.u32 1.1754944e-38, %v1077_v12  ;;  %v6842_v37 = vld [vmem:[#allocation82_spill] sm:$0xff]  ;;  %v4916_v31 = vld [vmem:[#allocation5 + $0x8] sm:$0xff]  ;;  %6843 = vst [vmem:[#allocation51_spill] sm:$0xff] %v4919_v17  ;;  %v6847_v12 = vld [vmem:[#allocation88_spill] sm:$0xff] }
 0x25e   :  { %2812 = vtanh.f32 %v975_v39  ;;  %v6846_v39 = vld [vmem:[#allocation26_spill] sm:$0xff]  ;;  %v6849_v44 = vld [vmem:[#allocation28_spill] sm:$0xff] }
 0x25f   :  { %v1083_v15 = vadd.f32 %v1082_v19, %v399_v42  ;;  %v966_v6 = vsel %vm965_vm5, %v2811_v16, %v962_v38  ;;  %v1079_v4 = vsel %vm1076_vm8, %v1078_v47, %v1074_v8  ;;  %v6845_v42 = vld [vmem:[#allocation84_spill] sm:$0xff]  ;;  %v6848_v19 = vld [vmem:[#allocation53_spill] sm:$0xff]  ;;  %v4930_v38 = vld [vmem:[#allocation7 + $0x160] sm:$0xff] }
 0x260   :  { %v971_v46 = vsel %vm968_vm7, %v970_v56, %v966_v6  ;;  %v1085_v0 = vsub.f32 1.0, %v1079_v4  ;;  %v1087_v16 = vmul.f32 %v1079_v4, %v4414_v49  ;;  %v4867_v49 = vld [vmem:[#allocation5 + $0xb0] sm:$0xff]  ;;  %v6850_v56 = vld [vmem:[#allocation89_spill] sm:$0xff]  ;;  %v4936_v6 = vld [vmem:[#allocation7 + $0x148] sm:$0xff] }
 0x261   :  { %2814 = vtanh.f32 %v1083_v15  ;;  %v977_v40 = vsub.f32 1.0, %v971_v46  ;;  %v979_v14 = vmul.f32 %v971_v46, %v4392_v2  ;;  %v4837_v2 = vld [vmem:[#allocation5 + $0x128] sm:$0xff]  ;;  %v6852_v8 = vld [vmem:[#allocation30_spill] sm:$0xff]  ;;  %v6854_v47 = vld [vmem:[#allocation57_spill] sm:$0xff] }
 0x262   :  { %v6851_v15 = vld [vmem:[#allocation55_spill] sm:$0xff]  ;;  %v6853_v46 = vld [vmem:[#allocation90_spill] sm:$0xff]  ;;  %v4942_v4 = vld [vmem:[#allocation7 + $0x130] sm:$0xff] }
 0x264   :  { %v2813_v45 = vpop.eup %2812 }
 0x265   :  { %v978_v50 = vmul.f32 %v2813_v45, %v977_v40  ;;  %v6855_v40 = vld [vmem:[#allocation45_spill] sm:$0xff]  ;;  %v6856_v45 = vld [vmem:[#allocation62_spill] sm:$0xff] }
 0x267   :  { %v2815_v58 = vpop.eup %2814  ;;  %v4809_v33 = vadd.f32 %v979_v14, %v978_v50  ;;  %v6857_v50 = vld [vmem:[#allocation59_spill] sm:$0xff]  ;;  %v4948_v14 = vld [vmem:[#allocation7 + $0x118] sm:$0xff] }
 0x268   :  { %v1086_v9 = vmul.f32 %v2815_v58, %v1085_v0  ;;  %v6858_v0 = vld [vmem:[#allocation50_spill] sm:$0xff]  ;;  %v6859_v58 = vld [vmem:[#allocation96_spill] sm:$0xff] }
 0x269   :  { %1165 = vmatmul.f32.vlgmr.msra.gmra.mxu2 %v4809_v33 }
 0x26a   :  { %v4813_v63 = vadd.f32 %v1087_v16, %v1086_v9  ;;  %1405 = vmatpush.msra.mxu2 %v4398_v5  ;;  %v4843_v5 = vld [vmem:[#allocation5 + $0x110] sm:$0xff]  ;;  %v6860_v9 = vld [vmem:[#allocation94_spill] sm:$0xff] }
 0x26b   :  { %v4954_v16 = vld [vmem:[#allocation7 + $0x100] sm:$0xff] }
 0x26c   :  { %1105 = vmatmul.f32.vlgmr.msra.gmra.mxu3 %v4813_v63  ;;  %1125 = vmatmul.f32.vlgmr.msra.gmra.mxu0 %v4813_v63 }
 0x26d   :  { %1145 = vmatmul.f32.vlgmr.msra.gmra.mxu1 %v4813_v63  ;;  %1297 = vmatpush.msra.mxu3 %v4423_v18  ;;  %v4873_v18 = vld [vmem:[#allocation5 + $0x98] sm:$0xff] }
 0x26e   :  { %1365 = vmatpush.msra.mxu0 %v4426_v27  ;;  %1385 = vmatpush.msra.mxu1 %v4429_v51  ;;  %v6824_v27 = vld [vmem:[#allocation67_spill] sm:$0xff] }
 0x26f   :  { %1298 = vmatpush.msra.mxu3 %v4435_v59  ;;  %1406 = vmatpush.msra.mxu2 %v4401_v23  ;;  %v4849_v23 = vld [vmem:[#allocation5 + $0xf8] sm:$0xff]  ;;  %v6825_v51 = vld [vmem:[#allocation63_spill] sm:$0xff]  ;;  %v4879_v59 = vld [vmem:[#allocation5 + $0x80] sm:$0xff] }
 0x270   :  { %1366 = vmatpush.msra.mxu0 %v4438_v57  ;;  %1386 = vmatpush.msra.mxu1 %v4441_v62  ;;  %v6827_v57 = vld [vmem:[#allocation70_spill] sm:$0xff]  ;;  %v6828_v62 = vld [vmem:[#allocation23_spill] sm:$0xff] }
 0x271   :  { %1299 = vmatpush.msra.mxu3 %v4447_v53  ;;  %1293 = vmatmul.f32.vlgmr.msrb.gmra.mxu2 %v4813_v63  ;;  %v6829_v53 = vld [vmem:[#allocation95_spill] sm:$0xff] }
 0x272   :  { %1367 = vmatpush.msra.mxu0 %v4450_v35  ;;  %1387 = vmatpush.msra.mxu1 %v4453_v30  ;;  %v6830_v35 = vld [vmem:[#allocation72_spill] sm:$0xff]  ;;  %v6831_v30 = vld [vmem:[#allocation65_spill] sm:$0xff] }
 0x273   :  { %1300 = vmatpush.msra.mxu3 %v4459_v26  ;;  %1407 = vmatpush.msra.mxu2 %v4404_v61  ;;  %v4855_v61 = vld [vmem:[#allocation5 + $0xe0] sm:$0xff]  ;;  %v4891_v26 = vld [vmem:[#allocation5 + $0x50] sm:$0xff] }
 0x274   :  { %1185 = vmatmul.f32.vlgmr.msrb.gmra.mxu3 %v4809_v33  ;;  %1205 = vmatmul.f32.vlgmr.msrb.gmra.mxu0 %v4809_v33 }
 0x275   :  { %1273 = vmatmul.f32.vlgmr.msrb.gmra.mxu1 %v4813_v63  ;;  %1301 = vmatpush.msra.mxu3 %v4465_v34  ;;  %v6833_v34 = vld [vmem:[#allocation74_spill] sm:$0xff] }
 0x276   :  { %1368 = vmatpush.msra.mxu0 %v4468_v54  ;;  %1388 = vmatpush.msra.mxu1 %v4837_v2  ;;  %v6834_v54 = vld [vmem:[#allocation24_spill] sm:$0xff] }
 0x277   :  { %1302 = vmatpush.msra.mxu3 %v4475_v32  ;;  %1408 = vmatpush.msra.mxu2 %v4407_v21  ;;  %v4861_v21 = vld [vmem:[#allocation5 + $0xc8] sm:$0xff]  ;;  %v4897_v32 = vld [vmem:[#allocation5 + $0x38] sm:$0xff] }
 0x278   :  { %1369 = vmatpush.msra.mxu0 %v4478_v36  ;;  %1389 = vmatpush.msra.mxu1 %v4843_v5  ;;  %v6836_v36 = vld [vmem:[#allocation76_spill] sm:$0xff] }
 0x279   :  { %1303 = vmatpush.msra.mxu3 %v4485_v24  ;;  %1409 = vmatpush.msra.mxu2 %v4411_v11  ;;  %v6822_v11 = vld [vmem:[#allocation61_spill] sm:$0xff]  ;;  %v6837_v24 = vld [vmem:[#allocation80_spill] sm:$0xff] }
 0x27a   :  { %1370 = vmatpush.msra.mxu0 %v4488_v29  ;;  %1390 = vmatpush.msra.mxu1 %v4849_v23  ;;  %v6838_v29 = vld [vmem:[#allocation102_spill] sm:$0xff] }
 0x27b   :  { %1304 = vmatpush.msra.mxu3 %v4495_v48  ;;  %1410 = vmatpush.msra.mxu2 %v4416_v7  ;;  %v6823_v7 = vld [vmem:[#allocation22_spill] sm:$0xff]  ;;  %v6835_v48 = vld [vmem:[#allocation100_spill] sm:$0xff] }
 0x27c   :  { %1371 = vmatpush.msra.mxu0 %v4498_v1  ;;  %1391 = vmatpush.msra.mxu1 %v4855_v61  ;;  %v6839_v1 = vld [vmem:[#allocation46_spill] sm:$0xff] }
 0x27d   :  { %1305 = vmatpush.msra.mxu3 %v4505_v25  ;;  %1411 = vmatpush.msra.mxu2 %v4432_v55  ;;  %v6826_v55 = vld [vmem:[#allocation92_spill] sm:$0xff]  ;;  %v6832_v25 = vld [vmem:[#allocation97_spill] sm:$0xff] }
 0x27e   :  { %1372 = vmatpush.msra.mxu0 %v4508_v41  ;;  %1392 = vmatpush.msra.mxu1 %v4861_v21  ;;  %v4911_v41 = vld [vmem:[#allocation5 + $0x28] sm:$0xff] }
 0x27f   :  { %1306 = vmatpush.msra.mxu3 %v4513_v13  ;;  %1412 = vmatpush.msra.mxu2 %v6822_v11  ;;  %v4907_v13 = vld [vmem:[#allocation5 + $0x20] sm:$0xff]  ;;  %6840 = vst [vmem:[#allocation15_spill] sm:$0xff] %v4911_v41  ;;  %v6861_v11 = vld [vmem:[#allocation107_spill] sm:$0xff] }
 0x280   :  { %1373 = vmatpush.msra.mxu0 %v4516_v3  ;;  %1393 = vmatpush.msra.mxu1 %v4867_v49  ;;  %v6841_v3 = vld [vmem:[#allocation47_spill] sm:$0xff] }
 0x281   :  { %1307 = vmatpush.msra.mxu3 %v4521_v43  ;;  %1413 = vmatpush.msra.mxu2 %v6823_v7  ;;  %v4901_v43 = vld [vmem:[#allocation5 + $0x40] sm:$0xff]  ;;  %v6862_v7 = vld [vmem:[#allocation69_spill] sm:$0xff] }
 0x282   :  { %1374 = vmatpush.msra.mxu0 %v4524_v10  ;;  %1394 = vmatpush.msra.mxu1 %v4873_v18  ;;  %v4885_v10 = vld [vmem:[#allocation5 + $0x68] sm:$0xff] }
 0x283   :  { %1308 = vmatpush.msra.mxu3 %v6824_v27  ;;  %1414 = vmatpush.msra.mxu2 %v6825_v51  ;;  %v6863_v27 = vld [vmem:[#allocation66_spill] sm:$0xff]  ;;  %v4960_v51 = vld [vmem:[#allocation7 + $0xe8] sm:$0xff] }
 0x284   :  { %1375 = vmatpush.msra.mxu0 %v6826_v55  ;;  %1395 = vmatpush.msra.mxu1 %v4879_v59  ;;  %v6864_v55 = vld [vmem:[#allocation108_spill] sm:$0xff] }
 0x285   :  { %1309 = vmatpush.msra.mxu3 %v6827_v57  ;;  %1415 = vmatpush.msra.mxu2 %v6828_v62  ;;  %v6865_v57 = vld [vmem:[#allocation103_spill] sm:$0xff]  ;;  %v6866_v62 = vld [vmem:[#allocation101_spill] sm:$0xff] }
 0x286   :  { %1376 = vmatpush.msra.mxu0 %v6829_v53  ;;  %1396 = vmatpush.msra.mxu1 %v4885_v10  ;;  %v4966_v53 = vld [vmem:[#allocation7 + $0xd0] sm:$0xff] }
 0x287   :  { %1310 = vmatpush.msra.mxu3 %v6830_v35  ;;  %1416 = vmatpush.msra.mxu2 %v6831_v30  ;;  %v6867_v35 = vld [vmem:[#allocation109_spill] sm:$0xff]  ;;  %v6868_v30 = vld [vmem:[#allocation75_spill] sm:$0xff] }
 0x288   :  { %1377 = vmatpush.msra.mxu0 %v6832_v25  ;;  %1397 = vmatpush.msra.mxu1 %v4891_v26  ;;  %v6869_v25 = vld [vmem:[#allocation73_spill] sm:$0xff] }
 0x289   :  { %1311 = vmatpush.msra.mxu3 %v6833_v34  ;;  %1417 = vmatpush.msra.mxu2 %v6834_v54  ;;  %v4972_v34 = vld [vmem:[#allocation7 + $0xb8] sm:$0xff]  ;;  %v6870_v54 = vld [vmem:[#allocation91_spill] sm:$0xff] }
 0x28a   :  { %1378 = vmatpush.msra.mxu0 %v6835_v48  ;;  %1398 = vmatpush.msra.mxu1 %v4897_v32  ;;  %v6871_v48 = vld [vmem:[#allocation25_spill] sm:$0xff] }
 0x28b   :  { %1312 = vmatpush.msra.mxu3 %v6836_v36  ;;  %1418 = vmatpush.msra.mxu2 %v4901_v43  ;;  %v6872_v36 = vld [vmem:[#allocation105_spill] sm:$0xff] }
 0x28c   :  { %1313 = vmatmul.f32.vlgmr.msra.gmra.mxu3 %v4813_v63  ;;  %1379 = vmatpush.msra.mxu0 %v6837_v24  ;;  %v4978_v24 = vld [vmem:[#allocation7 + $0xa0] sm:$0xff] }
 0x28d   :  { %1425 = vmatpush.msrb.mxu3 %v6838_v29  ;;  %1399 = vmatpush.msra.mxu1 %v4907_v13  ;;  %v6873_v29 = vld [vmem:[#allocation64_spill] sm:$0xff] }
 0x28e   :  { %1380 = vmatpush.msra.mxu0 %v6839_v1  ;;  %1419 = vmatpush.msra.mxu2 %v4911_v41  ;;  %v6874_v1 = vld [vmem:[#allocation31_spill] sm:$0xff] }
 0x28f   :  { %1426 = vmatpush.msrb.mxu3 %v6841_v3  ;;  %1400 = vmatpush.msra.mxu1 %v4916_v31  ;;  %v6875_v3 = vld [vmem:[#allocation27_spill] sm:$0xff] }
 0x290   :  { %1445 = vmatpush.msrb.mxu0 %v6842_v37  ;;  %1420 = vmatpush.msra.mxu2 %v4919_v17  ;;  %v4984_v37 = vld [vmem:[#allocation7 + $0x88] sm:$0xff] }
 0x291   :  { %1427 = vmatpush.msrb.mxu3 %v6844_v60  ;;  %1465 = vmatpush.msrb.mxu1 %v4924_v20  ;;  %v6876_v60 = vld [vmem:[#allocation99_spill] sm:$0xff] }
 0x292   :  { %1446 = vmatpush.msrb.mxu0 %v6845_v42  ;;  %1533 = vmatpush.msrb.mxu2 %v6846_v39  ;;  %v6877_v42 = vld [vmem:[#allocation33_spill] sm:$0xff]  ;;  %v4989_v39 = vld [vmem:[#allocation7 + $0x50] sm:$0xff] }
 0x293   :  { %1428 = vmatpush.msrb.mxu3 %v6847_v12  ;;  %1466 = vmatpush.msrb.mxu1 %v4930_v38  ;;  %v4992_v12 = vld [vmem:[#allocation7 + $0x70] sm:$0xff] }
 0x294   :  { %1447 = vmatpush.msrb.mxu0 %v6848_v19  ;;  %1534 = vmatpush.msrb.mxu2 %v6849_v44  ;;  %v6878_v19 = vld [vmem:[#allocation71_spill] sm:$0xff]  ;;  %v6879_v44 = vld [vmem:[#allocation34_spill] sm:$0xff] }
 0x295   :  { %1429 = vmatpush.msrb.mxu3 %v6850_v56  ;;  %1467 = vmatpush.msrb.mxu1 %v4936_v6  ;;  %v4997_v56 = vld [vmem:[#allocation7 + $0x38] sm:$0xff] }
 0x296   :  { %1448 = vmatpush.msrb.mxu0 %v6851_v15  ;;  %1535 = vmatpush.msrb.mxu2 %v6852_v8  ;;  %v5000_v15 = vld [vmem:[#allocation7 + $0x58] sm:$0xff]  ;;  %v6880_v8 = vld [vmem:[#allocation104_spill] sm:$0xff] }
 0x297   :  { %1430 = vmatpush.msrb.mxu3 %v6853_v46  ;;  %1468 = vmatpush.msrb.mxu1 %v4942_v4  ;;  %v6881_v46 = vld [vmem:[#allocation35_spill] sm:$0xff] }
 0x298   :  { %1449 = vmatpush.msrb.mxu0 %v6854_v47  ;;  %1536 = vmatpush.msrb.mxu2 %v6855_v40  ;;  %v5005_v47 = vld [vmem:[#allocation7 + $0x20] sm:$0xff]  ;;  %v6883_v40 = vld [vmem:[#allocation36_spill] sm:$0xff] }
 0x299   :  { %1431 = vmatpush.msrb.mxu3 %v6856_v45  ;;  %1469 = vmatpush.msrb.mxu1 %v4948_v14  ;;  %6882 = vst [vmem:[#allocation58_spill] sm:$0xff] %v5005_v47  ;;  %v5009_v45 = vld [vmem:[#allocation7 + $0x40] sm:$0xff] }
 0x29a   :  { %1450 = vmatpush.msrb.mxu0 %v6857_v50  ;;  %1537 = vmatpush.msrb.mxu2 %v6858_v0  ;;  %6884 = vst [vmem:[#allocation16_spill] sm:$0xff] %v5009_v45  ;;  %v5012_v50 = vld [vmem:[#allocation7 + $0x8] sm:$0xff] }
 0x29b   :  { %1432 = vmatpush.msrb.mxu3 %v6859_v58  ;;  %1470 = vmatpush.msrb.mxu1 %v4954_v16  ;;  %6885 = vst [vmem:[#allocation61_spill] sm:$0xff] %v5012_v50  ;;  %v6886_v0 = vld [vmem:[#allocation79_spill] sm:$0xff]  ;;  %v6887_v58 = vld [vmem:[#allocation37_spill] sm:$0xff] }
 0x29c   :  { %1451 = vmatpush.msrb.mxu0 %v6860_v9  ;;  %1538 = vmatpush.msrb.mxu2 %v6861_v11  ;;  %v5017_v9 = vld [vmem:[#allocation7 + $0x28] sm:$0xff]  ;;  %v6889_v11 = vld [vmem:[#allocation29_spill] sm:$0xff] }
 0x29d   :  { %1433 = vmatpush.msrb.mxu3 %v6862_v7  ;;  %1471 = vmatpush.msrb.mxu1 %v4960_v51  ;;  %6888 = vst [vmem:[#allocation22_spill] sm:$0xff] %v5017_v9  ;;  %v6890_v7 = vld [vmem:[#allocation38_spill] sm:$0xff] }
 0x29e   :  { %1452 = vmatpush.msrb.mxu0 %v6863_v27  ;;  %1539 = vmatpush.msrb.mxu2 %v6864_v55  ;;  %v5022_v27 = vld [vmem:[#allocation7 + $0x10] sm:$0xff] }
 0x29f   :  { %1434 = vmatpush.msrb.mxu3 %v6865_v57  ;;  %1472 = vmatpush.msrb.mxu1 %v4966_v53  ;;  %6891 = vst [vmem:[#allocation67_spill] sm:$0xff] %v5022_v27  ;;  %v6892_v55 = vld [vmem:[#allocation32_spill] sm:$0xff]  ;;  %v6893_v57 = vld [vmem:[#allocation39_spill] sm:$0xff] }
 0x2a0   :  { %1453 = vmatpush.msrb.mxu0 %v6866_v62  ;;  %1540 = vmatpush.msrb.mxu2 %v6867_v35  ;;  %v6894_v62 = vld [vmem:[#allocation40_spill] sm:$0xff]  ;;  %v6895_v35 = vld [vmem:[#allocation41_spill] sm:$0xff] }
 0x2a1   :  { %1435 = vmatpush.msrb.mxu3 %v6868_v30  ;;  %1473 = vmatpush.msrb.mxu1 %v4972_v34  ;;  %v6896_v30 = vld [vmem:[#allocation42_spill] sm:$0xff] }
 0x2a2   :  { %1454 = vmatpush.msrb.mxu0 %v6869_v25  ;;  %1541 = vmatpush.msrb.mxu2 %v6870_v54  ;;  %v6897_v25 = vld [vmem:[#allocation43_spill] sm:$0xff]  ;;  %v6898_v54 = vld [vmem:[#allocation48_spill] sm:$0xff] }
 0x2a3   :  { %1436 = vmatpush.msrb.mxu3 %v6871_v48  ;;  %1474 = vmatpush.msrb.mxu1 %v4978_v24  ;;  %v6899_v48 = vld [vmem:[#allocation44_spill] sm:$0xff] }
 0x2a4   :  { %1455 = vmatpush.msrb.mxu0 %v6872_v36  ;;  %1542 = vmatpush.msrb.mxu2 %v6873_v29  ;;  %v6900_v36 = vld [vmem:[#allocation111_spill] sm:$0xff]  ;;  %v6901_v29 = vld [vmem:[#allocation106_spill] sm:$0xff] }
 0x2a5   :  { %1437 = vmatpush.msrb.mxu3 %v6874_v1  ;;  %1475 = vmatpush.msrb.mxu1 %v4984_v37  ;;  %v6902_v1 = vld [vmem:[#allocation112_spill] sm:$0xff] }
 0x2a6   :  { %1456 = vmatpush.msrb.mxu0 %v6875_v3  ;;  %1543 = vmatpush.msrb.mxu2 %v6876_v60  ;;  %v6903_v3 = vld [vmem:[#allocation113_spill] sm:$0xff]  ;;  %v6904_v60 = vld [vmem:[#allocation114_spill] sm:$0xff] }
 0x2a7   :  { %1438 = vmatpush.msrb.mxu3 %v6877_v42  ;;  %1476 = vmatpush.msrb.mxu1 %v4992_v12  ;;  %v6905_v42 = vld [vmem:[#allocation115_spill] sm:$0xff] }
 0x2a8   :  { %1457 = vmatpush.msrb.mxu0 %v4989_v39  ;;  %1544 = vmatpush.msrb.mxu2 %v6878_v19 }
 0x2a9   :  { %1439 = vmatpush.msrb.mxu3 %v6879_v44  ;;  %1477 = vmatpush.msrb.mxu1 %v5000_v15 }
 0x2aa   :  { %1458 = vmatpush.msrb.mxu0 %v4997_v56  ;;  %1545 = vmatpush.msrb.mxu2 %v6880_v8 }
 0x2ab   :  { %1440 = vmatpush.msrb.mxu3 %v6881_v46  ;;  %1478 = vmatpush.msrb.mxu1 %v5009_v45  ;;  %v6906_v46 = vld [vmem:[#allocation85_spill] sm:$0xff] }
 0x2ac   :  { %1459 = vmatpush.msrb.mxu0 %v5005_v47  ;;  %1546 = vmatpush.msrb.mxu2 %v6886_v0 }
 0x2ad   :  { %1553 = vmatpush.msra.mxu3 %v6883_v40  ;;  %1479 = vmatpush.msrb.mxu1 %v5017_v9 }
 0x2ae   :  { %1460 = vmatpush.msrb.mxu0 %v5012_v50  ;;  %1547 = vmatpush.msrb.mxu2 %v6889_v11  ;;  %v6907_v11 = vld [vmem:[#allocation98_spill] sm:$0xff] }
 0x2af   :  { %1554 = vmatpush.msra.mxu3 %v6887_v58  ;;  %1480 = vmatpush.msrb.mxu1 %v5022_v27  ;;  %v5060_v27 = vld [vmem:[%s6189_s8] ss:$0 sm:$0xff] }
 0x2b0   :  { %1548 = vmatpush.msrb.mxu2 %v6892_v55  ;;  %6912 = vst [vmem:[#allocation63_spill] sm:$0xff] %v5060_v27 }
 0x2b1   :  { %1555 = vmatpush.msra.mxu3 %v6890_v7  ;;  %v6908_v7 = vld [vmem:[#allocation49_spill] sm:$0xff] }
 0x2b2   :  { %v361_v55 = vadd.f32 %v6908_v7, %v6907_v11 }
 0x2b3   :  { %1556 = vmatpush.msra.mxu3 %v6893_v57 }
 0x2b5   :  { %1557 = vmatpush.msra.mxu3 %v6894_v62  ;;  %v6909_v62 = vld [vmem:[#allocation60_spill] sm:$0xff] }
 0x2b7   :  { %1558 = vmatpush.msra.mxu3 %v6895_v35 }
 0x2b9   :  { %1559 = vmatpush.msra.mxu3 %v6896_v30 }
 0x2bb   :  { %1560 = vmatpush.msra.mxu3 %v6897_v25 }
 0x2bd   :  { %1561 = vmatpush.msra.mxu3 %v6898_v54 }
 0x2bf   :  { %1562 = vmatpush.msra.mxu3 %v6899_v48 }
 0x2c1   :  { %1563 = vmatpush.msra.mxu3 %v6900_v36  ;;  %v6910_v36 = vld [vmem:[#allocation20_spill] sm:$0xff] }
 0x2c3   :  { %1564 = vmatpush.msra.mxu3 %v6901_v29 }
 0x2c5   :  { %1565 = vmatpush.msra.mxu3 %v6902_v1 }
 0x2c7   :  { %1566 = vmatpush.msra.mxu3 %v6903_v3 }
 0x2c9   :  { %1567 = vmatpush.msra.mxu3 %v6904_v60 }
 0x2cb   :  { %1568 = vmatpush.msra.mxu3 %v6905_v42 }
 0x2e9   :  { %v1126_v57 = vpop.f32.mrf.mxu0 }
 0x2ea   :  { %v1146_v19 = vpop.f32.mrf.mxu1  ;;  %v1127_v29 = vadd.f32 %v1126_v57, %v6910_v36 }
 0x2ec   :  { %v1166_v44 = vpop.f32.mrf.mxu2 }
 0x2ef   :  { %v1106_v8 = vpop.f32.mrf.mxu3 }
 0x2f0   :  { %v1107_v40 = vadd.f32 %v1106_v8, %v6906_v46 }
 0x2f2   :  { %v1209_v0 = vadd.f32 %v1166_v44, %v1107_v40  ;;  %v1274_v58 = vpop.f32.mrf.mxu1 }
 0x2f3   :  { %v1317_v35 = vadd.f32 %v1274_v58, %v6909_v62 }
 0x2f4   :  { %v2731_v30 = vmul.f32 -1.442695, %v1209_v0  ;;  %v1294_v25 = vpop.f32.mrf.mxu2 }
 0x2f5   :  { %v2733_v54 = vmul.f32 -1.442695, %v1317_v35  ;;  %v1337_v48 = vadd.f32 %v1294_v25, %v361_v55 }
 0x2f6   :  { %2816 = vpow2.f32 %v2731_v30 }
 0x2f7   :  { %2818 = vpow2.f32 %v2733_v54  ;;  %v2734_v1 = vmul.f32 -1.442695, %v1337_v48  ;;  %v1186_v3 = vpop.f32.mrf.mxu3  ;;  %v6911_v54 = vld [vmem:[#allocation77_spill] sm:$0xff] }
 0x2f8   :  { %v1229_v60 = vadd.f32 %v1186_v3, %v1127_v29  ;;  %v402_v48 = vadd.f32 %v6911_v54, %v4151_v52  ;;  %v1147_v29 = vadd.f32 %v1146_v19, %v4377_v28 }
 0x2f9   :  { %2820 = vpow2.f32 %v2734_v1 }
 0x2fa   :  { %v2732_v42 = vmul.f32 -1.442695, %v1229_v60 }
 0x2fc   :  { %v2817_v44 = vpop.eup %2816  ;;  %2822 = vpow2.f32 %v2732_v42 }
 0x2fd   :  { %v2819_v8 = vpop.eup %2818  ;;  %v1213_v40 = vadd.f32 1.0, %v2817_v44 }
 0x2fe   :  { %v1321_v7 = vadd.f32 1.0, %v2819_v8 }
 0x2ff   :  { %v2821_v11 = vpop.eup %2820  ;;  %2824 = vrcp.f32 %v1213_v40  ;;  %v1223_v3 = vand.u32 2147483647, %v1213_v40  ;;  %v1225_v60 = vand.u32 2147483648, %v1213_v40  ;;  %vm1219_vm11 = vweird.f32 %v1213_v40 }
 0x300   :  { %2826 = vrcp.f32 %v1321_v7  ;;  %v5044_v0 = vadd.f32 1.0, %v2821_v11  ;;  %v1206_v11 = vpop.f32.mrf.mxu0  ;;  %v1333_v36 = vand.u32 2147483648, %v1321_v7  ;;  %vm1327_vm12 = vweird.f32 %v1321_v7 }
 0x301   :  { %v1249_v19 = vadd.f32 %v5060_v27, %v1206_v11  ;;  %vm1224_vm14 = vcmp.eq.f32.partialorder %v1223_v3, 8.507059e+37 }
 0x302   :  { %v2823_v58 = vpop.eup %2822  ;;  %2828 = vrcp.f32 %v5044_v0  ;;  %v1334_v47 = vor.u32 1.1754944e-38, %v1333_v36  ;;  %vm1347_vm4 = vweird.f32 %v5044_v0 }
 0x303   :  { %v5047_v55 = vadd.f32 1.0, %v2823_v58  ;;  %v1331_v58 = vand.u32 2147483647, %v1321_v7 }
 0x305   :  { %v2825_v57 = vpop.eup %2824  ;;  %2830 = vrcp.f32 %v5047_v55  ;;  %vm1332_vm0 = vcmp.eq.f32.partialorder %v1331_v58, 8.507059e+37  ;;  %vm1239_vm3 = vweird.f32 %v5047_v55 }
 0x306   :  { %v2827_v62 = vpop.eup %2826  ;;  %v1215_v35 = vmul.f32 %v2825_v57, %v1213_v40  ;;  %vm1220_vm9 = vweird.f32 %v2825_v57  ;;  %v1245_v40 = vand.u32 2147483648, %v5047_v55 }
 0x307   :  { %v1323_v30 = vmul.f32 %v2827_v62, %v1321_v7  ;;  %vm1328_vm10 = vweird.f32 %v2827_v62  ;;  %vm1221_vm13 = vmor %vm1219_vm11, %vm1220_vm9 }
 0x308   :  { %v5050_v25 = vpop.eup %2828  ;;  %v1216_v1 = vsub.f32 1.0, %v1215_v35  ;;  %vm1329_vm15 = vmor %vm1327_vm12, %vm1328_vm10 }
 0x309   :  { %v1343_v42 = vmul.f32 %v5050_v25, %v5044_v0  ;;  %v1324_v44 = vsub.f32 1.0, %v1323_v30  ;;  %v1226_v30 = vor.u32 1.1754944e-38, %v1225_v60  ;;  %vm1348_vm2 = vweird.f32 %v5050_v25 }
 0x30a   :  { %v1217_v8 = vmul.f32 %v2825_v57, %v1216_v1  ;;  %vm1349_vm6 = vmor %vm1347_vm4, %vm1348_vm2 }
 0x30b   :  { %v2831_v46 = vpop.eup %2830  ;;  %v1344_v54 = vsub.f32 1.0, %v1343_v42  ;;  %v1325_v35 = vmul.f32 %v2827_v62, %v1324_v44 }
 0x30c   :  { %v1218_v52 = vadd.f32 %v2825_v57, %v1217_v8  ;;  %v1235_v28 = vmul.f32 %v2831_v46, %v5047_v55  ;;  %vm1240_vm1 = vweird.f32 %v2831_v46 }
 0x30d   :  { %v1345_v1 = vmul.f32 %v5050_v25, %v1344_v54  ;;  %v1326_v9 = vadd.f32 %v2827_v62, %v1325_v35  ;;  %vm1241_vm5 = vmor %vm1239_vm3, %vm1240_vm1 }
 0x30e   :  { %v1222_v50 = vsel %vm1221_vm13, %v2825_v57, %v1218_v52  ;;  %v1236_v45 = vsub.f32 1.0, %v1235_v28  ;;  %v1353_v52 = vand.u32 2147483648, %v5044_v0  ;;  %v1243_v28 = vand.u32 2147483647, %v5047_v55 }
 0x30f   :  { %v1227_v11 = vsel %vm1224_vm14, %v1226_v30, %v1222_v50  ;;  %v1314_v42 = vpop.f32.mrf.mxu3  ;;  %v1330_v44 = vsel %vm1329_vm15, %v2827_v62, %v1326_v9  ;;  %v1346_v60 = vadd.f32 %v5050_v25, %v1345_v1  ;;  %v1246_v57 = vor.u32 1.1754944e-38, %v1245_v40  ;;  %v5101_v40 = vld [vmem:[#allocation5 + $0x160] sm:$0xff] }
 0x310   :  { %v1250_v8 = vmul.f32 %v1249_v19, %v1227_v11  ;;  %v1237_v27 = vmul.f32 %v2831_v46, %v1236_v45  ;;  %v1335_v7 = vsel %vm1332_vm0, %v1334_v47, %v1330_v44  ;;  %v1357_v3 = vadd.f32 %v4795_v22, %v1314_v42  ;;  %v5095_v42 = vld [vmem:[#allocation5 + $0x170] sm:$0xff]  ;;  %v5098_v44 = vld [vmem:[#allocation2 + $0x160] sm:$0xff] }
 0x311   :  { %v1351_v45 = vand.u32 2147483647, %v5044_v0  ;;  %v1350_v62 = vsel %vm1349_vm6, %v5050_v25, %v1346_v60  ;;  %vm1244_vm7 = vcmp.eq.f32.partialorder %v1243_v28, 8.507059e+37  ;;  %v1354_v58 = vor.u32 1.1754944e-38, %v1353_v52  ;;  %v5083_v25 = vld [vmem:[#allocation5 + $0x178] sm:$0xff]  ;;  %v5113_v60 = vld [vmem:[#allocation5 + $0x148] sm:$0xff] }
 0x312   :  { %v1251_v36 = vadd.f32 %v1250_v8, %v1147_v29  ;;  %v1358_v50 = vmul.f32 %v1357_v3, %v1335_v7  ;;  %v1238_v9 = vadd.f32 %v2831_v46, %v1237_v27  ;;  %v5104_v8 = vld [vmem:[#allocation5 + $0x150] sm:$0xff]  ;;  %v5107_v7 = vld [vmem:[#allocation5 + $0x158] sm:$0xff]  ;;  %v5110_v3 = vld [vmem:[#allocation2 + $0x148] sm:$0xff] }
 0x313   :  { %vm1352_vm8 = vcmp.eq.f32.partialorder %v1351_v45, 8.507059e+37  ;;  %v5117_v52 = vld [vmem:[#allocation5 + $0x138] sm:$0xff]  ;;  %v5120_v28 = vld [vmem:[#allocation2 + $0x130] sm:$0xff]  ;;  %v5136_v45 = vld [vmem:[#allocation2 + $0x100] sm:$0xff] }
 0x314   :  { %2832 = vtanh.f32 %v1251_v36  ;;  %v1359_v22 = vadd.f32 %v1358_v50, %v402_v48  ;;  %v1242_v47 = vsel %vm1241_vm5, %v2831_v46, %v1238_v9  ;;  %v1355_v55 = vsel %vm1352_vm8, %v1354_v58, %v1350_v62  ;;  %v5123_v36 = vld [vmem:[#allocation5 + $0x140] sm:$0xff]  ;;  %v5129_v50 = vld [vmem:[#allocation2 + $0x118] sm:$0xff]  ;;  %v5156_v58 = vld [vmem:[#allocation2 + $0xd0] sm:$0xff] }
 0x315   :  { %v1247_v29 = vsel %vm1244_vm7, %v1246_v57, %v1242_v47  ;;  %v1361_v54 = vsub.f32 1.0, %v1355_v55  ;;  %v1363_v48 = vmul.f32 %v1355_v55, %v4813_v63  ;;  %v5092_v63 = vld [vmem:[#allocation5 + $0x168] sm:$0xff]  ;;  %v5132_v9 = vld [vmem:[#allocation5 + $0x120] sm:$0xff]  ;;  %v5149_v62 = vld [vmem:[#allocation5 + $0x118] sm:$0xff] }
 0x316   :  { %2834 = vtanh.f32 %v1359_v22  ;;  %v1253_v27 = vsub.f32 1.0, %v1247_v29  ;;  %v1255_v0 = vmul.f32 %v1247_v29, %v4809_v33  ;;  %v5089_v33 = vld [vmem:[#allocation2 + $0x178] sm:$0xff]  ;;  %v5139_v22 = vld [vmem:[#allocation5 + $0x130] sm:$0xff]  ;;  %v5142_v47 = vld [vmem:[#allocation5 + $0x108] sm:$0xff] }
 0x317   :  { %v5146_v57 = vld [vmem:[#allocation2 + $0xe8] sm:$0xff]  ;;  %v5159_v29 = vld [vmem:[#allocation5 + $0x100] sm:$0xff]  ;;  %v5166_v55 = vld [vmem:[#allocation2 + $0xb8] sm:$0xff] }
 0x31a   :  { %v2833_v19 = vpop.eup %2832 }
 0x31b   :  { %v1254_v35 = vmul.f32 %v2833_v19, %v1253_v27  ;;  %v5169_v27 = vld [vmem:[#allocation5 + $0xe8] sm:$0xff]  ;;  %v5176_v19 = vld [vmem:[#allocation2 + $0xa0] sm:$0xff] }
 0x31c   :  { %v2835_v30 = vpop.eup %2834 }
 0x31d   :  { %v1362_v1 = vmul.f32 %v2835_v30, %v1361_v54  ;;  %v5078_v46 = vadd.f32 %v1255_v0, %v1254_v35  ;;  %v5179_v54 = vld [vmem:[#allocation5 + $0xd0] sm:$0xff]  ;;  %v5186_v35 = vld [vmem:[#allocation2 + $0x88] sm:$0xff]  ;;  %v5189_v0 = vld [vmem:[#allocation5 + $0xb8] sm:$0xff] }
 0x31e   :  { %6914 = vst [vmem:[#allocation70_spill] sm:$0xff] %v5186_v35  ;;  %v5196_v30 = vld [vmem:[#allocation2 + $0x70] sm:$0xff] }
 0x31f   :  { %v5080_v11 = vadd.f32 %v1363_v48, %v1362_v1  ;;  %1441 = vmatmul.f32.vlgmr.msrb.gmra.mxu3 %v5078_v46  ;;  %6916 = vst [vmem:[#allocation95_spill] sm:$0xff] %v5196_v30  ;;  %v5199_v1 = vld [vmem:[#allocation5 + $0xa0] sm:$0xff]  ;;  %v5206_v48 = vld [vmem:[#allocation2 + $0x58] sm:$0xff] }
 0x320   :  { %1681 = vmatpush.msrb.mxu3 %v5083_v25  ;;  %6918 = vst [vmem:[#allocation65_spill] sm:$0xff] %v5206_v48 }
 0x321   :  { %1381 = vmatmul.f32.vlgmr.msra.gmra.mxu0 %v5080_v11  ;;  %1401 = vmatmul.f32.vlgmr.msra.gmra.mxu1 %v5080_v11 }
 0x322   :  { %1421 = vmatmul.f32.vlgmr.msra.gmra.mxu2 %v5080_v11  ;;  %1573 = vmatpush.msra.mxu0 %v5089_v33 }
 0x323   :  { %1641 = vmatpush.msra.mxu1 %v5092_v63  ;;  %1661 = vmatpush.msra.mxu2 %v5095_v42 }
 0x324   :  { %1574 = vmatpush.msra.mxu0 %v5098_v44  ;;  %1682 = vmatpush.msrb.mxu3 %v5101_v40 }
 0x325   :  { %1642 = vmatpush.msra.mxu1 %v5104_v8  ;;  %1662 = vmatpush.msra.mxu2 %v5107_v7 }
 0x326   :  { %1575 = vmatpush.msra.mxu0 %v5110_v3  ;;  %1683 = vmatpush.msrb.mxu3 %v5113_v60 }
 0x327   :  { %1569 = vmatmul.f32.vlgmr.msra.gmra.mxu3 %v5080_v11  ;;  %1643 = vmatpush.msra.mxu1 %v5117_v52 }
 0x328   :  { %1576 = vmatpush.msra.mxu0 %v5120_v28  ;;  %1663 = vmatpush.msra.mxu2 %v5123_v36 }
 0x329   :  { %1461 = vmatmul.f32.vlgmr.msrb.gmra.mxu0 %v5078_v46  ;;  %1481 = vmatmul.f32.vlgmr.msrb.gmra.mxu1 %v5078_v46 }
 0x32a   :  { %1549 = vmatmul.f32.vlgmr.msrb.gmra.mxu2 %v5080_v11  ;;  %1577 = vmatpush.msra.mxu0 %v5129_v50 }
 0x32b   :  { %1644 = vmatpush.msra.mxu1 %v5132_v9  ;;  %1664 = vmatpush.msra.mxu2 %v4837_v2  ;;  %v5152_v2 = vld [vmem:[#allocation5 + $0xf0] sm:$0xff] }
 0x32c   :  { %1578 = vmatpush.msra.mxu0 %v5136_v45  ;;  %1684 = vmatpush.msrb.mxu3 %v5139_v22 }
 0x32d   :  { %1645 = vmatpush.msra.mxu1 %v5142_v47  ;;  %1665 = vmatpush.msra.mxu2 %v4843_v5  ;;  %v5162_v5 = vld [vmem:[#allocation5 + $0xd8] sm:$0xff] }
 0x32e   :  { %1579 = vmatpush.msra.mxu0 %v5146_v57  ;;  %1685 = vmatpush.msrb.mxu3 %v5149_v62 }
 0x32f   :  { %1646 = vmatpush.msra.mxu1 %v5152_v2  ;;  %1666 = vmatpush.msra.mxu2 %v4849_v23  ;;  %v5172_v23 = vld [vmem:[#allocation5 + $0xc0] sm:$0xff] }
 0x330   :  { %1580 = vmatpush.msra.mxu0 %v5156_v58  ;;  %1686 = vmatpush.msrb.mxu3 %v5159_v29 }
 0x331   :  { %1647 = vmatpush.msra.mxu1 %v5162_v5  ;;  %1667 = vmatpush.msra.mxu2 %v4855_v61  ;;  %v5182_v61 = vld [vmem:[#allocation5 + $0xa8] sm:$0xff] }
 0x332   :  { %1581 = vmatpush.msra.mxu0 %v5166_v55  ;;  %1687 = vmatpush.msrb.mxu3 %v5169_v27  ;;  %6913 = vst [vmem:[#allocation92_spill] sm:$0xff] %v5182_v61 }
 0x333   :  { %1648 = vmatpush.msra.mxu1 %v5172_v23  ;;  %1668 = vmatpush.msra.mxu2 %v4861_v21  ;;  %v5192_v21 = vld [vmem:[#allocation5 + $0x90] sm:$0xff] }
 0x334   :  { %1582 = vmatpush.msra.mxu0 %v5176_v19  ;;  %1688 = vmatpush.msrb.mxu3 %v5179_v54  ;;  %6915 = vst [vmem:[#allocation23_spill] sm:$0xff] %v5192_v21 }
 0x335   :  { %1649 = vmatpush.msra.mxu1 %v5182_v61  ;;  %1669 = vmatpush.msra.mxu2 %v4867_v49  ;;  %v5202_v49 = vld [vmem:[#allocation5 + $0x78] sm:$0xff] }
 0x336   :  { %1583 = vmatpush.msra.mxu0 %v5186_v35  ;;  %1689 = vmatpush.msrb.mxu3 %v5189_v0  ;;  %6917 = vst [vmem:[#allocation72_spill] sm:$0xff] %v5202_v49 }
 0x337   :  { %1650 = vmatpush.msra.mxu1 %v5192_v21  ;;  %1670 = vmatpush.msra.mxu2 %v4873_v18  ;;  %v5209_v21 = vld [vmem:[#allocation5 + $0x88] sm:$0xff]  ;;  %v5212_v18 = vld [vmem:[#allocation5 + $0x60] sm:$0xff] }
 0x338   :  { %1584 = vmatpush.msra.mxu0 %v5196_v30  ;;  %1690 = vmatpush.msrb.mxu3 %v5199_v1  ;;  %6919 = vst [vmem:[#allocation97_spill] sm:$0xff] %v5212_v18  ;;  %v5216_v30 = vld [vmem:[#allocation2 + $0x40] sm:$0xff] }
 0x339   :  { %1651 = vmatpush.msra.mxu1 %v5202_v49  ;;  %1671 = vmatpush.msra.mxu2 %v4879_v59  ;;  %6920 = vst [vmem:[#allocation74_spill] sm:$0xff] %v5216_v30  ;;  %v5219_v49 = vld [vmem:[#allocation5 + $0x70] sm:$0xff]  ;;  %v5222_v59 = vld [vmem:[#allocation5 + $0x48] sm:$0xff] }
 0x33a   :  { %1585 = vmatpush.msra.mxu0 %v5206_v48  ;;  %1691 = vmatpush.msrb.mxu3 %v5209_v21  ;;  %6921 = vst [vmem:[#allocation24_spill] sm:$0xff] %v5222_v59  ;;  %v5226_v48 = vld [vmem:[#allocation2 + $0x28] sm:$0xff] }
 0x33b   :  { %1652 = vmatpush.msra.mxu1 %v5212_v18  ;;  %1672 = vmatpush.msra.mxu2 %v4885_v10  ;;  %6922 = vst [vmem:[#allocation100_spill] sm:$0xff] %v5226_v48  ;;  %v5229_v18 = vld [vmem:[#allocation5 + $0x58] sm:$0xff]  ;;  %v5232_v10 = vld [vmem:[#allocation5 + $0x30] sm:$0xff] }
 0x33c   :  { %1586 = vmatpush.msra.mxu0 %v5216_v30  ;;  %1692 = vmatpush.msrb.mxu3 %v5219_v49  ;;  %6923 = vst [vmem:[#allocation76_spill] sm:$0xff] %v5232_v10  ;;  %v5236_v30 = vld [vmem:[#allocation2 + $0x10] sm:$0xff] }
 0x33d   :  { %1653 = vmatpush.msra.mxu1 %v5222_v59  ;;  %1673 = vmatpush.msra.mxu2 %v4891_v26  ;;  %6924 = vst [vmem:[#allocation80_spill] sm:$0xff] %v5236_v30  ;;  %v5241_v26 = vld [vmem:[#allocation5 + $0x18] sm:$0xff]  ;;  %v6996_v59 = vld [vmem:[#allocation68_spill] sm:$0xff] }
 0x33e   :  { %1587 = vmatpush.msra.mxu0 %v5226_v48  ;;  %1693 = vmatpush.msrb.mxu3 %v5229_v18  ;;  %6925 = vst [vmem:[#allocation102_spill] sm:$0xff] %v5241_v26  ;;  %v5244_v48 = vld [vmem:[#allocation7 + $0x168] sm:$0xff] }
 0x33f   :  { %1654 = vmatpush.msra.mxu1 %v5232_v10  ;;  %1674 = vmatpush.msra.mxu2 %v4897_v32  ;;  %6926 = vst [vmem:[#allocation46_spill] sm:$0xff] %v5244_v48  ;;  %v5248_v10 = vld [vmem:[#allocation5] sm:$0xff]  ;;  %v5252_v32 = vld [vmem:[#allocation7 + $0x150] sm:$0xff] }
 0x340   :  { %1588 = vmatpush.msra.mxu0 %v5236_v30  ;;  %1694 = vmatpush.msrb.mxu3 %v4901_v43  ;;  %6927 = vst [vmem:[#allocation47_spill] sm:$0xff] %v5248_v10  ;;  %v5255_v30 = vld [vmem:[#allocation7 + $0x170] sm:$0xff] }
 0x341   :  { %1589 = vmatmul.f32.vlgmr.msra.gmra.mxu0 %v5080_v11  ;;  %1655 = vmatpush.msra.mxu1 %v5241_v26  ;;  %6928 = vst [vmem:[#allocation82_spill] sm:$0xff] %v5252_v32 }
 0x342   :  { %1701 = vmatpush.msrb.mxu0 %v5244_v48  ;;  %1675 = vmatpush.msra.mxu2 %v4907_v13  ;;  %6929 = vst [vmem:[#allocation86_spill] sm:$0xff] %v5255_v30  ;;  %v5260_v48 = vld [vmem:[#allocation7 + $0x138] sm:$0xff] }
 0x343   :  { %1656 = vmatpush.msra.mxu1 %v5248_v10  ;;  %1695 = vmatpush.msrb.mxu3 %v4911_v41  ;;  %6930 = vst [vmem:[#allocation84_spill] sm:$0xff] %v5260_v48  ;;  %v5263_v13 = vld [vmem:[#allocation7 + $0x158] sm:$0xff]  ;;  %v5267_v10 = vld [vmem:[#allocation2 + $0x168] sm:$0xff] }
 0x344   :  { %1702 = vmatpush.msrb.mxu0 %v5252_v32  ;;  %1676 = vmatpush.msra.mxu2 %v4916_v31  ;;  %6931 = vst [vmem:[#allocation26_spill] sm:$0xff] %v5263_v13  ;;  %v5270_v32 = vld [vmem:[#allocation7 + $0x120] sm:$0xff] }
 0x345   :  { %1721 = vmatpush.msrb.mxu1 %v5255_v30  ;;  %1696 = vmatpush.msrb.mxu3 %v4919_v17  ;;  %6932 = vst [vmem:[#allocation88_spill] sm:$0xff] %v5267_v10  ;;  %v5273_v31 = vld [vmem:[#allocation7 + $0x140] sm:$0xff] }
 0x346   :  { %1703 = vmatpush.msrb.mxu0 %v5260_v48  ;;  %1741 = vmatpush.msrb.mxu2 %v4924_v20  ;;  %6933 = vst [vmem:[#allocation53_spill] sm:$0xff] %v5270_v32  ;;  %v5277_v48 = vld [vmem:[#allocation2 + $0x150] sm:$0xff]  ;;  %v5283_v20 = vld [vmem:[#allocation7 + $0x128] sm:$0xff] }
 0x347   :  { %1722 = vmatpush.msrb.mxu1 %v5263_v13  ;;  %1809 = vmatpush.msra.mxu3 %v5267_v10  ;;  %6934 = vst [vmem:[#allocation28_spill] sm:$0xff] %v5273_v31  ;;  %v5280_v13 = vld [vmem:[#allocation7 + $0x108] sm:$0xff] }
 0x348   :  { %1704 = vmatpush.msrb.mxu0 %v5270_v32  ;;  %1742 = vmatpush.msrb.mxu2 %v4930_v38  ;;  %6935 = vst [vmem:[#allocation89_spill] sm:$0xff] %v5277_v48  ;;  %v5287_v32 = vld [vmem:[#allocation2 + $0x138] sm:$0xff]  ;;  %v5293_v38 = vld [vmem:[#allocation7 + $0x110] sm:$0xff] }
 0x349   :  { %1723 = vmatpush.msrb.mxu1 %v5273_v31  ;;  %1810 = vmatpush.msra.mxu3 %v5277_v48  ;;  %6936 = vst [vmem:[#allocation55_spill] sm:$0xff] %v5280_v13  ;;  %v5290_v31 = vld [vmem:[#allocation7 + $0xf0] sm:$0xff] }
 0x34a   :  { %1705 = vmatpush.msrb.mxu0 %v5280_v13  ;;  %6937 = vst [vmem:[#allocation30_spill] sm:$0xff] %v5283_v20  ;;  %1743 = vmatpush.msrb.mxu2 %v4936_v6  ;;  %v5297_v13 = vld [vmem:[#allocation2 + $0x120] sm:$0xff]  ;;  %v5303_v6 = vld [vmem:[#allocation7 + $0xf8] sm:$0xff] }
 0x34b   :  { %1724 = vmatpush.msrb.mxu1 %v5283_v20  ;;  %6938 = vst [vmem:[#allocation90_spill] sm:$0xff] %v5287_v32  ;;  %1811 = vmatpush.msra.mxu3 %v5287_v32  ;;  %v5300_v20 = vld [vmem:[#allocation7 + $0xd8] sm:$0xff] }
 0x34c   :  { %6939 = vst [vmem:[#allocation57_spill] sm:$0xff] %v5290_v31  ;;  %1706 = vmatpush.msrb.mxu0 %v5290_v31  ;;  %1744 = vmatpush.msrb.mxu2 %v4942_v4  ;;  %v5307_v31 = vld [vmem:[#allocation2 + $0x108] sm:$0xff]  ;;  %v5313_v4 = vld [vmem:[#allocation7 + $0xe0] sm:$0xff] }
 0x34d   :  { %6940 = vst [vmem:[#allocation45_spill] sm:$0xff] %v5293_v38  ;;  %1725 = vmatpush.msrb.mxu1 %v5293_v38  ;;  %1812 = vmatpush.msra.mxu3 %v5297_v13  ;;  %v5310_v38 = vld [vmem:[#allocation7 + $0xc0] sm:$0xff] }
 0x34e   :  { %6941 = vst [vmem:[#allocation62_spill] sm:$0xff] %v5297_v13  ;;  %1707 = vmatpush.msrb.mxu0 %v5300_v20  ;;  %1745 = vmatpush.msrb.mxu2 %v4948_v14  ;;  %v5323_v14 = vld [vmem:[#allocation7 + $0xc8] sm:$0xff] }
 0x34f   :  { %6942 = vst [vmem:[#allocation59_spill] sm:$0xff] %v5300_v20  ;;  %1726 = vmatpush.msrb.mxu1 %v5303_v6  ;;  %1813 = vmatpush.msra.mxu3 %v5307_v31  ;;  %v5317_v20 = vld [vmem:[#allocation2 + $0xf0] sm:$0xff] }
 0x350   :  { %6943 = vst [vmem:[#allocation50_spill] sm:$0xff] %v5303_v6  ;;  %1708 = vmatpush.msrb.mxu0 %v5310_v38  ;;  %1746 = vmatpush.msrb.mxu2 %v4954_v16  ;;  %v5320_v6 = vld [vmem:[#allocation7 + $0xa8] sm:$0xff]  ;;  %v5333_v16 = vld [vmem:[#allocation7 + $0xb0] sm:$0xff] }
 0x351   :  { %6944 = vst [vmem:[#allocation96_spill] sm:$0xff] %v5307_v31  ;;  %1727 = vmatpush.msrb.mxu1 %v5313_v4  ;;  %1814 = vmatpush.msra.mxu3 %v5317_v20  ;;  %v6995_v31 = vld [vmem:[#allocation17_spill] sm:$0xff] }
 0x352   :  { %6945 = vst [vmem:[#allocation94_spill] sm:$0xff] %v5310_v38  ;;  %1709 = vmatpush.msrb.mxu0 %v5320_v6  ;;  %1747 = vmatpush.msrb.mxu2 %v4960_v51  ;;  %v5327_v38 = vld [vmem:[#allocation2 + $0xd8] sm:$0xff] }
 0x353   :  { %6946 = vst [vmem:[#allocation107_spill] sm:$0xff] %v5313_v4  ;;  %1728 = vmatpush.msrb.mxu1 %v5323_v14  ;;  %1815 = vmatpush.msra.mxu3 %v5327_v38  ;;  %v5330_v4 = vld [vmem:[#allocation7 + $0x90] sm:$0xff]  ;;  %v5343_v51 = vld [vmem:[#allocation7 + $0x98] sm:$0xff] }
 0x354   :  { %6947 = vst [vmem:[#allocation69_spill] sm:$0xff] %v5317_v20  ;;  %1710 = vmatpush.msrb.mxu0 %v5330_v4  ;;  %1748 = vmatpush.msrb.mxu2 %v4966_v53  ;;  %v5353_v53 = vld [vmem:[#allocation7 + $0x80] sm:$0xff] }
 0x355   :  { %6948 = vst [vmem:[#allocation66_spill] sm:$0xff] %v5320_v6  ;;  %1729 = vmatpush.msrb.mxu1 %v5333_v16  ;;  %v5337_v6 = vld [vmem:[#allocation2 + $0xc0] sm:$0xff] }
 0x356   :  { %6949 = vst [vmem:[#allocation108_spill] sm:$0xff] %v5323_v14  ;;  %1816 = vmatpush.msra.mxu3 %v5337_v6  ;;  %v5340_v14 = vld [vmem:[#allocation7 + $0x78] sm:$0xff]  ;;  %1749 = vmatpush.msrb.mxu2 %v4972_v34  ;;  %v5363_v34 = vld [vmem:[#allocation7 + $0x68] sm:$0xff]  ;;  %v6994_v20 = vld [vmem:[#allocation98_spill] sm:$0xff] }
 0x357   :  { %6950 = vst [vmem:[#allocation103_spill] sm:$0xff] %v5327_v38  ;;  %1711 = vmatpush.msrb.mxu0 %v5340_v14  ;;  %1730 = vmatpush.msrb.mxu1 %v5343_v51 }
 0x358   :  { %6951 = vst [vmem:[#allocation101_spill] sm:$0xff] %v5330_v4  ;;  %v5347_v4 = vld [vmem:[#allocation2 + $0xa8] sm:$0xff]  ;;  %1750 = vmatpush.msrb.mxu2 %v4978_v24  ;;  %v5375_v24 = vld [vmem:[#allocation2 + $0x60] sm:$0xff] }
 0x359   :  { %6952 = vst [vmem:[#allocation109_spill] sm:$0xff] %v5333_v16  ;;  %1817 = vmatpush.msra.mxu3 %v5347_v4  ;;  %v5350_v16 = vld [vmem:[#allocation7 + $0x60] sm:$0xff]  ;;  %1731 = vmatpush.msrb.mxu1 %v5353_v53 }
 0x35a   :  { %6953 = vst [vmem:[#allocation75_spill] sm:$0xff] %v5337_v6  ;;  %1712 = vmatpush.msrb.mxu0 %v5350_v16  ;;  %1751 = vmatpush.msrb.mxu2 %v4984_v37  ;;  %v5383_v37 = vld [vmem:[#allocation2 + $0x48] sm:$0xff] }
 0x35b   :  { %6954 = vst [vmem:[#allocation73_spill] sm:$0xff] %v5340_v14  ;;  %v5357_v14 = vld [vmem:[#allocation2 + $0x90] sm:$0xff]  ;;  %1732 = vmatpush.msrb.mxu1 %v5363_v34 }
 0x35c   :  { %6955 = vst [vmem:[#allocation91_spill] sm:$0xff] %v5343_v51  ;;  %1818 = vmatpush.msra.mxu3 %v5357_v14  ;;  %v5360_v51 = vld [vmem:[#allocation7 + $0x48] sm:$0xff]  ;;  %1752 = vmatpush.msrb.mxu2 %v4992_v12  ;;  %v5390_v12 = vld [vmem:[#allocation2 + $0x170] sm:$0xff] }
 0x35d   :  { %6956 = vst [vmem:[#allocation25_spill] sm:$0xff] %v5347_v4  ;;  %1713 = vmatpush.msrb.mxu0 %v5360_v51  ;;  %1733 = vmatpush.msrb.mxu1 %v4989_v39  ;;  %v6968_v39 = vld [vmem:[#allocation58_spill] sm:$0xff] }
 0x35e   :  { %6957 = vst [vmem:[#allocation105_spill] sm:$0xff] %v5350_v16  ;;  %v5367_v16 = vld [vmem:[#allocation2 + $0x78] sm:$0xff]  ;;  %1753 = vmatpush.msrb.mxu2 %v5000_v15 }
 0x35f   :  { %6958 = vst [vmem:[#allocation64_spill] sm:$0xff] %v5353_v53  ;;  %1819 = vmatpush.msra.mxu3 %v5367_v16  ;;  %v5370_v53 = vld [vmem:[#allocation7 + $0x30] sm:$0xff]  ;;  %1734 = vmatpush.msrb.mxu1 %v4997_v56  ;;  %v5398_v15 = vld [vmem:[#allocation2 + $0x158] sm:$0xff] }
 0x360   :  { %6959 = vst [vmem:[#allocation31_spill] sm:$0xff] %v5357_v14  ;;  %1714 = vmatpush.msrb.mxu0 %v5370_v53  ;;  %v5395_v56 = vld [vmem:[#allocation2 + $0x30] sm:$0xff] }
 0x361   :  { %6960 = vst [vmem:[#allocation27_spill] sm:$0xff] %v5360_v51  ;;  %1820 = vmatpush.msra.mxu3 %v5375_v24  ;;  %v5378_v51 = vld [vmem:[#allocation7 + $0x18] sm:$0xff]  ;;  %1735 = vmatpush.msrb.mxu1 %v6968_v39  ;;  %v5405_v39 = vld [vmem:[#allocation2 + $0x140] sm:$0xff]  ;;  %v6993_v14 = vld [vmem:[#allocation20_spill] sm:$0xff] }
 0x362   :  { %6961 = vst [vmem:[#allocation99_spill] sm:$0xff] %v5363_v34  ;;  %1715 = vmatpush.msrb.mxu0 %v5378_v51  ;;  %v6970_v34 = vld [vmem:[#allocation16_spill] sm:$0xff] }
 0x363   :  { %6962 = vst [vmem:[#allocation33_spill] sm:$0xff] %v5367_v16  ;;  %1821 = vmatpush.msra.mxu3 %v5383_v37  ;;  %1754 = vmatpush.msrb.mxu2 %v6970_v34  ;;  %v6977_v34 = vld [vmem:[#allocation67_spill] sm:$0xff] }
 0x364   :  { %6963 = vst [vmem:[#allocation71_spill] sm:$0xff] %v5370_v53  ;;  %v5386_v53 = vld [vmem:[#allocation7] sm:$0xff] }
 0x365   :  { %6964 = vst [vmem:[#allocation34_spill] sm:$0xff] %v5375_v24  ;;  %1716 = vmatpush.msrb.mxu0 %v5386_v53  ;;  %1822 = vmatpush.msra.mxu3 %v5395_v56 }
 0x366   :  { %6965 = vst [vmem:[#allocation104_spill] sm:$0xff] %v5378_v51  ;;  %v6971_v51 = vld [vmem:[#allocation61_spill] sm:$0xff] }
 0x367   :  { %6966 = vst [vmem:[#allocation35_spill] sm:$0xff] %v5383_v37  ;;  %1829 = vmatpush.msra.mxu0 %v5390_v12  ;;  %1736 = vmatpush.msrb.mxu1 %v6971_v51  ;;  %v6974_v37 = vld [vmem:[#allocation22_spill] sm:$0xff] }
 0x368   :  { %6967 = vst [vmem:[#allocation36_spill] sm:$0xff] %v5386_v53  ;;  %1755 = vmatpush.msrb.mxu2 %v6974_v37  ;;  %v5402_v53 = vld [vmem:[#allocation2 + $0x18] sm:$0xff]  ;;  %v5409_v51 = vld [vmem:[#allocation2] sm:$0xff] }
 0x369   :  { %6969 = vst [vmem:[#allocation79_spill] sm:$0xff] %v5390_v12  ;;  %1830 = vmatpush.msra.mxu0 %v5398_v15  ;;  %1823 = vmatpush.msra.mxu3 %v5402_v53  ;;  %v5412_v12 = vld [vmem:[#allocation2 + $0x128] sm:$0xff]  ;;  %v5418_v37 = vld [vmem:[#allocation2 + $0xf8] sm:$0xff] }
 0x36a   :  { %6972 = vst [vmem:[#allocation37_spill] sm:$0xff] %v5395_v56  ;;  %1756 = vmatpush.msrb.mxu2 %v6977_v34  ;;  %v5424_v34 = vld [vmem:[#allocation2 + $0xc8] sm:$0xff] }
 0x36b   :  { %6973 = vst [vmem:[#allocation29_spill] sm:$0xff] %v5398_v15  ;;  %1831 = vmatpush.msra.mxu0 %v5405_v39  ;;  %1824 = vmatpush.msra.mxu3 %v5409_v51  ;;  %v5415_v15 = vld [vmem:[#allocation2 + $0x110] sm:$0xff] }
 0x36c   :  { %6975 = vst [vmem:[#allocation38_spill] sm:$0xff] %v5402_v53  ;;  %v5421_v53 = vld [vmem:[#allocation2 + $0xe0] sm:$0xff] }
 0x36d   :  { %6976 = vst [vmem:[#allocation32_spill] sm:$0xff] %v5405_v39  ;;  %1832 = vmatpush.msra.mxu0 %v5412_v12  ;;  %v5427_v39 = vld [vmem:[#allocation2 + $0xb0] sm:$0xff] }
 0x36e   :  { %6978 = vst [vmem:[#allocation39_spill] sm:$0xff] %v5409_v51  ;;  %v6992_v51 = vld [vmem:[#allocation85_spill] sm:$0xff] }
 0x36f   :  { %6979 = vst [vmem:[#allocation40_spill] sm:$0xff] %v5412_v12  ;;  %1833 = vmatpush.msra.mxu0 %v5415_v15  ;;  %v5430_v12 = vld [vmem:[#allocation2 + $0x98] sm:$0xff] }
 0x370   :  { %6980 = vst [vmem:[#allocation41_spill] sm:$0xff] %v5415_v15  ;;  %v5433_v15 = vld [vmem:[#allocation2 + $0x80] sm:$0xff] }
 0x371   :  { %6981 = vst [vmem:[#allocation42_spill] sm:$0xff] %v5418_v37  ;;  %1834 = vmatpush.msra.mxu0 %v5418_v37  ;;  %v5436_v37 = vld [vmem:[#allocation2 + $0x68] sm:$0xff] }
 0x372   :  { %6982 = vst [vmem:[#allocation43_spill] sm:$0xff] %v5421_v53 }
 0x373   :  { %1835 = vmatpush.msra.mxu0 %v5421_v53  ;;  %6983 = vst [vmem:[#allocation48_spill] sm:$0xff] %v5424_v34  ;;  %v5439_v53 = vld [vmem:[#allocation2 + $0x50] sm:$0xff] }
 0x374   :  { %6984 = vst [vmem:[#allocation44_spill] sm:$0xff] %v5427_v39 }
 0x375   :  { %1836 = vmatpush.msra.mxu0 %v5424_v34  ;;  %6985 = vst [vmem:[#allocation111_spill] sm:$0xff] %v5430_v12  ;;  %v5442_v34 = vld [vmem:[#allocation2 + $0x38] sm:$0xff] }
 0x376   :  { %6986 = vst [vmem:[#allocation106_spill] sm:$0xff] %v5433_v15 }
 0x377   :  { %1837 = vmatpush.msra.mxu0 %v5427_v39  ;;  %6987 = vst [vmem:[#allocation112_spill] sm:$0xff] %v5436_v37  ;;  %v5445_v39 = vld [vmem:[#allocation2 + $0x20] sm:$0xff] }
 0x378   :  { %6988 = vst [vmem:[#allocation113_spill] sm:$0xff] %v5439_v53 }
 0x379   :  { %1838 = vmatpush.msra.mxu0 %v5430_v12  ;;  %6989 = vst [vmem:[#allocation114_spill] sm:$0xff] %v5442_v34  ;;  %v5448_v12 = vld [vmem:[#allocation2 + $0x8] sm:$0xff] }
 0x37a   :  { %6990 = vst [vmem:[#allocation115_spill] sm:$0xff] %v5445_v39 }
 0x37b   :  { %1839 = vmatpush.msra.mxu0 %v5433_v15  ;;  %6991 = vst [vmem:[#allocation49_spill] sm:$0xff] %v5448_v12 }
 0x37d   :  { %1840 = vmatpush.msra.mxu0 %v5436_v37 }
 0x37f   :  { %1841 = vmatpush.msra.mxu0 %v5439_v53 }
 0x381   :  { %1842 = vmatpush.msra.mxu0 %v5442_v34 }
 0x383   :  { %1843 = vmatpush.msra.mxu0 %v5445_v39  ;;  %v364_v39 = vadd.f32 %v6995_v31, %v6994_v20 }
 0x385   :  { %1844 = vmatpush.msra.mxu0 %v5448_v12 }
 0x39e   :  { %v1382_v15 = vpop.f32.mrf.mxu0  ;;  %v1402_v37 = vpop.f32.mrf.mxu1 }
 0x39f   :  { %v1383_v56 = vadd.f32 %v1382_v15, %v6992_v51  ;;  %v1403_v53 = vadd.f32 %v1402_v37, %v6993_v14 }
 0x3a2   :  { %v1442_v24 = vpop.f32.mrf.mxu3 }
 0x3a3   :  { %v1485_v16 = vadd.f32 %v1442_v24, %v1383_v56 }
 0x3a5   :  { %v2735_v4 = vmul.f32 -1.442695, %v1485_v16  ;;  %v1422_v6 = vpop.f32.mrf.mxu2 }
 0x3a6   :  { %v1462_v38 = vpop.f32.mrf.mxu0 }
 0x3a7   :  { %2836 = vpow2.f32 %v2735_v4  ;;  %v1505_v34 = vadd.f32 %v1462_v38, %v1403_v53 }
 0x3a9   :  { %v2736_v30 = vmul.f32 -1.442695, %v1505_v34 }
 0x3aa   :  { %v1570_v26 = vpop.f32.mrf.mxu3 }
 0x3ab   :  { %2838 = vpow2.f32 %v2736_v30  ;;  %v1613_v12 = vadd.f32 %v1570_v26, %v364_v39 }
 0x3ad   :  { %v2837_v13 = vpop.eup %2836  ;;  %v2738_v32 = vmul.f32 -1.442695, %v1613_v12  ;;  %v1550_v15 = vpop.f32.mrf.mxu2 }
 0x3ae   :  { %v1489_v51 = vadd.f32 1.0, %v2837_v13  ;;  %v1593_v24 = vadd.f32 %v1550_v15, %v6996_v59  ;;  %v1482_v15 = vpop.f32.mrf.mxu1 }
 0x3af   :  { %2840 = vpow2.f32 %v2738_v32 }
 0x3b0   :  { %2842 = vrcp.f32 %v1489_v51  ;;  %v2737_v56 = vmul.f32 -1.442695, %v1593_v24  ;;  %v1501_v13 = vand.u32 2147483648, %v1489_v51  ;;  %v1499_v34 = vand.u32 2147483647, %v1489_v51 }
 0x3b1   :  { %v2839_v16 = vpop.eup %2838  ;;  %vm1495_vm10 = vweird.f32 %v1489_v51 }
 0x3b2   :  { %v1509_v37 = vadd.f32 1.0, %v2839_v16  ;;  %2844 = vpow2.f32 %v2737_v56  ;;  %vm1500_vm12 = vcmp.eq.f32.partialorder %v1499_v34, 8.507059e+37 }
 0x3b4   :  { %2846 = vrcp.f32 %v1509_v37  ;;  %vm1515_vm14 = vweird.f32 %v1509_v37  ;;  %v1519_v41 = vand.u32 2147483647, %v1509_v37 }
 0x3b5   :  { %v2841_v38 = vpop.eup %2840 }
 0x3b6   :  { %v2843_v4 = vpop.eup %2842  ;;  %v5456_v31 = vadd.f32 1.0, %v2841_v38  ;;  %v1502_v38 = vor.u32 1.1754944e-38, %v1501_v13  ;;  %vm1520_vm0 = vcmp.eq.f32.partialorder %v1519_v41, 8.507059e+37  ;;  %v5470_v41 = vld [vmem:[%s6185_s4] ss:$0 sm:$0xff] }
 0x3b7   :  { %v1491_v53 = vmul.f32 %v2843_v4, %v1489_v51  ;;  %vm1496_vm9 = vweird.f32 %v2843_v4 }
 0x3b8   :  { %2848 = vrcp.f32 %v5456_v31  ;;  %v2845_v30 = vpop.eup %2844  ;;  %vm1497_vm11 = vmor %vm1495_vm10, %vm1496_vm9  ;;  %vm1623_vm6 = vweird.f32 %v5456_v31 }
 0x3b9   :  { %v1492_v26 = vsub.f32 1.0, %v1491_v53  ;;  %v1597_v39 = vadd.f32 1.0, %v2845_v30  ;;  %v6997_v53 = vld [vmem:[#allocation63_spill] sm:$0xff] }
 0x3ba   :  { %v2847_v12 = vpop.eup %2846  ;;  %v1525_v48 = vadd.f32 %v6997_v53, %v1482_v15 }
 0x3bb   :  { %v1511_v59 = vmul.f32 %v2847_v12, %v1509_v37  ;;  %v1493_v32 = vmul.f32 %v2843_v4, %v1492_v26  ;;  %2850 = vrcp.f32 %v1597_v39  ;;  %vm1516_vm13 = vweird.f32 %v2847_v12  ;;  %v6998_v26 = vld [vmem:[#allocation21_spill] sm:$0xff] }
 0x3bc   :  { %v1423_v17 = vadd.f32 %v1422_v6, %v6998_v26  ;;  %vm1517_vm15 = vmor %vm1515_vm14, %vm1516_vm13  ;;  %vm1603_vm2 = vweird.f32 %v1597_v39 }
 0x3bd   :  { %v1512_v24 = vsub.f32 1.0, %v1511_v59  ;;  %v1494_v16 = vadd.f32 %v2843_v4, %v1493_v32  ;;  %v1521_v32 = vand.u32 2147483648, %v1509_v37 }
 0x3be   :  { %v5459_v56 = vpop.eup %2848 }
 0x3bf   :  { %v1513_v14 = vmul.f32 %v2847_v12, %v1512_v24  ;;  %v1498_v20 = vsel %vm1497_vm11, %v2843_v4, %v1494_v16  ;;  %v1619_v30 = vmul.f32 %v5459_v56, %v5456_v31  ;;  %v1609_v24 = vand.u32 2147483648, %v1597_v39 }
 0x3c0   :  { %v1503_v10 = vsel %vm1500_vm12, %v1502_v38, %v1498_v20  ;;  %v1522_v20 = vor.u32 1.1754944e-38, %v1521_v32  ;;  %v1607_v38 = vand.u32 2147483647, %v1597_v39  ;;  %vm1624_vm4 = vweird.f32 %v5459_v56  ;;  %v6999_v32 = vld [vmem:[#allocation110_spill] sm:$0xff] }
 0x3c1   :  { %v1526_v35 = vmul.f32 %v1525_v48, %v1503_v10  ;;  %v1514_v59 = vadd.f32 %v2847_v12, %v1513_v14  ;;  %v2851_v51 = vpop.eup %2850  ;;  %v1620_v4 = vsub.f32 1.0, %v1619_v30  ;;  %v1590_v10 = vpop.f32.mrf.mxu0  ;;  %vm1625_vm7 = vmor %vm1623_vm6, %vm1624_vm4 }
 0x3c2   :  { %v1599_v13 = vmul.f32 %v2851_v51, %v1597_v39  ;;  %vm1604_vm1 = vweird.f32 %v2851_v51  ;;  %vm1608_vm5 = vcmp.eq.f32.partialorder %v1607_v38, 8.507059e+37 }
 0x3c3   :  { %v1527_v61 = vadd.f32 %v1526_v35, %v1423_v17  ;;  %v1518_v34 = vsel %vm1517_vm15, %v2847_v12, %v1514_v59  ;;  %v1621_v48 = vmul.f32 %v5459_v56, %v1620_v4  ;;  %vm1605_vm3 = vmor %vm1603_vm2, %vm1604_vm1  ;;  %v1610_v17 = vor.u32 1.1754944e-38, %v1609_v24 }
 0x3c4   :  { %v1600_v15 = vsub.f32 1.0, %v1599_v13  ;;  %v1523_v6 = vsel %vm1520_vm0, %v1522_v20, %v1518_v34  ;;  %v1633_v12 = vadd.f32 %v5470_v41, %v1590_v10  ;;  %v7000_v13 = vld [vmem:[#allocation52_spill] sm:$0xff]  ;;  %v1629_v34 = vand.u32 2147483648, %v5456_v31 }
 0x3c5   :  { %2852 = vtanh.f32 %v1527_v61  ;;  %v1529_v35 = vsub.f32 1.0, %v1523_v6  ;;  %v1622_v53 = vadd.f32 %v5459_v56, %v1621_v48  ;;  %v1531_v39 = vmul.f32 %v1523_v6, %v5078_v46 }
 0x3c6   :  { %v1601_v16 = vmul.f32 %v2851_v51, %v1600_v15  ;;  %v405_v4 = vadd.f32 %v7000_v13, %v6999_v32  ;;  %v1627_v15 = vand.u32 2147483647, %v5456_v31  ;;  %v1630_v46 = vor.u32 1.1754944e-38, %v1629_v34  ;;  %v5594_v13 = vld [vmem:[#allocation7 + $0x178] sm:$0xff]  ;;  %v7025_v34 = vld [vmem:[#allocation96_spill] sm:$0xff] }
 0x3c8   :  { %v1602_v14 = vadd.f32 %v2851_v51, %v1601_v16  ;;  %v1626_v16 = vsel %vm1625_vm7, %v5459_v56, %v1622_v53  ;;  %vm1628_vm8 = vcmp.eq.f32.partialorder %v1627_v15, 8.507059e+37  ;;  %v7021_v53 = vld [vmem:[#allocation47_spill] sm:$0xff]  ;;  %v5600_v15 = vld [vmem:[#allocation7 + $0x160] sm:$0xff] }
 0x3c9   :  { %v1631_v38 = vsel %vm1628_vm8, %v1630_v46, %v1626_v16  ;;  %v7028_v16 = vld [vmem:[#allocation69_spill] sm:$0xff] }
 0x3ca   :  { %v1606_v61 = vsel %vm1605_vm3, %v2851_v51, %v1602_v14  ;;  %v1637_v31 = vsub.f32 1.0, %v1631_v38  ;;  %v1639_v10 = vmul.f32 %v1631_v38, %v5080_v11  ;;  %v5517_v11 = vld [vmem:[#allocation5 + $0x128] sm:$0xff]  ;;  %v5577_v14 = vld [vmem:[#allocation5 + $0x38] sm:$0xff] }
 0x3cb   :  { %v2853_v37 = vpop.eup %2852  ;;  %v1611_v30 = vsel %vm1608_vm5, %v1610_v17, %v1606_v61  ;;  %v7017_v17 = vld [vmem:[#allocation62_spill] sm:$0xff]  ;;  %v7029_v46 = vld [vmem:[#allocation53_spill] sm:$0xff]  ;;  %v5606_v38 = vld [vmem:[#allocation7 + $0x148] sm:$0xff] }
 0x3cc   :  { %v1530_v59 = vmul.f32 %v2853_v37, %v1529_v35  ;;  %v1634_v51 = vmul.f32 %v1633_v12, %v1611_v30  ;;  %v7018_v35 = vld [vmem:[#allocation80_spill] sm:$0xff]  ;;  %v7019_v37 = vld [vmem:[#allocation102_spill] sm:$0xff] }
 0x3cd   :  { %v5584_v61 = vld [vmem:[#allocation5 + $0x20] sm:$0xff] }
 0x3ce   :  { %v5480_v20 = vadd.f32 %v1531_v39, %v1530_v59  ;;  %v1635_v24 = vadd.f32 %v1634_v51, %v405_v4  ;;  %v7020_v12 = vld [vmem:[#allocation46_spill] sm:$0xff]  ;;  %v5590_v59 = vld [vmem:[#allocation5 + $0x8] sm:$0xff]  ;;  %v7026_v51 = vld [vmem:[#allocation84_spill] sm:$0xff] }
 0x3cf   :  { %v7022_v30 = vld [vmem:[#allocation86_spill] sm:$0xff] }
 0x3d0   :  { %1717 = vmatmul.f32.vlgmr.msrb.gmra.mxu0 %v5480_v20  ;;  %2854 = vtanh.f32 %v1635_v24  ;;  %v7023_v39 = vld [vmem:[#allocation82_spill] sm:$0xff]  ;;  %v7027_v24 = vld [vmem:[#allocation28_spill] sm:$0xff] }
 0x3d1   :  { %1957 = vmatpush.msrb.mxu0 %v5083_v25  ;;  %v5523_v25 = vld [vmem:[#allocation5 + $0x110] sm:$0xff]  ;;  %v7024_v4 = vld [vmem:[#allocation26_spill] sm:$0xff] }
 0x3d3   :  { %1958 = vmatpush.msrb.mxu0 %v5101_v40  ;;  %v5547_v40 = vld [vmem:[#allocation5 + $0xb0] sm:$0xff] }
 0x3d5   :  { %1959 = vmatpush.msrb.mxu0 %v5113_v60  ;;  %v5553_v60 = vld [vmem:[#allocation5 + $0x98] sm:$0xff] }
 0x3d6   :  { %v2855_v6 = vpop.eup %2854 }
 0x3d7   :  { %1960 = vmatpush.msrb.mxu0 %v5139_v22  ;;  %v1638_v48 = vmul.f32 %v2855_v6, %v1637_v31  ;;  %v7030_v31 = vld [vmem:[#allocation30_spill] sm:$0xff]  ;;  %v7031_v6 = vld [vmem:[#allocation103_spill] sm:$0xff] }
 0x3d9   :  { %1961 = vmatpush.msrb.mxu0 %v5149_v62  ;;  %v5492_v56 = vadd.f32 %v1639_v10, %v1638_v48  ;;  %v7032_v48 = vld [vmem:[#allocation55_spill] sm:$0xff]  ;;  %v5612_v10 = vld [vmem:[#allocation7 + $0x130] sm:$0xff] }
 0x3db   :  { %1962 = vmatpush.msrb.mxu0 %v5159_v29  ;;  %1657 = vmatmul.f32.vlgmr.msra.gmra.mxu1 %v5492_v56 }
 0x3dc   :  { %1677 = vmatmul.f32.vlgmr.msra.gmra.mxu2 %v5492_v56  ;;  %1697 = vmatmul.f32.vlgmr.msrb.gmra.mxu3 %v5492_v56 }
 0x3dd   :  { %1845 = vmatmul.f32.vlgmr.msra.gmra.mxu0 %v5492_v56  ;;  %1849 = vmatpush.msra.mxu1 %v5089_v33  ;;  %v5529_v33 = vld [vmem:[#allocation5 + $0xf8] sm:$0xff] }
 0x3de   :  { %1917 = vmatpush.msra.mxu2 %v5092_v63  ;;  %1937 = vmatpush.msrb.mxu3 %v5095_v42  ;;  %v5535_v63 = vld [vmem:[#allocation5 + $0xe0] sm:$0xff]  ;;  %v5541_v42 = vld [vmem:[#allocation5 + $0xc8] sm:$0xff] }
 0x3df   :  { %1963 = vmatpush.msrb.mxu0 %v5169_v27  ;;  %1850 = vmatpush.msra.mxu1 %v5098_v44  ;;  %v7001_v44 = vld [vmem:[#allocation92_spill] sm:$0xff] }
 0x3e0   :  { %1918 = vmatpush.msra.mxu2 %v5104_v8  ;;  %1938 = vmatpush.msrb.mxu3 %v5107_v7  ;;  %v7002_v8 = vld [vmem:[#allocation15_spill] sm:$0xff]  ;;  %v7003_v7 = vld [vmem:[#allocation70_spill] sm:$0xff] }
 0x3e1   :  { %1964 = vmatpush.msrb.mxu0 %v5179_v54  ;;  %1851 = vmatpush.msra.mxu1 %v5110_v3  ;;  %v7004_v3 = vld [vmem:[#allocation23_spill] sm:$0xff] }
 0x3e2   :  { %1919 = vmatpush.msra.mxu2 %v5117_v52  ;;  %1939 = vmatpush.msrb.mxu3 %v5123_v36  ;;  %v7005_v52 = vld [vmem:[#allocation51_spill] sm:$0xff]  ;;  %v5559_v36 = vld [vmem:[#allocation5 + $0x80] sm:$0xff] }
 0x3e3   :  { %1965 = vmatpush.msrb.mxu0 %v5189_v0  ;;  %1852 = vmatpush.msra.mxu1 %v5120_v28  ;;  %v7007_v28 = vld [vmem:[#allocation72_spill] sm:$0xff] }
 0x3e4   :  { %1757 = vmatmul.f32.vlgmr.msrb.gmra.mxu2 %v5480_v20  ;;  %1737 = vmatmul.f32.vlgmr.msrb.gmra.mxu1 %v5480_v20 }
 0x3e5   :  { %1825 = vmatmul.f32.vlgmr.msra.gmra.mxu3 %v5492_v56  ;;  %1853 = vmatpush.msra.mxu1 %v5129_v50  ;;  %v7008_v50 = vld [vmem:[#allocation88_spill] sm:$0xff] }
 0x3e6   :  { %1920 = vmatpush.msra.mxu2 %v5132_v9  ;;  %1940 = vmatpush.msrb.mxu3 %v5517_v11  ;;  %v7009_v9 = vld [vmem:[#allocation65_spill] sm:$0xff] }
 0x3e7   :  { %1966 = vmatpush.msrb.mxu0 %v5199_v1  ;;  %1854 = vmatpush.msra.mxu1 %v5136_v45  ;;  %v7010_v45 = vld [vmem:[#allocation97_spill] sm:$0xff] }
 0x3e8   :  { %1921 = vmatpush.msra.mxu2 %v5142_v47  ;;  %1941 = vmatpush.msrb.mxu3 %v5523_v25  ;;  %v5565_v47 = vld [vmem:[#allocation5 + $0x68] sm:$0xff] }
 0x3e9   :  { %1967 = vmatpush.msrb.mxu0 %v5209_v21  ;;  %1855 = vmatpush.msra.mxu1 %v5146_v57  ;;  %v7011_v57 = vld [vmem:[#allocation89_spill] sm:$0xff] }
 0x3ea   :  { %1922 = vmatpush.msra.mxu2 %v5152_v2  ;;  %1942 = vmatpush.msrb.mxu3 %v5529_v33  ;;  %v7012_v2 = vld [vmem:[#allocation74_spill] sm:$0xff] }
 0x3eb   :  { %1968 = vmatpush.msrb.mxu0 %v5219_v49  ;;  %1856 = vmatpush.msra.mxu1 %v5156_v58  ;;  %v7013_v58 = vld [vmem:[#allocation24_spill] sm:$0xff] }
 0x3ec   :  { %1923 = vmatpush.msra.mxu2 %v5162_v5  ;;  %1943 = vmatpush.msrb.mxu3 %v5535_v63  ;;  %v5571_v5 = vld [vmem:[#allocation5 + $0x50] sm:$0xff] }
 0x3ed   :  { %1969 = vmatpush.msrb.mxu0 %v5229_v18  ;;  %1857 = vmatpush.msra.mxu1 %v5166_v55  ;;  %v7014_v55 = vld [vmem:[#allocation90_spill] sm:$0xff] }
 0x3ee   :  { %1924 = vmatpush.msra.mxu2 %v5172_v23  ;;  %1944 = vmatpush.msrb.mxu3 %v5541_v42  ;;  %v7015_v23 = vld [vmem:[#allocation100_spill] sm:$0xff] }
 0x3ef   :  { %1970 = vmatpush.msrb.mxu0 %v4901_v43  ;;  %1858 = vmatpush.msra.mxu1 %v5176_v19  ;;  %v7006_v43 = vld [vmem:[#allocation95_spill] sm:$0xff]  ;;  %v7016_v19 = vld [vmem:[#allocation76_spill] sm:$0xff] }
 0x3f0   :  { %1925 = vmatpush.msra.mxu2 %v7001_v44  ;;  %1945 = vmatpush.msrb.mxu3 %v5547_v40  ;;  %v7033_v44 = vld [vmem:[#allocation45_spill] sm:$0xff] }
 0x3f1   :  { %1971 = vmatpush.msrb.mxu0 %v7002_v8  ;;  %1859 = vmatpush.msra.mxu1 %v7003_v7  ;;  %v7034_v8 = vld [vmem:[#allocation75_spill] sm:$0xff]  ;;  %v7035_v7 = vld [vmem:[#allocation57_spill] sm:$0xff] }
 0x3f2   :  { %1926 = vmatpush.msra.mxu2 %v7004_v3  ;;  %1946 = vmatpush.msrb.mxu3 %v5553_v60  ;;  %v5618_v3 = vld [vmem:[#allocation7 + $0x118] sm:$0xff] }
 0x3f3   :  { %1972 = vmatpush.msrb.mxu0 %v7005_v52  ;;  %1860 = vmatpush.msra.mxu1 %v7006_v43  ;;  %v7036_v52 = vld [vmem:[#allocation50_spill] sm:$0xff]  ;;  %v7037_v43 = vld [vmem:[#allocation25_spill] sm:$0xff] }
 0x3f4   :  { %1927 = vmatpush.msra.mxu2 %v7007_v28  ;;  %1947 = vmatpush.msrb.mxu3 %v5559_v36  ;;  %v7038_v28 = vld [vmem:[#allocation59_spill] sm:$0xff] }
 0x3f5   :  { %2085 = vmatpush.msra.mxu0 %v7008_v50  ;;  %1861 = vmatpush.msra.mxu1 %v7009_v9  ;;  %v5624_v9 = vld [vmem:[#allocation7 + $0x100] sm:$0xff] }
 0x3f6   :  { %1928 = vmatpush.msra.mxu2 %v7010_v45  ;;  %1948 = vmatpush.msrb.mxu3 %v5565_v47  ;;  %v7039_v45 = vld [vmem:[#allocation107_spill] sm:$0xff] }
 0x3f7   :  { %2086 = vmatpush.msra.mxu0 %v7011_v57  ;;  %1862 = vmatpush.msra.mxu1 %v7012_v2  ;;  %v7040_v2 = vld [vmem:[#allocation31_spill] sm:$0xff] }
 0x3f8   :  { %1929 = vmatpush.msra.mxu2 %v7013_v58  ;;  %1949 = vmatpush.msrb.mxu3 %v5571_v5  ;;  %v7041_v58 = vld [vmem:[#allocation94_spill] sm:$0xff] }
 0x3f9   :  { %2087 = vmatpush.msra.mxu0 %v7014_v55  ;;  %1863 = vmatpush.msra.mxu1 %v7015_v23  ;;  %v5630_v23 = vld [vmem:[#allocation7 + $0xe8] sm:$0xff] }
 0x3fa   :  { %1930 = vmatpush.msra.mxu2 %v7016_v19  ;;  %1950 = vmatpush.msrb.mxu3 %v5577_v14  ;;  %v7042_v19 = vld [vmem:[#allocation108_spill] sm:$0xff] }
 0x3fb   :  { %2088 = vmatpush.msra.mxu0 %v7017_v17  ;;  %1864 = vmatpush.msra.mxu1 %v7018_v35  ;;  %v7043_v35 = vld [vmem:[#allocation33_spill] sm:$0xff] }
 0x3fc   :  { %1931 = vmatpush.msra.mxu2 %v7019_v37  ;;  %1865 = vmatmul.f32.vlgmr.msra.gmra.mxu1 %v5492_v56  ;;  %v7044_v37 = vld [vmem:[#allocation66_spill] sm:$0xff] }
 0x3fd   :  { %1951 = vmatpush.msrb.mxu3 %v5584_v61  ;;  %1977 = vmatpush.msrb.mxu1 %v7020_v12  ;;  %v5636_v12 = vld [vmem:[#allocation7 + $0xd0] sm:$0xff] }
 0x3fe   :  { %1932 = vmatpush.msra.mxu2 %v7021_v53  ;;  %2089 = vmatpush.msra.mxu0 %v7025_v34  ;;  %7045 = vst [vmem:[#allocation60_spill] sm:$0xff] %v5636_v12  ;;  %v7046_v53 = vld [vmem:[#allocation109_spill] sm:$0xff] }
 0x3ff   :  { %1952 = vmatpush.msrb.mxu3 %v5590_v59  ;;  %1978 = vmatpush.msrb.mxu1 %v7023_v39  ;;  %v7048_v39 = vld [vmem:[#allocation101_spill] sm:$0xff] }
 0x400   :  { %1997 = vmatpush.msrb.mxu2 %v7022_v30  ;;  %2090 = vmatpush.msra.mxu0 %v7028_v16  ;;  %v7047_v30 = vld [vmem:[#allocation34_spill] sm:$0xff]  ;;  %v7052_v16 = vld [vmem:[#allocation73_spill] sm:$0xff] }
 0x401   :  { %2017 = vmatpush.msra.mxu3 %v5594_v13  ;;  %1979 = vmatpush.msrb.mxu1 %v7026_v51  ;;  %v7050_v51 = vld [vmem:[#allocation91_spill] sm:$0xff] }
 0x402   :  { %1998 = vmatpush.msrb.mxu2 %v7024_v4  ;;  %2091 = vmatpush.msra.mxu0 %v7031_v6  ;;  %v5642_v4 = vld [vmem:[#allocation7 + $0xb8] sm:$0xff] }
 0x403   :  { %2018 = vmatpush.msra.mxu3 %v5600_v15  ;;  %1980 = vmatpush.msrb.mxu1 %v7029_v46  ;;  %7049 = vst [vmem:[#allocation77_spill] sm:$0xff] %v5642_v4  ;;  %v5648_v46 = vld [vmem:[#allocation7 + $0xa0] sm:$0xff]  ;;  %v7055_v6 = vld [vmem:[#allocation37_spill] sm:$0xff] }
 0x404   :  { %1999 = vmatpush.msrb.mxu2 %v7027_v24  ;;  %2092 = vmatpush.msra.mxu0 %v7034_v8  ;;  %v7051_v24 = vld [vmem:[#allocation35_spill] sm:$0xff]  ;;  %7053 = vst [vmem:[#allocation58_spill] sm:$0xff] %v5648_v46 }
 0x405   :  { %2019 = vmatpush.msra.mxu3 %v5606_v38  ;;  %1981 = vmatpush.msrb.mxu1 %v7032_v48  ;;  %v7056_v48 = vld [vmem:[#allocation105_spill] sm:$0xff]  ;;  %v7058_v8 = vld [vmem:[#allocation99_spill] sm:$0xff] }
 0x406   :  { %2000 = vmatpush.msrb.mxu2 %v7030_v31  ;;  %2093 = vmatpush.msra.mxu0 %v7037_v43  ;;  %v7054_v31 = vld [vmem:[#allocation64_spill] sm:$0xff] }
 0x407   :  { %2020 = vmatpush.msra.mxu3 %v5612_v10  ;;  %1982 = vmatpush.msrb.mxu1 %v7035_v7  ;;  %v7059_v7 = vld [vmem:[#allocation38_spill] sm:$0xff]  ;;  %v5660_v43 = vld [vmem:[#allocation7 + $0x70] sm:$0xff] }
 0x408   :  { %2001 = vmatpush.msrb.mxu2 %v7033_v44  ;;  %2094 = vmatpush.msra.mxu0 %v7040_v2  ;;  %v5654_v44 = vld [vmem:[#allocation7 + $0x88] sm:$0xff]  ;;  %7061 = vst [vmem:[#allocation61_spill] sm:$0xff] %v5660_v43 }
 0x409   :  { %2021 = vmatpush.msra.mxu3 %v5618_v3  ;;  %1983 = vmatpush.msrb.mxu1 %v7038_v28  ;;  %7057 = vst [vmem:[#allocation16_spill] sm:$0xff] %v5654_v44  ;;  %v5663_v28 = vld [vmem:[#allocation7 + $0x50] sm:$0xff]  ;;  %v7064_v2 = vld [vmem:[#allocation71_spill] sm:$0xff] }
 0x40a   :  { %2002 = vmatpush.msrb.mxu2 %v7036_v52  ;;  %2095 = vmatpush.msra.mxu0 %v7043_v35  ;;  %v7060_v52 = vld [vmem:[#allocation27_spill] sm:$0xff]  ;;  %7062 = vst [vmem:[#allocation22_spill] sm:$0xff] %v5663_v28  ;;  %v7067_v35 = vld [vmem:[#allocation104_spill] sm:$0xff] }
 0x40b   :  { %2022 = vmatpush.msra.mxu3 %v5624_v9  ;;  %1984 = vmatpush.msrb.mxu1 %v7041_v58  ;;  %v5668_v58 = vld [vmem:[#allocation7 + $0x58] sm:$0xff] }
 0x40c   :  { %2003 = vmatpush.msrb.mxu2 %v7039_v45  ;;  %2096 = vmatpush.msra.mxu0 %v7047_v30  ;;  %v7063_v45 = vld [vmem:[#allocation39_spill] sm:$0xff]  ;;  %7065 = vst [vmem:[#allocation67_spill] sm:$0xff] %v5668_v58  ;;  %v7070_v30 = vld [vmem:[#allocation36_spill] sm:$0xff] }
 0x40d   :  { %2023 = vmatpush.msra.mxu3 %v5630_v23  ;;  %1985 = vmatpush.msrb.mxu1 %v7044_v37  ;;  %v5675_v37 = vld [vmem:[#allocation7 + $0x40] sm:$0xff] }
 0x40e   :  { %2004 = vmatpush.msrb.mxu2 %v7042_v19  ;;  %2097 = vmatpush.msra.mxu0 %v7051_v24  ;;  %v5671_v19 = vld [vmem:[#allocation7 + $0x38] sm:$0xff]  ;;  %7068 = vst [vmem:[#allocation68_spill] sm:$0xff] %v5675_v37  ;;  %v5686_v24 = vld [vmem:[#allocation7 + $0x8] sm:$0xff] }
 0x40f   :  { %2024 = vmatpush.msra.mxu3 %v5636_v12  ;;  %1986 = vmatpush.msrb.mxu1 %v7048_v39  ;;  %7066 = vst [vmem:[#allocation17_spill] sm:$0xff] %v5671_v19  ;;  %v5682_v39 = vld [vmem:[#allocation7 + $0x28] sm:$0xff] }
 0x410   :  { %2005 = vmatpush.msrb.mxu2 %v7046_v53  ;;  %2098 = vmatpush.msra.mxu0 %v7055_v6  ;;  %v5678_v53 = vld [vmem:[#allocation7 + $0x20] sm:$0xff]  ;;  %7071 = vst [vmem:[#allocation110_spill] sm:$0xff] %v5682_v39  ;;  %v7076_v6 = vld [vmem:[#allocation32_spill] sm:$0xff] }
 0x411   :  { %2025 = vmatpush.msra.mxu3 %v5642_v4  ;;  %1987 = vmatpush.msrb.mxu1 %v7052_v16  ;;  %7069 = vst [vmem:[#allocation63_spill] sm:$0xff] %v5678_v53  ;;  %v5689_v16 = vld [vmem:[#allocation7 + $0x10] sm:$0xff] }
 0x412   :  { %2006 = vmatpush.msrb.mxu2 %v7050_v51  ;;  %2099 = vmatpush.msra.mxu0 %v7059_v7  ;;  %v7072_v51 = vld [vmem:[#allocation79_spill] sm:$0xff]  ;;  %7073 = vst [vmem:[#allocation52_spill] sm:$0xff] %v5686_v24  ;;  %v7079_v7 = vld [vmem:[#allocation42_spill] sm:$0xff] }
 0x413   :  { %2026 = vmatpush.msra.mxu3 %v5648_v46  ;;  %1988 = vmatpush.msrb.mxu1 %v7056_v48  ;;  %7074 = vst [vmem:[#allocation92_spill] sm:$0xff] %v5689_v16  ;;  %v7077_v48 = vld [vmem:[#allocation40_spill] sm:$0xff] }
 0x414   :  { %2007 = vmatpush.msrb.mxu2 %v7054_v31  ;;  %2100 = vmatpush.msra.mxu0 %v7063_v45  ;;  %v7075_v31 = vld [vmem:[#allocation29_spill] sm:$0xff]  ;;  %v7081_v45 = vld [vmem:[#allocation48_spill] sm:$0xff] }
 0x415   :  { %2027 = vmatpush.msra.mxu3 %v5654_v44  ;;  %1989 = vmatpush.msrb.mxu1 %v7060_v52  ;;  %v7080_v52 = vld [vmem:[#allocation43_spill] sm:$0xff] }
 0x416   :  { %2008 = vmatpush.msrb.mxu2 %v7058_v8  ;;  %v7078_v8 = vld [vmem:[#allocation41_spill] sm:$0xff] }
 0x417   :  { %2028 = vmatpush.msra.mxu3 %v5660_v43  ;;  %1990 = vmatpush.msrb.mxu1 %v7064_v2  ;;  %v7082_v2 = vld [vmem:[#allocation44_spill] sm:$0xff] }
 0x418   :  { %2009 = vmatpush.msrb.mxu2 %v5663_v28 }
 0x419   :  { %2029 = vmatpush.msra.mxu3 %v5668_v58  ;;  %1991 = vmatpush.msrb.mxu1 %v7067_v35  ;;  %v7083_v35 = vld [vmem:[#allocation111_spill] sm:$0xff] }
 0x41a   :  { %2010 = vmatpush.msrb.mxu2 %v5671_v19 }
 0x41b   :  { %2030 = vmatpush.msra.mxu3 %v5675_v37  ;;  %1992 = vmatpush.msrb.mxu1 %v7070_v30  ;;  %v7084_v30 = vld [vmem:[#allocation106_spill] sm:$0xff] }
 0x41c   :  { %2011 = vmatpush.msrb.mxu2 %v5678_v53 }
 0x41d   :  { %2031 = vmatpush.msra.mxu3 %v5682_v39  ;;  %2105 = vmatpush.msra.mxu1 %v7072_v51  ;;  %v7085_v51 = vld [vmem:[#allocation112_spill] sm:$0xff]  ;;  %v7092_v39 = vld [vmem:[#allocation81_spill] sm:$0xff] }
 0x41e   :  { %2012 = vmatpush.msrb.mxu2 %v5686_v24 }
 0x41f   :  { %2032 = vmatpush.msra.mxu3 %v5689_v16  ;;  %2106 = vmatpush.msra.mxu1 %v7075_v31  ;;  %v7086_v31 = vld [vmem:[#allocation113_spill] sm:$0xff] }
 0x420   :  { %v7090_v16 = vld [vmem:[#allocation85_spill] sm:$0xff] }
 0x421   :  { %2107 = vmatpush.msra.mxu1 %v7076_v6  ;;  %v7087_v6 = vld [vmem:[#allocation114_spill] sm:$0xff] }
 0x423   :  { %2108 = vmatpush.msra.mxu1 %v7077_v48  ;;  %v7088_v48 = vld [vmem:[#allocation115_spill] sm:$0xff] }
 0x425   :  { %2109 = vmatpush.msra.mxu1 %v7078_v8  ;;  %v7089_v8 = vld [vmem:[#allocation49_spill] sm:$0xff] }
 0x427   :  { %2110 = vmatpush.msra.mxu1 %v7079_v7 }
 0x429   :  { %2111 = vmatpush.msra.mxu1 %v7080_v52 }
 0x42b   :  { %2112 = vmatpush.msra.mxu1 %v7081_v45 }
 0x42d   :  { %2113 = vmatpush.msra.mxu1 %v7082_v2  ;;  %v7091_v2 = vld [vmem:[#allocation98_spill] sm:$0xff] }
 0x42f   :  { %2114 = vmatpush.msra.mxu1 %v7083_v35  ;;  %v367_v35 = vadd.f32 %v7092_v39, %v7091_v2 }
 0x431   :  { %2115 = vmatpush.msra.mxu1 %v7084_v30 }
 0x433   :  { %2116 = vmatpush.msra.mxu1 %v7085_v51 }
 0x435   :  { %2117 = vmatpush.msra.mxu1 %v7086_v31  ;;  %v7093_v31 = vld [vmem:[#allocation20_spill] sm:$0xff] }
 0x437   :  { %2118 = vmatpush.msra.mxu1 %v7087_v6 }
 0x439   :  { %2119 = vmatpush.msra.mxu1 %v7088_v48 }
 0x43b   :  { %2120 = vmatpush.msra.mxu1 %v7089_v8 }
 0x44d   :  { %v1718_v7 = vpop.f32.mrf.mxu0 }
 0x458   :  { %v1658_v52 = vpop.f32.mrf.mxu1 }
 0x459   :  { %v1659_v45 = vadd.f32 %v1658_v52, %v7090_v16  ;;  %v7094_v16 = vld [vmem:[#allocation78_spill] sm:$0xff] }
 0x45a   :  { %v1846_v24 = vpop.f32.mrf.mxu0 }
 0x45b   :  { %v1761_v53 = vadd.f32 %v1718_v7, %v1659_v45  ;;  %v1889_v30 = vadd.f32 %v1846_v24, %v367_v35 }
 0x45d   :  { %v2739_v37 = vmul.f32 -1.442695, %v1761_v53  ;;  %v2742_v58 = vmul.f32 -1.442695, %v1889_v30 }
 0x45f   :  { %v1678_v51 = vpop.f32.mrf.mxu2  ;;  %2856 = vpow2.f32 %v2739_v37  ;;  %v1698_v6 = vpop.f32.mrf.mxu3 }
 0x460   :  { %v1679_v19 = vadd.f32 %v1678_v51, %v7093_v31  ;;  %2858 = vpow2.f32 %v2742_v58 }
 0x461   :  { %v1738_v48 = vpop.f32.mrf.mxu1 }
 0x462   :  { %v1781_v28 = vadd.f32 %v1738_v48, %v1679_v19 }
 0x464   :  { %v2740_v8 = vmul.f32 -1.442695, %v1781_v28 }
 0x465   :  { %v2857_v43 = vpop.eup %2856 }
 0x466   :  { %v1765_v44 = vadd.f32 1.0, %v2857_v43  ;;  %2860 = vpow2.f32 %v2740_v8  ;;  %v2859_v7 = vpop.eup %2858 }
 0x467   :  { %v5712_v45 = vadd.f32 1.0, %v2859_v7  ;;  %v1758_v48 = vpop.f32.mrf.mxu2 }
 0x468   :  { %v1826_v52 = vpop.f32.mrf.mxu3  ;;  %2862 = vrcp.f32 %v1765_v44  ;;  %v1777_v58 = vand.u32 2147483648, %v1765_v44  ;;  %v1775_v51 = vand.u32 2147483647, %v1765_v44  ;;  %vm1771_vm10 = vweird.f32 %v1765_v44 }
 0x469   :  { %v1869_v39 = vadd.f32 %v1826_v52, %v7094_v16  ;;  %vm1899_vm6 = vweird.f32 %v5712_v45 }
 0x46a   :  { %v1778_v7 = vor.u32 1.1754944e-38, %v1777_v58  ;;  %vm1776_vm12 = vcmp.eq.f32.partialorder %v1775_v51, 8.507059e+37 }
 0x46b   :  { %v2741_v24 = vmul.f32 -1.442695, %v1869_v39 }
 0x46c   :  { %v2861_v53 = vpop.eup %2860 }
 0x46d   :  { %v1785_v37 = vadd.f32 1.0, %v2861_v53  ;;  %2864 = vpow2.f32 %v2741_v24 }
 0x46e   :  { %v2863_v35 = vpop.eup %2862 }
 0x46f   :  { %2866 = vrcp.f32 %v1785_v37  ;;  %v1767_v30 = vmul.f32 %v2863_v35, %v1765_v44  ;;  %vm1772_vm9 = vweird.f32 %v2863_v35  ;;  %v1797_v2 = vand.u32 2147483648, %v1785_v37 }
 0x470   :  { %2868 = vrcp.f32 %v5712_v45  ;;  %vm1773_vm11 = vmor %vm1771_vm10, %vm1772_vm9  ;;  %vm1791_vm14 = vweird.f32 %v1785_v37 }
 0x471   :  { %v1768_v28 = vsub.f32 1.0, %v1767_v30  ;;  %v5720_v30 = vld [vmem:[%s6189_s8] ss:$0 sm:$0xff] }
 0x472   :  { %7095 = vst [vmem:[#allocation15_spill] sm:$0xff] %v5720_v30 }
 0x473   :  { %v2865_v43 = vpop.eup %2864  ;;  %v1769_v19 = vmul.f32 %v2863_v35, %v1768_v28  ;;  %v1801_v28 = vadd.f32 %v5720_v30, %v1758_v48  ;;  %v1798_v48 = vor.u32 1.1754944e-38, %v1797_v2 }
 0x474   :  { %v1873_v16 = vadd.f32 1.0, %v2865_v43 }
 0x475   :  { %v2867_v8 = vpop.eup %2866  ;;  %v1770_v52 = vadd.f32 %v2863_v35, %v1769_v19  ;;  %v1699_v19 = vadd.f32 %v1698_v6, %v6998_v26 }
 0x476   :  { %v1787_v39 = vmul.f32 %v2867_v8, %v1785_v37  ;;  %2870 = vrcp.f32 %v1873_v16  ;;  %v5715_v24 = vpop.eup %2868  ;;  %vm1792_vm13 = vweird.f32 %v2867_v8  ;;  %v1883_v26 = vand.u32 2147483647, %v1873_v16 }
 0x477   :  { %v1774_v53 = vsel %vm1773_vm11, %v2863_v35, %v1770_v52  ;;  %v1895_v58 = vmul.f32 %v5715_v24, %v5712_v45  ;;  %v1795_v35 = vand.u32 2147483647, %v1785_v37  ;;  %vm1793_vm15 = vmor %vm1791_vm14, %vm1792_vm13  ;;  %vm1879_vm2 = vweird.f32 %v1873_v16 }
 0x478   :  { %v1788_v31 = vsub.f32 1.0, %v1787_v39  ;;  %v1779_v43 = vsel %vm1776_vm12, %v1778_v7, %v1774_v53  ;;  %vm1884_vm4 = vcmp.eq.f32.partialorder %v1883_v26, 8.507059e+37  ;;  %vm1900_vm5 = vweird.f32 %v5715_v24 }
 0x479   :  { %v1802_v44 = vmul.f32 %v1801_v28, %v1779_v43  ;;  %v1896_v39 = vsub.f32 1.0, %v1895_v58  ;;  %vm1796_vm0 = vcmp.eq.f32.partialorder %v1795_v35, 8.507059e+37  ;;  %v1885_v28 = vand.u32 2147483648, %v1873_v16  ;;  %v1866_v30 = vpop.f32.mrf.mxu1  ;;  %vm1901_vm7 = vmor %vm1899_vm6, %vm1900_vm5 }
 0x47a   :  { %v1789_v46 = vmul.f32 %v2867_v8, %v1788_v31 }
 0x47b   :  { %v1803_v51 = vadd.f32 %v1802_v44, %v1699_v19  ;;  %v1897_v31 = vmul.f32 %v5715_v24, %v1896_v39 }
 0x47c   :  { %v2871_v52 = vpop.eup %2870  ;;  %v1790_v4 = vadd.f32 %v2867_v8, %v1789_v46  ;;  %v1886_v46 = vor.u32 1.1754944e-38, %v1885_v28  ;;  %v5746_v28 = vld [vmem:[#allocation5 + $0x148] sm:$0xff] }
 0x47d   :  { %2872 = vtanh.f32 %v1803_v51  ;;  %v1875_v12 = vmul.f32 %v2871_v52, %v1873_v16  ;;  %vm1880_vm1 = vweird.f32 %v2871_v52  ;;  %v1905_v16 = vand.u32 2147483648, %v5712_v45 }
 0x47e   :  { %v1794_v7 = vsel %vm1793_vm15, %v2867_v8, %v1790_v4  ;;  %vm1881_vm3 = vmor %vm1879_vm2, %vm1880_vm1  ;;  %v1898_v8 = vadd.f32 %v5715_v24, %v1897_v31 }
 0x47f   :  { %v1876_v6 = vsub.f32 1.0, %v1875_v12  ;;  %v1799_v53 = vsel %vm1796_vm0, %v1798_v48, %v1794_v7  ;;  %v1909_v12 = vadd.f32 %v5470_v41, %v1866_v30  ;;  %v7096_v48 = vld [vmem:[#allocation18_spill] sm:$0xff]  ;;  %v5739_v41 = vld [vmem:[#allocation5 + $0x178] sm:$0xff] }
 0x480   :  { %v1805_v19 = vsub.f32 1.0, %v1799_v53  ;;  %v1807_v2 = vmul.f32 %v1799_v53, %v5480_v20  ;;  %v408_v39 = vadd.f32 %v7096_v48, %v6999_v32  ;;  %v1903_v20 = vand.u32 2147483647, %v5712_v45  ;;  %v5847_v48 = vld [vmem:[#allocation5 + $0x10] sm:$0xff] }
 0x481   :  { %v1877_v43 = vmul.f32 %v2871_v52, %v1876_v6  ;;  %v1902_v30 = vsel %vm1901_vm7, %v5715_v24, %v1898_v8  ;;  %v5743_v6 = vld [vmem:[#allocation5 + $0x160] sm:$0xff]  ;;  %v5815_v8 = vld [vmem:[#allocation5 + $0xf0] sm:$0xff]  ;;  %7099 = vst [vmem:[#allocation51_spill] sm:$0xff] %v5847_v48 }
 0x482   :  { %vm1904_vm8 = vcmp.eq.f32.partialorder %v1903_v20, 8.507059e+37  ;;  %v5869_v20 = vld [vmem:[#allocation5 + $0x60] sm:$0xff] }
 0x483   :  { %v2873_v44 = vpop.eup %2872  ;;  %v1878_v37 = vadd.f32 %v2871_v52, %v1877_v43 }
 0x484   :  { %v1806_v51 = vmul.f32 %v2873_v44, %v1805_v19  ;;  %v5776_v44 = vld [vmem:[#allocation5 + $0x158] sm:$0xff] }
 0x485   :  { %v1882_v4 = vsel %vm1881_vm3, %v2871_v52, %v1878_v37  ;;  %v1906_v52 = vor.u32 1.1754944e-38, %v1905_v16  ;;  %v5780_v37 = vld [vmem:[#allocation2 + $0x148] sm:$0xff]  ;;  %v5858_v16 = vld [vmem:[#allocation2 + $0x70] sm:$0xff] }
 0x486   :  { %v1887_v58 = vsel %vm1884_vm4, %v1886_v46, %v1882_v4  ;;  %v5731_v35 = vadd.f32 %v1807_v2, %v1806_v51  ;;  %v5783_v46 = vld [vmem:[#allocation5 + $0x138] sm:$0xff]  ;;  %v5790_v51 = vld [vmem:[#allocation2 + $0x130] sm:$0xff]  ;;  %v5799_v2 = vld [vmem:[#allocation5 + $0x120] sm:$0xff] }
 0x487   :  { %v1910_v7 = vmul.f32 %v1909_v12, %v1887_v58  ;;  %v1907_v53 = vsel %vm1904_vm8, %v1906_v52, %v1902_v30  ;;  %v5807_v4 = vld [vmem:[#allocation5 + $0x108] sm:$0xff]  ;;  %v5840_v58 = vld [vmem:[#allocation2 + $0xa0] sm:$0xff]  ;;  %v5915_v30 = vld [vmem:[#allocation7 + $0x138] sm:$0xff] }
 0x488   :  { %1993 = vmatmul.f32.vlgmr.msrb.gmra.mxu1 %v5731_v35  ;;  %v1913_v45 = vsub.f32 1.0, %v1907_v53  ;;  %v1915_v24 = vmul.f32 %v1907_v53, %v5492_v56  ;;  %v5773_v56 = vld [vmem:[#allocation5 + $0x150] sm:$0xff]  ;;  %v5812_v12 = vld [vmem:[#allocation2 + $0xe8] sm:$0xff]  ;;  %7111 = vst [vmem:[#allocation62_spill] sm:$0xff] %v5915_v30  ;;  %v5919_v52 = vld [vmem:[#allocation7 + $0x140] sm:$0xff] }
 0x489   :  { %v1911_v26 = vadd.f32 %v1910_v7, %v408_v39  ;;  %2233 = vmatpush.msrb.mxu1 %v5739_v41  ;;  %v5850_v39 = vld [vmem:[#allocation2 + $0x88] sm:$0xff]  ;;  %v5866_v7 = vld [vmem:[#allocation2 + $0x58] sm:$0xff]  ;;  %7112 = vst [vmem:[#allocation80_spill] sm:$0xff] %v5919_v52  ;;  %v5922_v53 = vld [vmem:[#allocation7 + $0x120] sm:$0xff] }
 0x48a   :  { %7113 = vst [vmem:[#allocation102_spill] sm:$0xff] %v5922_v53 }
 0x48b   :  { %2874 = vtanh.f32 %v1911_v26  ;;  %2234 = vmatpush.msrb.mxu1 %v5743_v6  ;;  %v3260_v26 = vld [vmem:[#allocation2 + $0xf0] sm:$0xff] }
 0x48d   :  { %2235 = vmatpush.msrb.mxu1 %v5746_v28 }
 0x48f   :  { %2236 = vmatpush.msrb.mxu1 %v5139_v22  ;;  %v5760_v22 = vld [vmem:[#allocation2 + $0x178] sm:$0xff] }
 0x491   :  { %v2875_v43 = vpop.eup %2874  ;;  %2237 = vmatpush.msrb.mxu1 %v5149_v62  ;;  %v5763_v62 = vld [vmem:[#allocation5 + $0x168] sm:$0xff] }
 0x492   :  { %v1914_v31 = vmul.f32 %v2875_v43, %v1913_v45  ;;  %v3266_v45 = vld [vmem:[#allocation2 + $0xc0] sm:$0xff]  ;;  %v5929_v43 = vld [vmem:[#allocation7 + $0x108] sm:$0xff] }
 0x493   :  { %2238 = vmatpush.msrb.mxu1 %v5159_v29  ;;  %v5766_v29 = vld [vmem:[#allocation5 + $0x170] sm:$0xff]  ;;  %7115 = vst [vmem:[#allocation47_spill] sm:$0xff] %v5929_v43 }
 0x494   :  { %v5753_v19 = vadd.f32 %v1915_v24, %v1914_v31  ;;  %v3269_v31 = vld [vmem:[#allocation2 + $0xa8] sm:$0xff]  ;;  %v5936_v24 = vld [vmem:[#allocation7 + $0xf0] sm:$0xff] }
 0x495   :  { %2239 = vmatpush.msrb.mxu1 %v5169_v27  ;;  %v5770_v27 = vld [vmem:[#allocation2 + $0x160] sm:$0xff]  ;;  %7117 = vst [vmem:[#allocation82_spill] sm:$0xff] %v5936_v24 }
 0x496   :  { %1933 = vmatmul.f32.vlgmr.msra.gmra.mxu2 %v5753_v19  ;;  %1953 = vmatmul.f32.vlgmr.msrb.gmra.mxu3 %v5753_v19 }
 0x497   :  { %1973 = vmatmul.f32.vlgmr.msrb.gmra.mxu0 %v5753_v19  ;;  %2121 = vmatmul.f32.vlgmr.msra.gmra.mxu1 %v5753_v19 }
 0x498   :  { %2125 = vmatpush.msra.mxu2 %v5760_v22  ;;  %2193 = vmatpush.msrb.mxu3 %v5763_v62 }
 0x499   :  { %2213 = vmatpush.msrb.mxu0 %v5766_v29  ;;  %2240 = vmatpush.msrb.mxu1 %v5179_v54  ;;  %v5786_v54 = vld [vmem:[#allocation5 + $0x140] sm:$0xff] }
 0x49a   :  { %2126 = vmatpush.msra.mxu2 %v5770_v27  ;;  %2194 = vmatpush.msrb.mxu3 %v5773_v56 }
 0x49b   :  { %2214 = vmatpush.msrb.mxu0 %v5776_v44  ;;  %2241 = vmatpush.msrb.mxu1 %v5189_v0  ;;  %v5796_v0 = vld [vmem:[#allocation2 + $0x118] sm:$0xff] }
 0x49c   :  { %2127 = vmatpush.msra.mxu2 %v5780_v37  ;;  %2195 = vmatpush.msrb.mxu3 %v5783_v46 }
 0x49d   :  { %2215 = vmatpush.msrb.mxu0 %v5786_v54  ;;  %2242 = vmatpush.msrb.mxu1 %v5199_v1  ;;  %v5804_v1 = vld [vmem:[#allocation2 + $0x100] sm:$0xff] }
 0x49e   :  { %2128 = vmatpush.msra.mxu2 %v5790_v51  ;;  %2033 = vmatmul.f32.vlgmr.msra.gmra.mxu3 %v5731_v35 }
 0x49f   :  { %2013 = vmatmul.f32.vlgmr.msrb.gmra.mxu2 %v5731_v35  ;;  %2101 = vmatmul.f32.vlgmr.msra.gmra.mxu0 %v5753_v19 }
 0x4a0   :  { %2129 = vmatpush.msra.mxu2 %v5796_v0  ;;  %2196 = vmatpush.msrb.mxu3 %v5799_v2 }
 0x4a1   :  { %2216 = vmatpush.msrb.mxu0 %v5517_v11  ;;  %2243 = vmatpush.msrb.mxu1 %v5209_v21  ;;  %v5820_v21 = vld [vmem:[#allocation2 + $0xd0] sm:$0xff]  ;;  %v5823_v11 = vld [vmem:[#allocation5 + $0xd8] sm:$0xff] }
 0x4a2   :  { %2130 = vmatpush.msra.mxu2 %v5804_v1  ;;  %2197 = vmatpush.msrb.mxu3 %v5807_v4 }
 0x4a3   :  { %2217 = vmatpush.msrb.mxu0 %v5523_v25  ;;  %2244 = vmatpush.msrb.mxu1 %v5219_v49  ;;  %v5827_v49 = vld [vmem:[#allocation5 + $0x40] sm:$0xff]  ;;  %v5830_v25 = vld [vmem:[#allocation2 + $0xb8] sm:$0xff] }
 0x4a4   :  { %2131 = vmatpush.msra.mxu2 %v5812_v12  ;;  %2198 = vmatpush.msrb.mxu3 %v5815_v8  ;;  %7097 = vst [vmem:[#allocation70_spill] sm:$0xff] %v5827_v49 }
 0x4a5   :  { %2218 = vmatpush.msrb.mxu0 %v5529_v33  ;;  %2245 = vmatpush.msrb.mxu1 %v5229_v18  ;;  %v5833_v33 = vld [vmem:[#allocation5 + $0xc0] sm:$0xff]  ;;  %v5837_v18 = vld [vmem:[#allocation5 + $0x28] sm:$0xff] }
 0x4a6   :  { %2132 = vmatpush.msra.mxu2 %v5820_v21  ;;  %2199 = vmatpush.msrb.mxu3 %v5823_v11  ;;  %7098 = vst [vmem:[#allocation23_spill] sm:$0xff] %v5837_v18 }
 0x4a7   :  { %2219 = vmatpush.msrb.mxu0 %v5535_v63  ;;  %2246 = vmatpush.msrb.mxu1 %v5827_v49  ;;  %v5843_v63 = vld [vmem:[#allocation5 + $0xa8] sm:$0xff] }
 0x4a8   :  { %2133 = vmatpush.msra.mxu2 %v5830_v25  ;;  %2200 = vmatpush.msrb.mxu3 %v5833_v33 }
 0x4a9   :  { %2220 = vmatpush.msrb.mxu0 %v5541_v42  ;;  %2247 = vmatpush.msrb.mxu1 %v5837_v18  ;;  %v5853_v42 = vld [vmem:[#allocation5 + $0x90] sm:$0xff] }
 0x4aa   :  { %2134 = vmatpush.msra.mxu2 %v5840_v58  ;;  %2201 = vmatpush.msrb.mxu3 %v5843_v63 }
 0x4ab   :  { %2221 = vmatpush.msrb.mxu0 %v5547_v40  ;;  %2248 = vmatpush.msrb.mxu1 %v5847_v48  ;;  %v5861_v40 = vld [vmem:[#allocation5 + $0x78] sm:$0xff] }
 0x4ac   :  { %2135 = vmatpush.msra.mxu2 %v5850_v39  ;;  %2202 = vmatpush.msrb.mxu3 %v5853_v42 }
 0x4ad   :  { %2222 = vmatpush.msrb.mxu0 %v5553_v60  ;;  %2361 = vmatpush.msra.mxu1 %v7008_v50  ;;  %v5874_v60 = vld [vmem:[#allocation2 + $0x40] sm:$0xff]  ;;  %v5877_v50 = vld [vmem:[#allocation5 + $0x48] sm:$0xff] }
 0x4ae   :  { %2136 = vmatpush.msra.mxu2 %v5858_v16  ;;  %2203 = vmatpush.msrb.mxu3 %v5861_v40  ;;  %7100 = vst [vmem:[#allocation95_spill] sm:$0xff] %v5874_v60 }
 0x4af   :  { %2223 = vmatpush.msrb.mxu0 %v5559_v36  ;;  %2362 = vmatpush.msra.mxu1 %v7011_v57  ;;  %7101 = vst [vmem:[#allocation72_spill] sm:$0xff] %v5877_v50  ;;  %v5882_v36 = vld [vmem:[#allocation2 + $0x28] sm:$0xff]  ;;  %v5885_v57 = vld [vmem:[#allocation5 + $0x30] sm:$0xff] }
 0x4b0   :  { %2137 = vmatpush.msra.mxu2 %v5866_v7  ;;  %2204 = vmatpush.msrb.mxu3 %v5869_v20  ;;  %7102 = vst [vmem:[#allocation88_spill] sm:$0xff] %v5882_v36 }
 0x4b1   :  { %2224 = vmatpush.msrb.mxu0 %v5565_v47  ;;  %2363 = vmatpush.msra.mxu1 %v7014_v55  ;;  %7103 = vst [vmem:[#allocation65_spill] sm:$0xff] %v5885_v57  ;;  %v5890_v47 = vld [vmem:[#allocation2 + $0x10] sm:$0xff]  ;;  %v5893_v55 = vld [vmem:[#allocation5 + $0x18] sm:$0xff] }
 0x4b2   :  { %2138 = vmatpush.msra.mxu2 %v5874_v60  ;;  %2205 = vmatpush.msrb.mxu3 %v5877_v50  ;;  %7104 = vst [vmem:[#allocation97_spill] sm:$0xff] %v5890_v47 }
 0x4b3   :  { %2225 = vmatpush.msrb.mxu0 %v5571_v5  ;;  %2364 = vmatpush.msra.mxu1 %v7017_v17  ;;  %7105 = vst [vmem:[#allocation89_spill] sm:$0xff] %v5893_v55  ;;  %v5898_v5 = vld [vmem:[#allocation7 + $0x168] sm:$0xff]  ;;  %v5901_v17 = vld [vmem:[#allocation5] sm:$0xff] }
 0x4b4   :  { %2139 = vmatpush.msra.mxu2 %v5882_v36  ;;  %2206 = vmatpush.msrb.mxu3 %v5885_v57  ;;  %7106 = vst [vmem:[#allocation74_spill] sm:$0xff] %v5898_v5 }
 0x4b5   :  { %2226 = vmatpush.msrb.mxu0 %v5577_v14  ;;  %2365 = vmatpush.msra.mxu1 %v7025_v34  ;;  %7107 = vst [vmem:[#allocation24_spill] sm:$0xff] %v5901_v17  ;;  %v5904_v14 = vld [vmem:[#allocation7 + $0x170] sm:$0xff] }
 0x4b6   :  { %2140 = vmatpush.msra.mxu2 %v5890_v47  ;;  %2207 = vmatpush.msrb.mxu3 %v5893_v55  ;;  %7108 = vst [vmem:[#allocation90_spill] sm:$0xff] %v5904_v14  ;;  %v5908_v34 = vld [vmem:[#allocation7 + $0x150] sm:$0xff]  ;;  %v7153_v55 = vld [vmem:[#allocation15_spill] sm:$0xff] }
 0x4b7   :  { %2141 = vmatmul.f32.vlgmr.msra.gmra.mxu2 %v5753_v19  ;;  %2227 = vmatpush.msrb.mxu0 %v5584_v61  ;;  %7109 = vst [vmem:[#allocation100_spill] sm:$0xff] %v5908_v34  ;;  %v5912_v61 = vld [vmem:[#allocation7 + $0x158] sm:$0xff] }
 0x4b8   :  { %2253 = vmatpush.msrb.mxu2 %v5898_v5  ;;  %2208 = vmatpush.msrb.mxu3 %v5901_v17  ;;  %7110 = vst [vmem:[#allocation76_spill] sm:$0xff] %v5912_v61 }
 0x4b9   :  { %2228 = vmatpush.msrb.mxu0 %v5590_v59  ;;  %2366 = vmatpush.msra.mxu1 %v3260_v26  ;;  %v3263_v59 = vld [vmem:[#allocation2 + $0xd8] sm:$0xff]  ;;  %v3272_v26 = vld [vmem:[#allocation2 + $0x90] sm:$0xff] }
 0x4ba   :  { %2273 = vmatpush.msra.mxu3 %v5904_v14  ;;  %2254 = vmatpush.msrb.mxu2 %v5908_v34  ;;  %v7152_v34 = vld [vmem:[#allocation20_spill] sm:$0xff] }
 0x4bb   :  { %2293 = vmatpush.msra.mxu0 %v5594_v13  ;;  %2367 = vmatpush.msra.mxu1 %v3263_v59  ;;  %v5926_v13 = vld [vmem:[#allocation7 + $0x128] sm:$0xff]  ;;  %v5943_v59 = vld [vmem:[#allocation7 + $0xd8] sm:$0xff] }
 0x4bc   :  { %2274 = vmatpush.msra.mxu3 %v5912_v61  ;;  %2255 = vmatpush.msrb.mxu2 %v5915_v30  ;;  %7114 = vst [vmem:[#allocation46_spill] sm:$0xff] %v5926_v13 }
 0x4bd   :  { %2294 = vmatpush.msra.mxu0 %v5600_v15  ;;  %2368 = vmatpush.msra.mxu1 %v3266_v45  ;;  %v5933_v15 = vld [vmem:[#allocation7 + $0x110] sm:$0xff]  ;;  %7119 = vst [vmem:[#allocation96_spill] sm:$0xff] %v5943_v59  ;;  %v3275_v45 = vld [vmem:[#allocation2 + $0x78] sm:$0xff] }
 0x4be   :  { %2275 = vmatpush.msra.mxu3 %v5919_v52  ;;  %2256 = vmatpush.msrb.mxu2 %v5922_v53  ;;  %7116 = vst [vmem:[#allocation86_spill] sm:$0xff] %v5933_v15 }
 0x4bf   :  { %2295 = vmatpush.msra.mxu0 %v5606_v38  ;;  %2369 = vmatpush.msra.mxu1 %v3269_v31  ;;  %v5940_v38 = vld [vmem:[#allocation7 + $0xf8] sm:$0xff]  ;;  %v5950_v31 = vld [vmem:[#allocation7 + $0xc0] sm:$0xff] }
 0x4c0   :  { %2276 = vmatpush.msra.mxu3 %v5926_v13  ;;  %2257 = vmatpush.msrb.mxu2 %v5929_v43  ;;  %7118 = vst [vmem:[#allocation26_spill] sm:$0xff] %v5940_v38  ;;  %v7149_v13 = vld [vmem:[#allocation54_spill] sm:$0xff] }
 0x4c1   :  { %2296 = vmatpush.msra.mxu0 %v5612_v10  ;;  %2370 = vmatpush.msra.mxu1 %v3272_v26  ;;  %v5947_v10 = vld [vmem:[#allocation7 + $0xe0] sm:$0xff]  ;;  %7121 = vst [vmem:[#allocation28_spill] sm:$0xff] %v5950_v31 }
 0x4c2   :  { %2277 = vmatpush.msra.mxu3 %v5933_v15  ;;  %2258 = vmatpush.msrb.mxu2 %v5936_v24  ;;  %7120 = vst [vmem:[#allocation84_spill] sm:$0xff] %v5947_v10  ;;  %v3278_v26 = vld [vmem:[#allocation2 + $0x60] sm:$0xff] }
 0x4c3   :  { %2297 = vmatpush.msra.mxu0 %v5618_v3  ;;  %2371 = vmatpush.msra.mxu1 %v3275_v45  ;;  %v5954_v3 = vld [vmem:[#allocation7 + $0xc8] sm:$0xff]  ;;  %v3297_v15 = vld [vmem:[#allocation2 + $0x140] sm:$0xff] }
 0x4c4   :  { %2278 = vmatpush.msra.mxu3 %v5940_v38  ;;  %2259 = vmatpush.msrb.mxu2 %v5943_v59  ;;  %7122 = vst [vmem:[#allocation69_spill] sm:$0xff] %v5954_v3  ;;  %v5957_v38 = vld [vmem:[#allocation7 + $0xa8] sm:$0xff]  ;;  %v5995_v59 = vld [vmem:[#allocation7 + $0x18] sm:$0xff]  ;;  %v3301_v24 = vld [vmem:[#allocation2 + $0xe0] sm:$0xff] }
 0x4c5   :  { %2298 = vmatpush.msra.mxu0 %v5624_v9  ;;  %2372 = vmatpush.msra.mxu1 %v3278_v26  ;;  %7123 = vst [vmem:[#allocation53_spill] sm:$0xff] %v5957_v38  ;;  %v7124_v9 = vld [vmem:[#allocation60_spill] sm:$0xff]  ;;  %v3281_v45 = vld [vmem:[#allocation2 + $0x48] sm:$0xff] }
 0x4c6   :  { %2279 = vmatpush.msra.mxu3 %v5947_v10  ;;  %2260 = vmatpush.msrb.mxu2 %v5950_v31  ;;  %v5961_v10 = vld [vmem:[#allocation7 + $0xb0] sm:$0xff]  ;;  %7141 = vst [vmem:[#allocation107_spill] sm:$0xff] %v5995_v59 }
 0x4c7   :  { %2299 = vmatpush.msra.mxu0 %v5630_v23  ;;  %7125 = vst [vmem:[#allocation30_spill] sm:$0xff] %v5961_v10  ;;  %2373 = vmatpush.msra.mxu1 %v3281_v45  ;;  %v5964_v31 = vld [vmem:[#allocation7 + $0x90] sm:$0xff]  ;;  %v7127_v23 = vld [vmem:[#allocation77_spill] sm:$0xff] }
 0x4c8   :  { %2280 = vmatpush.msra.mxu3 %v5954_v3  ;;  %2261 = vmatpush.msrb.mxu2 %v5957_v38  ;;  %7126 = vst [vmem:[#allocation103_spill] sm:$0xff] %v5964_v31  ;;  %v5968_v3 = vld [vmem:[#allocation7 + $0x98] sm:$0xff]  ;;  %v3284_v26 = vld [vmem:[#allocation2 + $0x30] sm:$0xff] }
 0x4c9   :  { %2300 = vmatpush.msra.mxu0 %v7124_v9  ;;  %7128 = vst [vmem:[#allocation55_spill] sm:$0xff] %v5968_v3  ;;  %2374 = vmatpush.msra.mxu1 %v3284_v26  ;;  %v5971_v38 = vld [vmem:[#allocation7 + $0x78] sm:$0xff]  ;;  %v7130_v9 = vld [vmem:[#allocation58_spill] sm:$0xff] }
 0x4ca   :  { %2281 = vmatpush.msra.mxu3 %v5961_v10  ;;  %2262 = vmatpush.msrb.mxu2 %v5964_v31  ;;  %7129 = vst [vmem:[#allocation45_spill] sm:$0xff] %v5971_v38  ;;  %v5975_v10 = vld [vmem:[#allocation7 + $0x80] sm:$0xff]  ;;  %v3287_v45 = vld [vmem:[#allocation2 + $0x18] sm:$0xff] }
 0x4cb   :  { %2301 = vmatpush.msra.mxu0 %v7127_v23  ;;  %7131 = vst [vmem:[#allocation75_spill] sm:$0xff] %v5975_v10  ;;  %2375 = vmatpush.msra.mxu1 %v3287_v45  ;;  %v5978_v31 = vld [vmem:[#allocation7 + $0x60] sm:$0xff]  ;;  %v7133_v23 = vld [vmem:[#allocation16_spill] sm:$0xff] }
 0x4cc   :  { %2282 = vmatpush.msra.mxu3 %v5968_v3  ;;  %2263 = vmatpush.msrb.mxu2 %v5971_v38  ;;  %7132 = vst [vmem:[#allocation57_spill] sm:$0xff] %v5978_v31  ;;  %v5982_v3 = vld [vmem:[#allocation7 + $0x68] sm:$0xff]  ;;  %v3290_v26 = vld [vmem:[#allocation2] sm:$0xff]  ;;  %v5990_v45 = vld [vmem:[#allocation7 + $0x30] sm:$0xff] }
 0x4cd   :  { %2302 = vmatpush.msra.mxu0 %v7130_v9  ;;  %7134 = vst [vmem:[#allocation50_spill] sm:$0xff] %v5982_v3  ;;  %2376 = vmatpush.msra.mxu1 %v3290_v26  ;;  %v5985_v38 = vld [vmem:[#allocation7 + $0x48] sm:$0xff]  ;;  %v7136_v9 = vld [vmem:[#allocation61_spill] sm:$0xff]  ;;  %v7142_v26 = vld [vmem:[#allocation68_spill] sm:$0xff] }
 0x4ce   :  { %2283 = vmatpush.msra.mxu3 %v5975_v10  ;;  %2264 = vmatpush.msrb.mxu2 %v5978_v31  ;;  %7135 = vst [vmem:[#allocation25_spill] sm:$0xff] %v5985_v38  ;;  %v7137_v10 = vld [vmem:[#allocation22_spill] sm:$0xff]  ;;  %v7139_v31 = vld [vmem:[#allocation67_spill] sm:$0xff] }
 0x4cf   :  { %2303 = vmatpush.msra.mxu0 %v7133_v23  ;;  %7138 = vst [vmem:[#allocation59_spill] sm:$0xff] %v5990_v45  ;;  %v7140_v23 = vld [vmem:[#allocation17_spill] sm:$0xff] }
 0x4d0   :  { %2284 = vmatpush.msra.mxu3 %v5982_v3  ;;  %2265 = vmatpush.msrb.mxu2 %v5985_v38  ;;  %v7143_v3 = vld [vmem:[#allocation63_spill] sm:$0xff]  ;;  %v6000_v38 = vld [vmem:[#allocation7] sm:$0xff] }
 0x4d1   :  { %2304 = vmatpush.msra.mxu0 %v7136_v9  ;;  %7144 = vst [vmem:[#allocation31_spill] sm:$0xff] %v6000_v38  ;;  %v3295_v9 = vld [vmem:[#allocation2 + $0x170] sm:$0xff] }
 0x4d2   :  { %2285 = vmatpush.msra.mxu3 %v7137_v10  ;;  %2266 = vmatpush.msrb.mxu2 %v5990_v45  ;;  %v7145_v10 = vld [vmem:[#allocation110_spill] sm:$0xff]  ;;  %v7146_v45 = vld [vmem:[#allocation52_spill] sm:$0xff] }
 0x4d3   :  { %2305 = vmatpush.msra.mxu0 %v7139_v31  ;;  %v7147_v31 = vld [vmem:[#allocation92_spill] sm:$0xff] }
 0x4d4   :  { %2286 = vmatpush.msra.mxu3 %v7140_v23  ;;  %2267 = vmatpush.msrb.mxu2 %v5995_v59  ;;  %v3296_v23 = vld [vmem:[#allocation2 + $0x158] sm:$0xff]  ;;  %v3298_v59 = vld [vmem:[#allocation2 + $0x128] sm:$0xff] }
 0x4d5   :  { %2306 = vmatpush.msra.mxu0 %v7142_v26  ;;  %v3299_v26 = vld [vmem:[#allocation2 + $0x110] sm:$0xff] }
 0x4d6   :  { %2287 = vmatpush.msra.mxu3 %v7143_v3  ;;  %2268 = vmatpush.msrb.mxu2 %v6000_v38  ;;  %v3300_v3 = vld [vmem:[#allocation2 + $0xf8] sm:$0xff]  ;;  %v3302_v38 = vld [vmem:[#allocation2 + $0xc8] sm:$0xff] }
 0x4d7   :  { %2307 = vmatpush.msra.mxu0 %v7145_v10  ;;  %v3303_v10 = vld [vmem:[#allocation2 + $0xb0] sm:$0xff] }
 0x4d8   :  { %2381 = vmatpush.msra.mxu2 %v3295_v9  ;;  %2288 = vmatpush.msra.mxu3 %v7146_v45  ;;  %v3304_v9 = vld [vmem:[#allocation2 + $0x98] sm:$0xff]  ;;  %v3305_v45 = vld [vmem:[#allocation2 + $0x80] sm:$0xff] }
 0x4d9   :  { %2308 = vmatpush.msra.mxu0 %v7147_v31  ;;  %v3306_v31 = vld [vmem:[#allocation2 + $0x68] sm:$0xff] }
 0x4da   :  { %2382 = vmatpush.msra.mxu2 %v3296_v23  ;;  %v3307_v23 = vld [vmem:[#allocation2 + $0x50] sm:$0xff] }
 0x4dc   :  { %2383 = vmatpush.msra.mxu2 %v3297_v15  ;;  %v3308_v15 = vld [vmem:[#allocation2 + $0x38] sm:$0xff] }
 0x4de   :  { %2384 = vmatpush.msra.mxu2 %v3298_v59  ;;  %v3309_v59 = vld [vmem:[#allocation2 + $0x20] sm:$0xff] }
 0x4e0   :  { %2385 = vmatpush.msra.mxu2 %v3299_v26  ;;  %v3310_v26 = vld [vmem:[#allocation2 + $0x8] sm:$0xff] }
 0x4e2   :  { %2386 = vmatpush.msra.mxu2 %v3300_v3 }
 0x4e4   :  { %2387 = vmatpush.msra.mxu2 %v3301_v24  ;;  %v7148_v24 = vld [vmem:[#allocation98_spill] sm:$0xff] }
 0x4e6   :  { %2388 = vmatpush.msra.mxu2 %v3302_v38  ;;  %v370_v38 = vadd.f32 %v7149_v13, %v7148_v24 }
 0x4e8   :  { %2389 = vmatpush.msra.mxu2 %v3303_v10 }
 0x4ea   :  { %2390 = vmatpush.msra.mxu2 %v3304_v9 }
 0x4ec   :  { %2391 = vmatpush.msra.mxu2 %v3305_v45 }
 0x4ee   :  { %2392 = vmatpush.msra.mxu2 %v3306_v31  ;;  %v7150_v31 = vld [vmem:[#allocation85_spill] sm:$0xff] }
 0x4f0   :  { %2393 = vmatpush.msra.mxu2 %v3307_v23 }
 0x4f2   :  { %2394 = vmatpush.msra.mxu2 %v3308_v15  ;;  %v7151_v15 = vld [vmem:[#allocation87_spill] sm:$0xff] }
 0x4f4   :  { %2395 = vmatpush.msra.mxu2 %v3309_v59 }
 0x4f6   :  { %2396 = vmatpush.msra.mxu2 %v3310_v26 }
 0x505   :  { %v1994_v3 = vpop.f32.mrf.mxu1 }
 0x514   :  { %v6008_v43 = vpop.f32.mrf.mxu0  ;;  %v2122_v10 = vpop.f32.mrf.mxu1 }
 0x515   :  { %v2165_v9 = vadd.f32 %v2122_v10, %v370_v38 }
 0x517   :  { %v2746_v52 = vmul.f32 -1.442695, %v2165_v9 }
 0x519   :  { %2876 = vpow2.f32 %v2746_v52  ;;  %v1934_v45 = vpop.f32.mrf.mxu2  ;;  %v1954_v30 = vpop.f32.mrf.mxu3 }
 0x51a   :  { %v1935_v53 = vadd.f32 %v1934_v45, %v7150_v31  ;;  %v1955_v13 = vadd.f32 %v1954_v30, %v7152_v34 }
 0x51c   :  { %v2037_v23 = vadd.f32 %v1994_v3, %v1935_v53  ;;  %v2102_v61 = vpop.f32.mrf.mxu0 }
 0x51d   :  { %v2145_v48 = vadd.f32 %v2102_v61, %v7151_v15 }
 0x51e   :  { %v2743_v59 = vmul.f32 -1.442695, %v2037_v23 }
 0x51f   :  { %v2877_v26 = vpop.eup %2876  ;;  %v2745_v14 = vmul.f32 -1.442695, %v2145_v48 }
 0x520   :  { %2878 = vpow2.f32 %v2743_v59  ;;  %v6013_v24 = vadd.f32 1.0, %v2877_v26 }
 0x521   :  { %2880 = vpow2.f32 %v2745_v14 }
 0x522   :  { %v2014_v38 = vpop.f32.mrf.mxu2  ;;  %2882 = vrcp.f32 %v6013_v24  ;;  %vm2175_vm4 = vweird.f32 %v6013_v24 }
 0x523   :  { %v2057_v10 = vadd.f32 %v2014_v38, %v1955_v13  ;;  %v2034_v38 = vpop.f32.mrf.mxu3 }
 0x524   :  { %v2077_v49 = vadd.f32 %v7153_v55, %v2034_v38 }
 0x525   :  { %v2744_v52 = vmul.f32 -1.442695, %v2057_v10 }
 0x526   :  { %v2879_v9 = vpop.eup %2878 }
 0x527   :  { %v2881_v53 = vpop.eup %2880  ;;  %v2041_v3 = vadd.f32 1.0, %v2879_v9  ;;  %2884 = vpow2.f32 %v2744_v52 }
 0x528   :  { %v2149_v61 = vadd.f32 1.0, %v2881_v53  ;;  %v6016_v45 = vpop.eup %2882 }
 0x529   :  { %2886 = vrcp.f32 %v2041_v3  ;;  %v2171_v15 = vmul.f32 %v6016_v45, %v6013_v24  ;;  %v2051_v10 = vand.u32 2147483647, %v2041_v3  ;;  %v2053_v52 = vand.u32 2147483648, %v2041_v3 }
 0x52a   :  { %2888 = vrcp.f32 %v2149_v61  ;;  %v2161_v31 = vand.u32 2147483648, %v2149_v61  ;;  %v2159_v18 = vand.u32 2147483647, %v2149_v61  ;;  %vm2047_vm11 = vweird.f32 %v2041_v3 }
 0x52b   :  { %v2172_v53 = vsub.f32 1.0, %v2171_v15  ;;  %vm2155_vm13 = vweird.f32 %v2149_v61  ;;  %vm2052_vm14 = vcmp.eq.f32.partialorder %v2051_v10, 8.507059e+37  ;;  %vm2176_vm2 = vweird.f32 %v6016_v45 }
 0x52c   :  { %vm2160_vm0 = vcmp.eq.f32.partialorder %v2159_v18, 8.507059e+37  ;;  %v7155_v18 = vld [vmem:[#allocation83_spill] sm:$0xff]  ;;  %vm2177_vm6 = vmor %vm2175_vm4, %vm2176_vm2 }
 0x52d   :  { %v2885_v48 = vpop.eup %2884 }
 0x52e   :  { %v6018_v23 = vadd.f32 1.0, %v2885_v48 }
 0x52f   :  { %v2887_v14 = vpop.eup %2886 }
 0x530   :  { %v2889_v30 = vpop.eup %2888  ;;  %2890 = vrcp.f32 %v6018_v23  ;;  %v2043_v59 = vmul.f32 %v2887_v14, %v2041_v3  ;;  %vm2048_vm9 = vweird.f32 %v2887_v14  ;;  %vm2067_vm3 = vweird.f32 %v6018_v23 }
 0x531   :  { %v2151_v26 = vmul.f32 %v2889_v30, %v2149_v61  ;;  %vm2156_vm10 = vweird.f32 %v2889_v30  ;;  %vm2049_vm12 = vmor %vm2047_vm11, %vm2048_vm9 }
 0x532   :  { %v2044_v13 = vsub.f32 1.0, %v2043_v59  ;;  %v2054_v59 = vor.u32 1.1754944e-38, %v2053_v52  ;;  %vm2157_vm15 = vmor %vm2155_vm13, %vm2156_vm10  ;;  %v2073_v52 = vand.u32 2147483648, %v6018_v23 }
 0x533   :  { %v2152_v9 = vsub.f32 1.0, %v2151_v26  ;;  %v2173_v26 = vmul.f32 %v6016_v45, %v2172_v53 }
 0x534   :  { %v2045_v34 = vmul.f32 %v2887_v14, %v2044_v13  ;;  %v2162_v13 = vor.u32 1.1754944e-38, %v2161_v31 }
 0x535   :  { %v2153_v48 = vmul.f32 %v2889_v30, %v2152_v9 }
 0x536   :  { %v2891_v17 = vpop.eup %2890  ;;  %v2046_v5 = vadd.f32 %v2887_v14, %v2045_v34  ;;  %v7154_v34 = vld [vmem:[#allocation21_spill] sm:$0xff] }
 0x537   :  { %v2063_v47 = vmul.f32 %v2891_v17, %v6018_v23  ;;  %v2154_v57 = vadd.f32 %v2889_v30, %v2153_v48  ;;  %v1975_v3 = vadd.f32 %v6008_v43, %v7154_v34  ;;  %vm2068_vm1 = vweird.f32 %v2891_v17 }
 0x538   :  { %v2050_v15 = vsel %vm2049_vm12, %v2887_v14, %v2046_v5  ;;  %v6032_v5 = vld [vmem:[%s6185_s4] ss:$0 sm:$0xff]  ;;  %vm2069_vm5 = vmor %vm2067_vm3, %vm2068_vm1  ;;  %v2074_v14 = vor.u32 1.1754944e-38, %v2073_v52 }
 0x539   :  { %v2064_v9 = vsub.f32 1.0, %v2063_v47  ;;  %v2055_v36 = vsel %vm2052_vm14, %v2054_v59, %v2050_v15  ;;  %v2158_v50 = vsel %vm2157_vm15, %v2889_v30, %v2154_v57  ;;  %v2071_v57 = vand.u32 2147483647, %v6018_v23 }
 0x53a   :  { %v2078_v38 = vmul.f32 %v2077_v49, %v2055_v36  ;;  %v2142_v55 = vpop.f32.mrf.mxu2  ;;  %v2163_v60 = vsel %vm2160_vm0, %v2162_v13, %v2158_v50  ;;  %v411_v47 = vadd.f32 %v7155_v18, %v6999_v32  ;;  %v2174_v49 = vadd.f32 %v6016_v45, %v2173_v26  ;;  %v7168_v18 = vld [vmem:[#allocation62_spill] sm:$0xff] }
 0x53b   :  { %v2065_v48 = vmul.f32 %v2891_v17, %v2064_v9  ;;  %v2185_v31 = vadd.f32 %v6032_v5, %v2142_v55  ;;  %v2181_v36 = vand.u32 2147483648, %v6013_v24  ;;  %v2179_v55 = vand.u32 2147483647, %v6013_v24 }
 0x53c   :  { %v2079_v50 = vadd.f32 %v2078_v38, %v1975_v3  ;;  %vm2072_vm7 = vcmp.eq.f32.partialorder %v2071_v57, 8.507059e+37  ;;  %v2178_v53 = vsel %vm2177_vm6, %v6016_v45, %v2174_v49  ;;  %v3335_v57 = vld [vmem:[#allocation7 + $0x178] sm:$0xff]  ;;  %v7170_v49 = vld [vmem:[#allocation76_spill] sm:$0xff] }
 0x53d   :  { %v2186_v43 = vmul.f32 %v2185_v31, %v2163_v60  ;;  %v2066_v61 = vadd.f32 %v2891_v17, %v2065_v48  ;;  %v2182_v26 = vor.u32 1.1754944e-38, %v2181_v36  ;;  %vm2180_vm8 = vcmp.eq.f32.partialorder %v2179_v55, 8.507059e+37  ;;  %v3334_v48 = vld [vmem:[#allocation5 + $0x8] sm:$0xff]  ;;  %v7167_v31 = vld [vmem:[#allocation90_spill] sm:$0xff] }
 0x53e   :  { %2892 = vtanh.f32 %v2079_v50  ;;  %v3336_v50 = vld [vmem:[#allocation7 + $0x160] sm:$0xff]  ;;  %v7173_v55 = vld [vmem:[#allocation47_spill] sm:$0xff] }
 0x53f   :  { %v2187_v30 = vadd.f32 %v2186_v43, %v411_v47  ;;  %v2070_v10 = vsel %vm2069_vm5, %v2891_v17, %v2066_v61  ;;  %v2183_v23 = vsel %vm2180_vm8, %v2182_v26, %v2178_v53  ;;  %v7169_v47 = vld [vmem:[#allocation51_spill] sm:$0xff]  ;;  %v7171_v36 = vld [vmem:[#allocation102_spill] sm:$0xff]  ;;  %v7172_v43 = vld [vmem:[#allocation80_spill] sm:$0xff] }
 0x540   :  { %v2075_v59 = vsel %vm2072_vm7, %v2074_v14, %v2070_v10  ;;  %v2189_v24 = vsub.f32 1.0, %v2183_v23  ;;  %v2191_v17 = vmul.f32 %v2183_v23, %v5753_v19  ;;  %v3316_v19 = vld [vmem:[#allocation5 + $0xf8] sm:$0xff]  ;;  %v3337_v61 = vld [vmem:[#allocation7 + $0x148] sm:$0xff]  ;;  %v7174_v14 = vld [vmem:[#allocation46_spill] sm:$0xff] }
 0x541   :  { %2894 = vtanh.f32 %v2187_v30  ;;  %v2081_v60 = vsub.f32 1.0, %v2075_v59  ;;  %v2083_v9 = vmul.f32 %v2075_v59, %v5731_v35  ;;  %v3312_v35 = vld [vmem:[#allocation5 + $0x128] sm:$0xff]  ;;  %v3338_v30 = vld [vmem:[#allocation7 + $0x130] sm:$0xff]  ;;  %v7175_v10 = vld [vmem:[#allocation82_spill] sm:$0xff] }
 0x542   :  { %v7176_v53 = vld [vmem:[#allocation86_spill] sm:$0xff]  ;;  %v3339_v59 = vld [vmem:[#allocation7 + $0x118] sm:$0xff]  ;;  %v7177_v26 = vld [vmem:[#allocation96_spill] sm:$0xff] }
 0x543   :  { %v7178_v23 = vld [vmem:[#allocation26_spill] sm:$0xff] }
 0x544   :  { %v2893_v15 = vpop.eup %2892 }
 0x545   :  { %v2082_v13 = vmul.f32 %v2893_v15, %v2081_v60  ;;  %v3340_v60 = vld [vmem:[#allocation7 + $0x100] sm:$0xff]  ;;  %v7179_v15 = vld [vmem:[#allocation28_spill] sm:$0xff] }
 0x547   :  { %v2895_v3 = vpop.eup %2894  ;;  %v6046_v38 = vadd.f32 %v2083_v9, %v2082_v13  ;;  %v7180_v13 = vld [vmem:[#allocation84_spill] sm:$0xff]  ;;  %v3341_v9 = vld [vmem:[#allocation7 + $0xe8] sm:$0xff] }
 0x548   :  { %v2190_v52 = vmul.f32 %v2895_v3, %v2189_v24  ;;  %v7181_v24 = vld [vmem:[#allocation53_spill] sm:$0xff] }
 0x549   :  { %2269 = vmatmul.f32.vlgmr.msrb.gmra.mxu2 %v6046_v38  ;;  %v7182_v3 = vld [vmem:[#allocation69_spill] sm:$0xff] }
 0x54a   :  { %v6050_v45 = vadd.f32 %v2191_v17, %v2190_v52  ;;  %2509 = vmatpush.msrb.mxu2 %v5739_v41  ;;  %v3313_v41 = vld [vmem:[#allocation5 + $0x130] sm:$0xff]  ;;  %v7183_v17 = vld [vmem:[#allocation103_spill] sm:$0xff] }
 0x54b   :  { %v3342_v52 = vld [vmem:[#allocation7 + $0xd0] sm:$0xff] }
 0x54c   :  { %2209 = vmatmul.f32.vlgmr.msrb.gmra.mxu3 %v6050_v45  ;;  %2229 = vmatmul.f32.vlgmr.msrb.gmra.mxu0 %v6050_v45 }
 0x54d   :  { %2249 = vmatmul.f32.vlgmr.msrb.gmra.mxu1 %v6050_v45  ;;  %2401 = vmatpush.msrb.mxu3 %v5760_v22  ;;  %v3317_v22 = vld [vmem:[#allocation5 + $0x100] sm:$0xff] }
 0x54e   :  { %2469 = vmatpush.msrb.mxu0 %v5763_v62  ;;  %2489 = vmatpush.msrb.mxu1 %v5766_v29  ;;  %v3318_v62 = vld [vmem:[#allocation5 + $0xe0] sm:$0xff]  ;;  %v3319_v29 = vld [vmem:[#allocation5 + $0xe8] sm:$0xff] }
 0x54f   :  { %2402 = vmatpush.msrb.mxu3 %v5770_v27  ;;  %2510 = vmatpush.msrb.mxu2 %v5743_v6  ;;  %v3314_v6 = vld [vmem:[#allocation5 + $0x110] sm:$0xff]  ;;  %v3320_v27 = vld [vmem:[#allocation5 + $0xc8] sm:$0xff] }
 0x550   :  { %2470 = vmatpush.msrb.mxu0 %v5773_v56  ;;  %2490 = vmatpush.msrb.mxu1 %v5776_v44  ;;  %v3321_v56 = vld [vmem:[#allocation5 + $0xd0] sm:$0xff] }
 0x551   :  { %2403 = vmatpush.msrb.mxu3 %v5780_v37  ;;  %2397 = vmatmul.f32.vlgmr.msra.gmra.mxu2 %v6050_v45  ;;  %v3322_v44 = vld [vmem:[#allocation5 + $0xb0] sm:$0xff]  ;;  %v3323_v37 = vld [vmem:[#allocation5 + $0xb8] sm:$0xff] }
 0x552   :  { %2471 = vmatpush.msrb.mxu0 %v5783_v46  ;;  %2491 = vmatpush.msrb.mxu1 %v5786_v54  ;;  %v3324_v46 = vld [vmem:[#allocation5 + $0x98] sm:$0xff]  ;;  %v3325_v54 = vld [vmem:[#allocation5 + $0xa0] sm:$0xff] }
 0x553   :  { %2404 = vmatpush.msrb.mxu3 %v5790_v51  ;;  %2511 = vmatpush.msrb.mxu2 %v5746_v28  ;;  %v3315_v28 = vld [vmem:[#allocation5 + $0x118] sm:$0xff]  ;;  %v3326_v51 = vld [vmem:[#allocation5 + $0x80] sm:$0xff] }
 0x554   :  { %2289 = vmatmul.f32.vlgmr.msra.gmra.mxu3 %v6046_v38  ;;  %2309 = vmatmul.f32.vlgmr.msra.gmra.mxu0 %v6046_v38 }
 0x555   :  { %2377 = vmatmul.f32.vlgmr.msra.gmra.mxu1 %v6050_v45  ;;  %2405 = vmatpush.msrb.mxu3 %v5796_v0  ;;  %v3327_v0 = vld [vmem:[#allocation5 + $0x88] sm:$0xff] }
 0x556   :  { %2472 = vmatpush.msrb.mxu0 %v5799_v2  ;;  %2492 = vmatpush.msrb.mxu1 %v3312_v35  ;;  %v3328_v2 = vld [vmem:[#allocation5 + $0x68] sm:$0xff]  ;;  %v7184_v35 = vld [vmem:[#allocation30_spill] sm:$0xff] }
 0x557   :  { %2406 = vmatpush.msrb.mxu3 %v5804_v1  ;;  %2512 = vmatpush.msrb.mxu2 %v3313_v41  ;;  %v7156_v1 = vld [vmem:[#allocation95_spill] sm:$0xff]  ;;  %v3343_v41 = vld [vmem:[#allocation7 + $0xb8] sm:$0xff] }
 0x558   :  { %2473 = vmatpush.msrb.mxu0 %v5807_v4  ;;  %2493 = vmatpush.msrb.mxu1 %v3314_v6  ;;  %v3329_v4 = vld [vmem:[#allocation5 + $0x70] sm:$0xff]  ;;  %v7185_v6 = vld [vmem:[#allocation45_spill] sm:$0xff] }
 0x559   :  { %2407 = vmatpush.msrb.mxu3 %v5812_v12  ;;  %2513 = vmatpush.msrb.mxu2 %v3315_v28  ;;  %v7157_v12 = vld [vmem:[#allocation72_spill] sm:$0xff]  ;;  %v7186_v28 = vld [vmem:[#allocation55_spill] sm:$0xff] }
 0x55a   :  { %2474 = vmatpush.msrb.mxu0 %v5815_v8  ;;  %2494 = vmatpush.msrb.mxu1 %v3316_v19  ;;  %v3330_v8 = vld [vmem:[#allocation5 + $0x50] sm:$0xff]  ;;  %v3344_v19 = vld [vmem:[#allocation7 + $0xa0] sm:$0xff] }
 0x55b   :  { %2408 = vmatpush.msrb.mxu3 %v5820_v21  ;;  %2514 = vmatpush.msrb.mxu2 %v3317_v22  ;;  %v7158_v21 = vld [vmem:[#allocation88_spill] sm:$0xff]  ;;  %v7187_v22 = vld [vmem:[#allocation57_spill] sm:$0xff] }
 0x55c   :  { %2475 = vmatpush.msrb.mxu0 %v5823_v11  ;;  %2495 = vmatpush.msrb.mxu1 %v3318_v62  ;;  %v3331_v11 = vld [vmem:[#allocation5 + $0x58] sm:$0xff]  ;;  %v7188_v62 = vld [vmem:[#allocation75_spill] sm:$0xff] }
 0x55d   :  { %2409 = vmatpush.msrb.mxu3 %v5830_v25  ;;  %2515 = vmatpush.msrb.mxu2 %v3319_v29  ;;  %v7159_v25 = vld [vmem:[#allocation65_spill] sm:$0xff]  ;;  %v3345_v29 = vld [vmem:[#allocation7 + $0x88] sm:$0xff] }
 0x55e   :  { %2476 = vmatpush.msrb.mxu0 %v5833_v33  ;;  %2496 = vmatpush.msrb.mxu1 %v3320_v27  ;;  %v3332_v33 = vld [vmem:[#allocation5 + $0x38] sm:$0xff] }
 0x55f   :  { %2410 = vmatpush.msrb.mxu3 %v5840_v58  ;;  %2516 = vmatpush.msrb.mxu2 %v3321_v56  ;;  %v7160_v58 = vld [vmem:[#allocation97_spill] sm:$0xff]  ;;  %v7190_v56 = vld [vmem:[#allocation50_spill] sm:$0xff] }
 0x560   :  { %2477 = vmatpush.msrb.mxu0 %v5843_v63  ;;  %2497 = vmatpush.msrb.mxu1 %v3322_v44  ;;  %v7161_v63 = vld [vmem:[#allocation70_spill] sm:$0xff]  ;;  %v7189_v27 = vld [vmem:[#allocation25_spill] sm:$0xff]  ;;  %v3346_v44 = vld [vmem:[#allocation7 + $0x70] sm:$0xff] }
 0x561   :  { %2411 = vmatpush.msrb.mxu3 %v5850_v39  ;;  %2517 = vmatpush.msrb.mxu2 %v3323_v37  ;;  %v7162_v39 = vld [vmem:[#allocation89_spill] sm:$0xff]  ;;  %v7191_v37 = vld [vmem:[#allocation59_spill] sm:$0xff] }
 0x562   :  { %2478 = vmatpush.msrb.mxu0 %v5853_v42  ;;  %2498 = vmatpush.msrb.mxu1 %v3324_v46  ;;  %v7163_v42 = vld [vmem:[#allocation74_spill] sm:$0xff]  ;;  %v3347_v46 = vld [vmem:[#allocation7 + $0x50] sm:$0xff] }
 0x563   :  { %2412 = vmatpush.msrb.mxu3 %v5858_v16  ;;  %2518 = vmatpush.msrb.mxu2 %v3325_v54  ;;  %v3333_v16 = vld [vmem:[#allocation5 + $0x20] sm:$0xff]  ;;  %v3348_v54 = vld [vmem:[#allocation7 + $0x58] sm:$0xff] }
 0x564   :  { %2479 = vmatpush.msrb.mxu0 %v5861_v40  ;;  %2499 = vmatpush.msrb.mxu1 %v3326_v51  ;;  %v7164_v40 = vld [vmem:[#allocation24_spill] sm:$0xff]  ;;  %v7192_v51 = vld [vmem:[#allocation107_spill] sm:$0xff] }
 0x565   :  { %2413 = vmatpush.msrb.mxu3 %v5866_v7  ;;  %2519 = vmatpush.msrb.mxu2 %v3327_v0  ;;  %v7165_v7 = vld [vmem:[#allocation23_spill] sm:$0xff]  ;;  %v3349_v0 = vld [vmem:[#allocation7 + $0x38] sm:$0xff] }
 0x566   :  { %2480 = vmatpush.msrb.mxu0 %v5869_v20  ;;  %2500 = vmatpush.msrb.mxu1 %v3328_v2  ;;  %v7166_v20 = vld [vmem:[#allocation100_spill] sm:$0xff]  ;;  %v3350_v2 = vld [vmem:[#allocation7 + $0x40] sm:$0xff] }
 0x567   :  { %2414 = vmatpush.msrb.mxu3 %v7156_v1  ;;  %2520 = vmatpush.msrb.mxu2 %v3329_v4  ;;  %v7193_v1 = vld [vmem:[#allocation31_spill] sm:$0xff]  ;;  %v3351_v4 = vld [vmem:[#allocation7 + $0x20] sm:$0xff] }
 0x568   :  { %2481 = vmatpush.msrb.mxu0 %v7157_v12  ;;  %2501 = vmatpush.msrb.mxu1 %v3330_v8  ;;  %v3352_v12 = vld [vmem:[#allocation7 + $0x28] sm:$0xff] }
 0x569   :  { %2415 = vmatpush.msrb.mxu3 %v7158_v21  ;;  %2521 = vmatpush.msrb.mxu2 %v3331_v11  ;;  %v3353_v8 = vld [vmem:[#allocation7 + $0x8] sm:$0xff]  ;;  %v3354_v21 = vld [vmem:[#allocation7 + $0x10] sm:$0xff] }
 0x56a   :  { %2482 = vmatpush.msrb.mxu0 %v7159_v25  ;;  %2502 = vmatpush.msrb.mxu1 %v3332_v33 }
 0x56b   :  { %2416 = vmatpush.msrb.mxu3 %v7160_v58  ;;  %2522 = vmatpush.msrb.mxu2 %v7161_v63  ;;  %v7194_v58 = vld [vmem:[#allocation85_spill] sm:$0xff] }
 0x56c   :  { %2417 = vmatmul.f32.vlgmr.msrb.gmra.mxu3 %v6050_v45  ;;  %2483 = vmatpush.msrb.mxu0 %v7162_v39 }
 0x56d   :  { %2529 = vmatpush.msra.mxu3 %v7163_v42  ;;  %2503 = vmatpush.msrb.mxu1 %v3333_v16  ;;  %v7195_v16 = vld [vmem:[#allocation98_spill] sm:$0xff] }
 0x56e   :  { %2484 = vmatpush.msrb.mxu0 %v7164_v40  ;;  %2523 = vmatpush.msrb.mxu2 %v7165_v7  ;;  %v7196_v40 = vld [vmem:[#allocation19_spill] sm:$0xff] }
 0x56f   :  { %2530 = vmatpush.msra.mxu3 %v7166_v20  ;;  %2504 = vmatpush.msrb.mxu1 %v3334_v48  ;;  %v373_v7 = vadd.f32 %v7196_v40, %v7195_v16  ;;  %v7197_v48 = vld [vmem:[#allocation93_spill] sm:$0xff] }
 0x570   :  { %2549 = vmatpush.msra.mxu0 %v7167_v31  ;;  %2524 = vmatpush.msrb.mxu2 %v7169_v47 }
 0x571   :  { %2569 = vmatpush.msra.mxu1 %v3335_v57  ;;  %2531 = vmatpush.msra.mxu3 %v7168_v18 }
 0x572   :  { %2550 = vmatpush.msra.mxu0 %v7170_v49 }
 0x573   :  { %2570 = vmatpush.msra.mxu1 %v3336_v50  ;;  %2532 = vmatpush.msra.mxu3 %v7171_v36  ;;  %v7198_v50 = vld [vmem:[#allocation20_spill] sm:$0xff] }
 0x574   :  { %2551 = vmatpush.msra.mxu0 %v7172_v43 }
 0x575   :  { %2571 = vmatpush.msra.mxu1 %v3337_v61  ;;  %2533 = vmatpush.msra.mxu3 %v7173_v55 }
 0x576   :  { %2552 = vmatpush.msra.mxu0 %v7174_v14 }
 0x577   :  { %2572 = vmatpush.msra.mxu1 %v3338_v30  ;;  %2534 = vmatpush.msra.mxu3 %v7175_v10 }
 0x578   :  { %2553 = vmatpush.msra.mxu0 %v7176_v53 }
 0x579   :  { %2573 = vmatpush.msra.mxu1 %v3339_v59  ;;  %2535 = vmatpush.msra.mxu3 %v7177_v26 }
 0x57a   :  { %2554 = vmatpush.msra.mxu0 %v7178_v23 }
 0x57b   :  { %2574 = vmatpush.msra.mxu1 %v3340_v60  ;;  %2536 = vmatpush.msra.mxu3 %v7179_v15 }
 0x57c   :  { %2555 = vmatpush.msra.mxu0 %v7180_v13 }
 0x57d   :  { %2575 = vmatpush.msra.mxu1 %v3341_v9  ;;  %2537 = vmatpush.msra.mxu3 %v7181_v24 }
 0x57e   :  { %2556 = vmatpush.msra.mxu0 %v7182_v3 }
 0x57f   :  { %2576 = vmatpush.msra.mxu1 %v3342_v52  ;;  %2538 = vmatpush.msra.mxu3 %v7183_v17  ;;  %v7199_v17 = vld [vmem:[#allocation56_spill] sm:$0xff] }
 0x580   :  { %2557 = vmatpush.msra.mxu0 %v7184_v35  ;;  %v414_v35 = vadd.f32 %v7199_v17, %v6999_v32  ;;  %v2649_v17 = vld [vmem:[#allocation8 + $0x60] sm:$0xff] }
 0x581   :  { %2577 = vmatpush.msra.mxu1 %v3343_v41  ;;  %2539 = vmatpush.msra.mxu3 %v7185_v6 }
 0x582   :  { %2558 = vmatpush.msra.mxu0 %v7186_v28 }
 0x583   :  { %2578 = vmatpush.msra.mxu1 %v3344_v19  ;;  %2540 = vmatpush.msra.mxu3 %v7187_v22 }
 0x584   :  { %2559 = vmatpush.msra.mxu0 %v7188_v62 }
 0x585   :  { %2579 = vmatpush.msra.mxu1 %v3345_v29  ;;  %2541 = vmatpush.msra.mxu3 %v7189_v27 }
 0x586   :  { %2560 = vmatpush.msra.mxu0 %v7190_v56 }
 0x587   :  { %2580 = vmatpush.msra.mxu1 %v3346_v44  ;;  %2542 = vmatpush.msra.mxu3 %v7191_v37 }
 0x588   :  { %2561 = vmatpush.msra.mxu0 %v3347_v46  ;;  %v7200_v46 = vld [vmem:[#allocation15_spill] sm:$0xff] }
 0x589   :  { %2581 = vmatpush.msra.mxu1 %v3348_v54  ;;  %2543 = vmatpush.msra.mxu3 %v7192_v51 }
 0x58a   :  { %2562 = vmatpush.msra.mxu0 %v3349_v0 }
 0x58b   :  { %2582 = vmatpush.msra.mxu1 %v3350_v2  ;;  %2544 = vmatpush.msra.mxu3 %v7193_v1 }
 0x58c   :  { %2563 = vmatpush.msra.mxu0 %v3351_v4 }
 0x58d   :  { %2583 = vmatpush.msra.mxu1 %v3352_v12 }
 0x58e   :  { %2564 = vmatpush.msra.mxu0 %v3353_v8 }
 0x58f   :  { %2584 = vmatpush.msra.mxu1 %v3354_v21 }
 0x5c9   :  { %v2230_v20 = vpop.f32.mrf.mxu0 }
 0x5ca   :  { %v2250_v11 = vpop.f32.mrf.mxu1  ;;  %v2231_v36 = vadd.f32 %v2230_v20, %v7198_v50 }
 0x5cb   :  { %v2251_v41 = vadd.f32 %v2250_v11, %v7154_v34 }
 0x5cc   :  { %v2270_v25 = vpop.f32.mrf.mxu2 }
 0x5cf   :  { %v2210_v33 = vpop.f32.mrf.mxu3 }
 0x5d0   :  { %v2211_v63 = vadd.f32 %v2210_v33, %v7194_v58 }
 0x5d1   :  { %v2310_v6 = vpop.f32.mrf.mxu0 }
 0x5d2   :  { %v2313_v39 = vadd.f32 %v2270_v25, %v2211_v63  ;;  %v2378_v42 = vpop.f32.mrf.mxu1  ;;  %v2353_v54 = vadd.f32 %v7200_v46, %v2310_v6  ;;  %v2646_v6 = vld [vmem:[#allocation8 + $0x48] sm:$0xff] }
 0x5d3   :  { %v2421_v31 = vadd.f32 %v2378_v42, %v7197_v48 }
 0x5d4   :  { %v2747_v57 = vmul.f32 -1.442695, %v2313_v39  ;;  %v2398_v18 = vpop.f32.mrf.mxu2 }
 0x5d5   :  { %v2749_v47 = vmul.f32 -1.442695, %v2421_v31  ;;  %v2441_v49 = vadd.f32 %v2398_v18, %v373_v7 }
 0x5d6   :  { %2896 = vpow2.f32 %v2747_v57 }
 0x5d7   :  { %2898 = vpow2.f32 %v2749_v47  ;;  %v2750_v43 = vmul.f32 -1.442695, %v2441_v49  ;;  %v2290_v61 = vpop.f32.mrf.mxu3 }
 0x5d8   :  { %v2333_v55 = vadd.f32 %v2290_v61, %v2231_v36 }
 0x5d9   :  { %2900 = vpow2.f32 %v2750_v43 }
 0x5da   :  { %v2748_v14 = vmul.f32 -1.442695, %v2333_v55 }
 0x5dc   :  { %v2897_v30 = vpop.eup %2896  ;;  %2902 = vpow2.f32 %v2748_v14 }
 0x5dd   :  { %v2899_v10 = vpop.eup %2898  ;;  %v2317_v53 = vadd.f32 1.0, %v2897_v30 }
 0x5de   :  { %v2425_v59 = vadd.f32 1.0, %v2899_v10 }
 0x5df   :  { %v2901_v26 = vpop.eup %2900  ;;  %2904 = vrcp.f32 %v2317_v53  ;;  %v2327_v19 = vand.u32 2147483647, %v2317_v53  ;;  %v2329_v22 = vand.u32 2147483648, %v2317_v53  ;;  %vm2323_vm11 = vweird.f32 %v2317_v53 }
 0x5e0   :  { %2906 = vrcp.f32 %v2425_v59  ;;  %v6134_v23 = vadd.f32 1.0, %v2901_v26  ;;  %v2435_v56 = vand.u32 2147483647, %v2425_v59  ;;  %v2437_v44 = vand.u32 2147483648, %v2425_v59 }
 0x5e1   :  { %vm2431_vm12 = vweird.f32 %v2425_v59  ;;  %vm2328_vm14 = vcmp.eq.f32.partialorder %v2327_v19, 8.507059e+37  ;;  %v2330_v1 = vor.u32 1.1754944e-38, %v2329_v22 }
 0x5e2   :  { %v2903_v60 = vpop.eup %2902  ;;  %2908 = vrcp.f32 %v6134_v23  ;;  %vm2436_vm0 = vcmp.eq.f32.partialorder %v2435_v56, 8.507059e+37  ;;  %v2438_v11 = vor.u32 1.1754944e-38, %v2437_v44  ;;  %v2457_v48 = vand.u32 2147483648, %v6134_v23  ;;  %v2643_v56 = vld [vmem:[#allocation8 + $0x30] sm:$0xff] }
 0x5e3   :  { %v6137_v15 = vadd.f32 1.0, %v2903_v60  ;;  %vm2451_vm4 = vweird.f32 %v6134_v23  ;;  %v2455_v49 = vand.u32 2147483647, %v6134_v23 }
 0x5e4   :  { %v2458_v55 = vor.u32 1.1754944e-38, %v2457_v48 }
 0x5e5   :  { %v2905_v13 = vpop.eup %2904  ;;  %2910 = vrcp.f32 %v6137_v15  ;;  %v2349_v39 = vand.u32 2147483648, %v6137_v15  ;;  %v2347_v31 = vand.u32 2147483647, %v6137_v15  ;;  %vm2343_vm3 = vweird.f32 %v6137_v15 }
 0x5e6   :  { %v2907_v9 = vpop.eup %2906  ;;  %v2319_v24 = vmul.f32 %v2905_v13, %v2317_v53  ;;  %vm2324_vm9 = vweird.f32 %v2905_v13  ;;  %vm2456_vm8 = vcmp.eq.f32.partialorder %v2455_v49, 8.507059e+37  ;;  %v3355_v49 = vld [vmem:[%s6189_s8] ss:$0 sm:$0xff] }
 0x5e7   :  { %v2427_v3 = vmul.f32 %v2907_v9, %v2425_v59  ;;  %vm2432_vm10 = vweird.f32 %v2907_v9  ;;  %vm2325_vm13 = vmor %vm2323_vm11, %vm2324_vm9  ;;  %v2350_v43 = vor.u32 1.1754944e-38, %v2349_v39  ;;  %vm2348_vm7 = vcmp.eq.f32.partialorder %v2347_v31, 8.507059e+37 }
 0x5e8   :  { %v6140_v52 = vpop.eup %2908  ;;  %v2320_v28 = vsub.f32 1.0, %v2319_v24  ;;  %vm2433_vm15 = vmor %vm2431_vm12, %vm2432_vm10 }
 0x5e9   :  { %v2447_v62 = vmul.f32 %v6140_v52, %v6134_v23  ;;  %v2428_v29 = vsub.f32 1.0, %v2427_v3  ;;  %vm2452_vm2 = vweird.f32 %v6140_v52  ;;  %v2652_v3 = vld [vmem:[#allocation8 + $0x78] sm:$0xff] }
 0x5ea   :  { %v2321_v27 = vmul.f32 %v2905_v13, %v2320_v28  ;;  %vm2453_vm6 = vmor %vm2451_vm4, %vm2452_vm2  ;;  %2657 = vmatpush.msra.mxu2 %v2652_v3  ;;  %v2645_v28 = vld [vmem:[#allocation8 + $0x40] sm:$0xff] }
 0x5eb   :  { %v2911_v37 = vpop.eup %2910  ;;  %v2448_v51 = vsub.f32 1.0, %v2447_v62  ;;  %v2429_v0 = vmul.f32 %v2907_v9, %v2428_v29  ;;  %v2644_v29 = vld [vmem:[#allocation8 + $0x38] sm:$0xff] }
 0x5ec   :  { %v2322_v32 = vadd.f32 %v2905_v13, %v2321_v27  ;;  %v2339_v2 = vmul.f32 %v2911_v37, %v6137_v15  ;;  %vm2344_vm1 = vweird.f32 %v2911_v37 }
 0x5ed   :  { %v2449_v4 = vmul.f32 %v6140_v52, %v2448_v51  ;;  %v2430_v12 = vadd.f32 %v2907_v9, %v2429_v0  ;;  %vm2345_vm5 = vmor %vm2343_vm3, %vm2344_vm1  ;;  %v2641_v0 = vld [vmem:[#allocation8 + $0x20] sm:$0xff] }
 0x5ee   :  { %v2326_v8 = vsel %vm2325_vm13, %v2905_v13, %v2322_v32  ;;  %v2340_v21 = vsub.f32 1.0, %v2339_v2  ;;  %v2639_v2 = vld [vmem:[#allocation8 + $0x10] sm:$0xff] }
 0x5ef   :  { %v2331_v25 = vsel %vm2328_vm14, %v2330_v1, %v2326_v8  ;;  %v2418_v33 = vpop.f32.mrf.mxu3  ;;  %v2434_v63 = vsel %vm2433_vm15, %v2907_v9, %v2430_v12  ;;  %v2450_v20 = vadd.f32 %v6140_v52, %v2449_v4  ;;  %v2638_v1 = vld [vmem:[#allocation8 + $0x8] sm:$0xff]  ;;  %v2637_v8 = vld [vmem:[#allocation8] sm:$0xff] }
 0x5f0   :  { %v2354_v42 = vmul.f32 %v2353_v54, %v2331_v25  ;;  %v2341_v16 = vmul.f32 %v2911_v37, %v2340_v21  ;;  %v2439_v40 = vsel %vm2436_vm0, %v2438_v11, %v2434_v63  ;;  %v2461_v7 = vadd.f32 %v6032_v5, %v2418_v33  ;;  %v2642_v54 = vld [vmem:[#allocation8 + $0x28] sm:$0xff] }
 0x5f1   :  { %v2454_v61 = vsel %vm2453_vm6, %v6140_v52, %v2450_v20  ;;  %v2651_v52 = vld [vmem:[#allocation8 + $0x70] sm:$0xff] }
 0x5f2   :  { %v2355_v57 = vadd.f32 %v2354_v42, %v2251_v41  ;;  %v2462_v18 = vmul.f32 %v2461_v7, %v2439_v40  ;;  %v2342_v47 = vadd.f32 %v2911_v37, %v2341_v16  ;;  %v2459_v30 = vsel %vm2456_vm8, %v2458_v55, %v2454_v61  ;;  %2658 = vmatpush.msra.mxu2 %v2651_v52 }
 0x5f3   :  { %v2465_v59 = vsub.f32 1.0, %v2459_v30  ;;  %v2467_v9 = vmul.f32 %v2459_v30, %v6050_v45  ;;  %v2647_v45 = vld [vmem:[#allocation8 + $0x50] sm:$0xff] }
 0x5f4   :  { %2912 = vtanh.f32 %v2355_v57  ;;  %v2463_v5 = vadd.f32 %v2462_v18, %v414_v35  ;;  %v2346_v36 = vsel %vm2345_vm5, %v2911_v37, %v2342_v47  ;;  %v2648_v35 = vld [vmem:[#allocation8 + $0x58] sm:$0xff] }
 0x5f5   :  { %v2351_v14 = vsel %vm2348_vm7, %v2350_v43, %v2346_v36 }
 0x5f6   :  { %2914 = vtanh.f32 %v2463_v5  ;;  %v2357_v10 = vsub.f32 1.0, %v2351_v14  ;;  %v2359_v23 = vmul.f32 %v2351_v14, %v6046_v38  ;;  %v2650_v38 = vld [vmem:[#allocation8 + $0x68] sm:$0xff] }
 0x5f7   :  { %2659 = vmatpush.msra.mxu2 %v2650_v38 }
 0x5f9   :  { %2660 = vmatpush.msra.mxu2 %v2649_v17 }
 0x5fa   :  { %v2913_v53 = vpop.eup %2912 }
 0x5fb   :  { %v2358_v26 = vmul.f32 %v2913_v53, %v2357_v10  ;;  %2661 = vmatpush.msra.mxu2 %v2648_v35 }
 0x5fc   :  { %v2915_v60 = vpop.eup %2914 }
 0x5fd   :  { %v2466_v15 = vmul.f32 %v2915_v60, %v2465_v59  ;;  %v6162_v13 = vadd.f32 %v2359_v23, %v2358_v26  ;;  %2662 = vmatpush.msra.mxu2 %v2647_v45 }
 0x5ff   :  { %2545 = vmatmul.f32.vlgmr.msra.gmra.mxu3 %v6162_v13  ;;  %v2468_v24 = vadd.f32 %v2467_v9, %v2466_v15  ;;  %2663 = vmatpush.msra.mxu2 %v2646_v6 }
 0x601   :  { %2485 = vmatmul.f32.vlgmr.msrb.gmra.mxu0 %v2468_v24  ;;  %2505 = vmatmul.f32.vlgmr.msrb.gmra.mxu1 %v2468_v24 }
 0x602   :  { %2525 = vmatmul.f32.vlgmr.msrb.gmra.mxu2 %v2468_v24 }
 0x603   :  { %2664 = vmatpush.msra.mxu2 %v2645_v28 }
 0x605   :  { %2665 = vmatpush.msra.mxu2 %v2644_v29 }
 0x607   :  { %2666 = vmatpush.msra.mxu2 %v2643_v56 }
 0x609   :  { %2565 = vmatmul.f32.vlgmr.msra.gmra.mxu0 %v6162_v13  ;;  %2585 = vmatmul.f32.vlgmr.msra.gmra.mxu1 %v6162_v13 }
 0x60a   :  { %2667 = vmatpush.msra.mxu2 %v2642_v54 }
 0x60c   :  { %2668 = vmatpush.msra.mxu2 %v2641_v0 }
 0x67e   :  { %v2486_v41 = vpop.f32.mrf.mxu0  ;;  %v2506_v22 = vpop.f32.mrf.mxu1 }
 0x67f   :  { %v2487_v19 = vadd.f32 %v2486_v41, %v7194_v58  ;;  %v2507_v44 = vadd.f32 %v2506_v22, %v7198_v50  ;;  %v2640_v58 = vld [vmem:[#allocation8 + $0x18] sm:$0xff] }
 0x680   :  { %2669 = vmatpush.msra.mxu2 %v2640_v58 }
 0x682   :  { %v2546_v62 = vpop.f32.mrf.mxu3  ;;  %2670 = vmatpush.msra.mxu2 %v2639_v2 }
 0x683   :  { %v2589_v27 = vadd.f32 %v2546_v62, %v2487_v19 }
 0x684   :  { %2671 = vmatpush.msra.mxu2 %v2638_v1 }
 0x685   :  { %v2751_v37 = vmul.f32 -1.442695, %v2589_v27  ;;  %v2526_v31 = vpop.f32.mrf.mxu2 }
 0x686   :  { %v2566_v46 = vpop.f32.mrf.mxu0  ;;  %2672 = vmatpush.msra.mxu2 %v2637_v8  ;;  %v2586_v7 = vpop.f32.mrf.mxu1  ;;  %v2527_v43 = vadd.f32 %v2526_v31, %v7154_v34  ;;  %v2765_v34 = vld [vmem:[%s6191_s10] ss:$0 sm:$0xff] }
 0x687   :  { %2916 = vpow2.f32 %v2751_v37  ;;  %v2609_v51 = vadd.f32 %v2566_v46, %v2507_v44  ;;  %v2629_v5 = vadd.f32 %v3355_v49, %v2586_v7 }
 0x689   :  { %v2752_v32 = vmul.f32 -1.442695, %v2609_v51 }
 0x68b   :  { %2918 = vpow2.f32 %v2752_v32 }
 0x68d   :  { %v2917_v4 = vpop.eup %2916 }
 0x68e   :  { %v2593_v12 = vadd.f32 1.0, %v2917_v4 }
 0x690   :  { %2920 = vrcp.f32 %v2593_v12  ;;  %v2605_v39 = vand.u32 2147483648, %v2593_v12  ;;  %v2603_v40 = vand.u32 2147483647, %v2593_v12  ;;  %vm2599_vm10 = vweird.f32 %v2593_v12 }
 0x691   :  { %v2919_v50 = vpop.eup %2918 }
 0x692   :  { %v2613_v21 = vadd.f32 1.0, %v2919_v50  ;;  %v2606_v57 = vor.u32 1.1754944e-38, %v2605_v39  ;;  %vm2604_vm12 = vcmp.eq.f32.partialorder %v2603_v40, 8.507059e+37 }
 0x694   :  { %2922 = vrcp.f32 %v2613_v21  ;;  %v2625_v55 = vand.u32 2147483648, %v2613_v21  ;;  %vm2619_vm14 = vweird.f32 %v2613_v21  ;;  %v2623_v30 = vand.u32 2147483647, %v2613_v21 }
 0x696   :  { %v2921_v11 = vpop.eup %2920  ;;  %v2626_v59 = vor.u32 1.1754944e-38, %v2625_v55  ;;  %vm2624_vm0 = vcmp.eq.f32.partialorder %v2623_v30, 8.507059e+37 }
 0x697   :  { %v2595_v25 = vmul.f32 %v2921_v11, %v2593_v12  ;;  %vm2600_vm9 = vweird.f32 %v2921_v11 }
 0x698   :  { %vm2601_vm11 = vmor %vm2599_vm10, %vm2600_vm9 }
 0x699   :  { %v2596_v33 = vsub.f32 1.0, %v2595_v25 }
 0x69a   :  { %v2923_v63 = vpop.eup %2922 }
 0x69b   :  { %v2615_v42 = vmul.f32 %v2923_v63, %v2613_v21  ;;  %v2597_v16 = vmul.f32 %v2921_v11, %v2596_v33  ;;  %vm2620_vm13 = vweird.f32 %v2923_v63 }
 0x69c   :  { %vm2621_vm15 = vmor %vm2619_vm14, %vm2620_vm13 }
 0x69d   :  { %v2616_v20 = vsub.f32 1.0, %v2615_v42  ;;  %v2598_v48 = vadd.f32 %v2921_v11, %v2597_v16 }
 0x69f   :  { %v2617_v18 = vmul.f32 %v2923_v63, %v2616_v20  ;;  %v2602_v47 = vsel %vm2601_vm11, %v2921_v11, %v2598_v48 }
 0x6a0   :  { %v2607_v36 = vsel %vm2604_vm12, %v2606_v57, %v2602_v47 }
 0x6a1   :  { %v2618_v61 = vadd.f32 %v2923_v63, %v2617_v18  ;;  %v2630_v14 = vmul.f32 %v2629_v5, %v2607_v36 }
 0x6a3   :  { %v2631_v10 = vadd.f32 %v2630_v14, %v2527_v43  ;;  %v2622_v53 = vsel %vm2621_vm15, %v2923_v63, %v2618_v61 }
 0x6a4   :  { %v2627_v26 = vsel %vm2624_vm0, %v2626_v59, %v2622_v53 }
 0x6a5   :  { %2924 = vtanh.f32 %v2631_v10  ;;  %v2633_v23 = vsub.f32 1.0, %v2627_v26  ;;  %v2635_v9 = vmul.f32 %v2627_v26, %v6162_v13 }
 0x6ab   :  { %v2925_v60 = vpop.eup %2924 }
 0x6ac   :  { %v2634_v15 = vmul.f32 %v2925_v60, %v2633_v23 }
 0x6ae   :  { %v2636_v24 = vadd.f32 %v2635_v9, %v2634_v15 }
 0x6b0   :  { %2673 = vmatmul.f32.vlgmr.msra.gmra.mxu2 %v2636_v24 }
 0x733   :  { %v2674_v3 = vpop.f32.mrf.mxu2 }
 0x734   :  { %v2675_v52 = vadd.f32 %v2765_v34, %v2674_v3 }
 0x736   :  { %2677 = vst [vmem:[#allocation10] sm:$0xff] %v2675_v52 }
 0x737   :  { %2688 = dma.vmem_to_hbm [thread:$0]  %s2684_s1, 128, %s2686_s16, [#allocation4]  }
 0x738   :  { %3482 = dma.done.wait [#allocation4], 128  }
 0x739   :  { %3483 = vsyncadd [#allocation4], 4294967168 }
 0x73a   :  { %2693 = vsyncpa [#allocation3], 1 }
 0x73b   :  { %2694 = vsyncpa [#allocation6], 1 }
 0x73c   :  { %2695 = vsyncpa [#allocation9], 1 }
 0x73d   :  { %2696 = vsyncpa [#allocation4], 1 }

</bundles_post_ra>
